<compile_context>
chip_gen: v6e
topology: v6e:2x2x1
jax: 0.10.0
libtpu: 0.0.40
codegen_flags: <defaults>
</compile_context>

<pallas_src>
import math
import functools

import jax
import jax.numpy as jnp
from jax.experimental import pallas as pl
from jax.experimental.pallas import tpu as pltpu

_MASK_VALUE = -1e30      # finite "minus infinity": avoids 0/0 NaN on fully-masked rows
_BF16 = jnp.bfloat16

_single_buffer_weights_ok = None   # cached: does this jax/Mosaic build accept pl.Buffered(1)?


# ----------------------------- host-side parameter conversion ----------------------------------

def convert_params(params, num_heads):
    """fp32 PyTorch-style params -> fused bf16 matmul weights.

    Self-attn Q/K/V are concatenated into one (D, 3D) weight, cross-attn K/V into (D, 2D);
    the 1/sqrt(head_size) query scale is folded into the Q weight and bias.
    """
    (n1g, n1b, n2g, n2b, n3g, n3b,
     sa_wq, sa_bq, sa_wk, sa_bk, sa_wv, sa_bv, sa_wo, sa_bo,
     ca_wq, ca_bq, ca_wk, ca_bk, ca_wv, ca_bv, ca_wo, ca_bo,
     ff_w1, ff_b1, ff_w2, ff_b2) = params
    D = sa_wq.shape[0]
    inv = 1.0 / math.sqrt(D // num_heads)

    sa_wqkv = jnp.concatenate([sa_wq * inv, sa_wk, sa_wv], axis=1).astype(_BF16)
    sa_bqkv = jnp.concatenate([sa_bq * inv, sa_bk, sa_bv], axis=1).astype(jnp.float32)
    ca_wkv = jnp.concatenate([ca_wk, ca_wv], axis=1).astype(_BF16)
    ca_bkv = jnp.concatenate([ca_bk, ca_bv], axis=1).astype(jnp.float32)

    return (n1g, n1b, n2g, n2b, n3g, n3b,
            sa_wqkv, sa_bqkv, sa_wo.astype(_BF16), sa_bo,
            (ca_wq * inv).astype(_BF16), (ca_bq * inv).astype(jnp.float32), ca_wkv, ca_bkv,
            ca_wo.astype(_BF16), ca_bo,
            ff_w1.astype(_BF16), ff_b1, ff_w2.astype(_BF16), ff_b2)


# ----------------------------- Pallas kernel ---------------------------------------------------

def _gelu(x):
    # TODO(synk): tanh approximation; PyTorch nn.GELU() default is the exact erf form.
    return 0.5 * x * (1.0 + jnp.tanh(0.7978845608028654 * (x + 0.044715 * x * x * x)))


def _decoder_layer_kernel(num_heads, head_size, causal_tgt, has_tgt_mask, has_src_mask, *refs):
    idx = 0
    x_ref = refs[idx]; idx += 1
    enc_ref = refs[idx]; idx += 1
    tmask_ref = None
    if has_tgt_mask:
        tmask_ref = refs[idx]; idx += 1
    smask_ref = None
    if has_src_mask:
        smask_ref = refs[idx]; idx += 1
    (n1g_ref, n1b_ref, n2g_ref, n2b_ref, n3g_ref, n3b_ref,
     sa_wqkv_ref, sa_bqkv_ref, sa_wo_ref, sa_bo_ref,
     ca_wq_ref, ca_bq_ref, ca_wkv_ref, ca_bkv_ref, ca_wo_ref, ca_bo_ref,
     ff_w1_ref, ff_b1_ref, ff_w2_ref, ff_b2_ref) = refs[idx:idx + 20]
    out_ref = refs[idx + 20]

    H, hd = num_heads, head_size
    bb, T, D = x_ref.shape
    S = enc_ref.shape[1]

    # Fold the batch-block into the row dim: all LN / projections / FFN see (bb*T, D) rows.
    x = x_ref[...].reshape(bb * T, D)        # fp32 residual stream
    enc = enc_ref[...].reshape(bb * S, D)

    # ---- additive mask biases (0 = keep, -1e30 = drop) ----
    if causal_tgt:
        # Generated in-kernel: no (B, T, T) mask DMA from HBM.
        row = jax.lax.broadcasted_iota(jnp.int32, (T, T), 0)
        col = jax.lax.broadcasted_iota(jnp.int32, (T, T), 1)
        tgt_bias = jnp.where(col <= row, 0.0, _MASK_VALUE)[None]        # (1, T, T)
    elif has_tgt_mask:
        tgt_bias = jnp.where(tmask_ref[...] > 0.0, 0.0, _MASK_VALUE)    # (bb, T, T)
    else:
        tgt_bias = None
    if has_src_mask:
        src_bias = jnp.where(smask_ref[...] > 0.0, 0.0, _MASK_VALUE)    # (bb, T, S)
    else:
        src_bias = None

    def layernorm(v, g_ref, b_ref):
        # BertLayerNorm: biased variance, eps inside the sqrt (eps = 1e-12).
        u = jnp.mean(v, axis=-1, keepdims=True)
        d = v - u
        s = jnp.mean(d * d, axis=-1, keepdims=True)
        return g_ref[...] * (d * jax.lax.rsqrt(s + 1e-12)) + b_ref[...]

    def attention(q2, k2, v2, Tq, Tk, bias, bias_per_batch, wo_ref, bo_ref):
        """q2: (bb*Tq, D), k2/v2: (bb*Tk, D) fp32.  Returns (bb*Tq, D) fp32."""
        def split_heads(t2, L):
            # (bb*L, D) -> (H*bb, L, hd): H lane slices + one stack, then a layout-preserving
            # leading-dim regroup.
            # TODO(synk): replace with a single relayout (einshape) once verified on Mosaic.
            th = jnp.stack([t2[:, h * hd:(h + 1) * hd] for h in range(H)], axis=0)
            return th.reshape(H * bb, L, hd).astype(_BF16)

        qh = split_heads(q2, Tq)
        kh = split_heads(k2, Tk)
        vh = split_heads(v2, Tk)

        # Single-batch-dim contractions over n = head*batch.
        scores = jnp.einsum('nqd,nkd->nqk', qh, kh,
                            preferred_element_type=jnp.float32)          # (H*bb, Tq, Tk)
        if bias is not None:
            if bias_per_batch:
                scores = (scores.reshape(H, bb, Tq, Tk) + bias[None]).reshape(H * bb, Tq, Tk)
            else:
                scores = scores + bias                                    # (1, Tq, Tk) broadcast

        m = jnp.max(scores, axis=-1, keepdims=True)
        e = jnp.exp(scores - m)
        l = jnp.sum(e, axis=-1, keepdims=True)
        # Deferred softmax normalization: feed unnormalized e into the PV matmul and scale the
        # (n, Tq, hd) context instead of the (n, Tq, Tk) probabilities.
        ctx = jnp.einsum('nqk,nkd->nqd', e.astype(_BF16), vh,
                         preferred_element_type=jnp.float32)              # (H*bb, Tq, hd)
        ctx = ctx * pl.reciprocal(l, approx=True)

        # Merge heads (head-major columns, matching torch .view) and do ONE (D, D) output matmul.
        ctx3 = ctx.reshape(H, bb * Tq, hd)
        merged = jnp.concatenate([ctx3[h] for h in range(H)], axis=-1)    # (bb*Tq, D)
        return (jnp.dot(merged.astype(_BF16), wo_ref[...],
                        preferred_element_type=jnp.float32) + bo_ref[...])

    # ---- self-attention block (dropout = identity in eval) ----
    resid = x
    xn = layernorm(x, n1g_ref, n1b_ref).astype(_BF16)
    qkv = jnp.dot(xn, sa_wqkv_ref[...], preferred_element_type=jnp.float32) + sa_bqkv_ref[...]
    x = resid + attention(qkv[:, 0:D], qkv[:, D:2 * D], qkv[:, 2 * D:3 * D], T, T,
                          tgt_bias, has_tgt_mask, sa_wo_ref, sa_bo_ref)

    # ---- cross-attention block (K/V from raw encoder output, per the module) ----
    resid = x
    xn = layernorm(x, n2g_ref, n2b_ref).astype(_BF16)
    q = jnp.dot(xn, ca_wq_ref[...], preferred_element_type=jnp.float32) + ca_bq_ref[...]
    kv = jnp.dot(enc.astype(_BF16), ca_wkv_ref[...],
                 preferred_element_type=jnp.float32) + ca_bkv_ref[...]
    x = resid + attention(q, kv[:, 0:D], kv[:, D:2 * D], T, S,
                          src_bias, True, ca_wo_ref, ca_bo_ref)

    # ---- feed-forward block ----
    resid = x
    xn = layernorm(x, n3g_ref, n3b_ref).astype(_BF16)
    h1 = jnp.dot(xn, ff_w1_ref[...], preferred_element_type=jnp.float32) + ff_b1_ref[...]
    h1 = _gelu(h1)
    h2 = jnp.dot(h1.astype(_BF16), ff_w2_ref[...],
                 preferred_element_type=jnp.float32) + ff_b2_ref[...]
    x = resid + h2

    out_ref[...] = x.reshape(bb, T, D)


# ----------------------------- wrapper ---------------------------------------------------------

def _const_index_map(rank):
    return lambda b: (0,) * rank


def _vmem_cap_bytes():
    try:
        info = pltpu.get_tpu_info()
        cap = getattr(info, "vmem_capacity_bytes", None)
        if cap:
            return int(cap)
    except Exception:
        pass
    return 64 * 1024 * 1024   # conservative (v7x physical VMEM)


def _choose_block_batch(B, T):
    """Largest divisor of B with block_batch*T ~ 256, preferring an even grid (v7x: 2 TCs)."""
    target = max(1, -(-256 // max(T, 1)))
    divisors = [d for d in range(1, B + 1) if B % d == 0 and d <= target]
    even = [d for d in divisors if (B // d) % 2 == 0 and (B // d) >= 2]
    pool = even if even else divisors
    return max(pool) if pool else 1


def decoder_layer_pallas(x, enc_out, tgt_mask, src_mask, params, num_heads, block_batch=None):
    """Fused decoder layer.

    tgt_mask: "causal" (mask generated in-kernel), None (no mask), or (B, T, T) array
              with nonzero = attend.
    src_mask: None (no mask, e.g. all-ones) or (B, T, S) array with nonzero = attend.
    """
    global _single_buffer_weights_ok
    B, T, D = x.shape
    S = enc_out.shape[1]
    head_size = D // num_heads
    cparams = convert_params(params, num_heads)

    causal_tgt = isinstance(tgt_mask, str) and tgt_mask == "causal"
    has_tgt_mask = (not causal_tgt) and (tgt_mask is not None)
    has_src_mask = src_mask is not None

    bb = _choose_block_batch(B, T) if block_batch is None else block_batch
    assert B % bb == 0
    grid = (B // bb,)

    inputs = [x, enc_out]
    if has_tgt_mask:
        inputs.append(tgt_mask.astype(jnp.float32))
    if has_src_mask:
        inputs.append(src_mask.astype(jnp.float32))
    inputs.extend(cparams)

    def activation_specs():
        specs = [pl.BlockSpec((bb, T, D), lambda b: (b, 0, 0)),
                 pl.BlockSpec((bb, S, D), lambda b: (b, 0, 0))]
        if has_tgt_mask:
            specs.append(pl.BlockSpec((bb, T, T), lambda b: (b, 0, 0)))
        if has_src_mask:
            specs.append(pl.BlockSpec((bb, T, S), lambda b: (b, 0, 0)))
        return specs

    def param_specs(single_buffer):
        specs = []
        for p in cparams:
            if single_buffer:
                # Constant index_map -> double buffering buys nothing; halve the weight VMEM.
                specs.append(pl.BlockSpec(p.shape, _const_index_map(p.ndim),
                                          pipeline_mode=pl.Buffered(1)))
            else:
                specs.append(pl.BlockSpec(p.shape, _const_index_map(p.ndim)))
        return specs

    def vmem_limit(single_buffer):
        param_bytes = sum(int(p.nbytes) for p in cparams)
        n_rows, m_rows = bb * T, bb * S
        mlp = cparams[16].shape[1]
        block_bytes = 4 * (bb * T * D + bb * S * D + bb * T * D)           # x, enc, out blocks
        if has_tgt_mask:
            block_bytes += 4 * bb * T * T
        if has_src_mask:
            block_bytes += 4 * bb * T * S
        scratch = 4 * num_heads * bb * T * max(T, S) * 3                   # scores / exp / bf16 p
        scratch += 4 * n_rows * mlp * 2                                    # FFN hidden f32 + bf16
        scratch += 4 * (n_rows + m_rows) * D * 8                           # proj / relayout copies
        needed = param_bytes * (1 if single_buffer else 2) + 2 * block_bytes + scratch
        cap = _vmem_cap_bytes()
        return int(min(int(0.8 * cap), max(32 * 1024 * 1024, int(1.25 * needed))))

    kernel = functools.partial(_decoder_layer_kernel, num_heads, head_size,
                               causal_tgt, has_tgt_mask, has_src_mask)

    def build(single_buffer):
        return pl.pallas_call(
            kernel,
            out_shape=jax.ShapeDtypeStruct((B, T, D), jnp.float32),
            grid_spec=pltpu.PrefetchScalarGridSpec(
                num_scalar_prefetch=0,
                grid=grid,
                in_specs=activation_specs() + param_specs(single_buffer),
                out_specs=pl.BlockSpec((bb, T, D), lambda b: (b, 0, 0)),
            ),
            compiler_params=pltpu.CompilerParams(
                dimension_semantics=("parallel",),    # independent batch blocks -> megacore
                vmem_limit_bytes=vmem_limit(single_buffer),
            ),
        )

    order = [True, False] if _single_buffer_weights_ok is None else [_single_buffer_weights_ok]
    last_err = None
    for sb in order:
        try:
            result = build(sb)(*inputs)
            _single_buffer_weights_ok = sb
            return result
        except Exception as e:      # pl.Buffered(1) unsupported on this build -> default buffering
            last_err = e
    raise last_err


# ----------------------------- plain-JAX reference (fp32, mirrors the PyTorch module) ----------

def decoder_layer_ref(x, enc_out, tgt_mask, src_mask, params, num_heads):
    (n1g, n1b, n2g, n2b, n3g, n3b,
     sa_wq, sa_bq, sa_wk, sa_bk, sa_wv, sa_bv, sa_wo, sa_bo,
     ca_wq, ca_bq, ca_wk, ca_bk, ca_wv, ca_bv, ca_wo, ca_bo,
     ff_w1, ff_b1, ff_w2, ff_b2) = params
    D = x.shape[-1]
    H = num_heads
    hd = D // H

    def layernorm(v, g, b, eps=1e-12):
        u = jnp.mean(v, -1, keepdims=True)
        s = jnp.mean((v - u) ** 2, -1, keepdims=True)
        return g * ((v - u) / jnp.sqrt(s + eps)) + b

    def attention(q_in, k_in, v_in, mask, wq, bq, wk, bk, wv, bv, wo, bo):
        Bn, Tq = q_in.shape[0], q_in.shape[1]
        Tk = k_in.shape[1]
        q = q_in @ wq + bq
        k = k_in @ wk + bk
        v = v_in @ wv + bv
        split = lambda t, L: t.reshape(Bn, L, H, hd).transpose(0, 2, 1, 3)
        q = split(q, Tq) / math.sqrt(hd)
        k = split(k, Tk)
        v = split(v, Tk)
        scores = jnp.einsum('bhqd,bhkd->bhqk', q, k)
        if mask is not None:
            scores = jnp.where(mask[:, None, :, :], scores, _MASK_VALUE)
        attn = jax.nn.softmax(scores, axis=-1)
        ctx = jnp.einsum('bhqk,bhkd->bhqd', attn, v)
        ctx = ctx.transpose(0, 2, 1, 3).reshape(Bn, Tq, D)
        return ctx @ wo + bo

    resid = x
    xn = layernorm(x, n1g, n1b)
    x = resid + attention(xn, xn, xn, tgt_mask,
                          sa_wq, sa_bq, sa_wk, sa_bk, sa_wv, sa_bv, sa_wo, sa_bo)
    resid = x
    xn = layernorm(x, n2g, n2b)
    x = resid + attention(xn, enc_out, enc_out, src_mask,
                          ca_wq, ca_bq, ca_wk, ca_bk, ca_wv, ca_bv, ca_wo, ca_bo)
    resid = x
    xn = layernorm(x, n3g, n3b)
    h = jax.nn.gelu(xn @ ff_w1 + ff_b1, approximate=False)
    return resid + (h @ ff_w2 + ff_b2)


# ----------------------------- parameter init --------------------------------------------------

def init_params(key, dim, mlp_dim):
    keys = jax.random.split(key, 32)
    ki = iter(keys)

    def lin(fan_in, fan_out):
        w = jax.random.normal(next(ki), (fan_in, fan_out), jnp.float32) * 0.02
        b = jax.random.normal(next(ki), (1, fan_out), jnp.float32) * 0.01
        return w, b

    n1g = jnp.ones((1, dim), jnp.float32); n1b = jnp.zeros((1, dim), jnp.float32)
    n2g = jnp.ones((1, dim), jnp.float32); n2b = jnp.zeros((1, dim), jnp.float32)
    n3g = jnp.ones((1, dim), jnp.float32); n3b = jnp.zeros((1, dim), jnp.float32)

    sa_wq, sa_bq = lin(dim, dim); sa_wk, sa_bk = lin(dim, dim)
    sa_wv, sa_bv = lin(dim, dim); sa_wo, sa_bo = lin(dim, dim)
    ca_wq, ca_bq = lin(dim, dim); ca_wk, ca_bk = lin(dim, dim)
    ca_wv, ca_bv = lin(dim, dim); ca_wo, ca_bo = lin(dim, dim)
    ff_w1, ff_b1 = lin(dim, mlp_dim); ff_w2, ff_b2 = lin(mlp_dim, dim)

    return (n1g, n1b, n2g, n2b, n3g, n3b,
            sa_wq, sa_bq, sa_wk, sa_bk, sa_wv, sa_bv, sa_wo, sa_bo,
            ca_wq, ca_bq, ca_wk, ca_bk, ca_wv, ca_bv, ca_wo, ca_bo,
            ff_w1, ff_b1, ff_w2, ff_b2)


# ----------------------------- main -------------------------------------------------------------

if __name__ == "__main__":
    B, T, S, D, HEADS, MLP = 4, 8, 16, 32, 4, 64

    key = jax.random.PRNGKey(0)
    kx, ke, kp = jax.random.split(key, 3)

    x = jax.random.normal(kx, (B, T, D), jnp.float32)
    enc_out = jax.random.normal(ke, (B, S, D), jnp.float32)
    params = init_params(kp, D, MLP)

    # causal target mask (True = attend), full source mask.
    tgt_mask_bool = jnp.broadcast_to(jnp.tril(jnp.ones((T, T), jnp.bool_)), (B, T, T))
    src_mask_bool = jnp.ones((B, T, S), jnp.bool_)

    ref = jax.block_until_ready(
        decoder_layer_ref(x, enc_out, tgt_mask_bool, src_mask_bool, params, HEADS))

    # Optimized path: causal mask generated in-kernel, all-ones src mask skipped entirely.
    out = jax.block_until_ready(decoder_layer_pallas(x, enc_out, "causal", None, params, HEADS))
    assert out.shape == (B, T, D) and out.dtype == jnp.float32
    if not jnp.allclose(out, ref, atol=2e-2, rtol=2e-2):
        raise AssertionError("Pallas kernel (in-kernel causal mask) mismatch vs. reference")

    # General path: explicit (B, T, T)/(B, T, S) masks DMA'd in (arbitrary-mask semantics).
    out2 = jax.block_until_ready(
        decoder_layer_pallas(x, enc_out, tgt_mask_bool, src_mask_bool, params, HEADS))
    if not jnp.allclose(out2, ref, atol=2e-2, rtol=2e-2):
        raise AssertionError("Pallas kernel (explicit masks) mismatch vs. reference")

    print("KERNEL_OK")
</pallas_src>

<mosaic_0001>
module attributes {stable_mosaic.version = 11 : i64} {
  func.func @_decoder_layer_kernel(%arg0: i32, %arg1: memref<2x8x32xf32, #tpu.memory_space<vmem>>, %arg2: memref<2x16x32xf32, #tpu.memory_space<vmem>>, %arg3: memref<1x32xf32, #tpu.memory_space<vmem>>, %arg4: memref<1x32xf32, #tpu.memory_space<vmem>>, %arg5: memref<1x32xf32, #tpu.memory_space<vmem>>, %arg6: memref<1x32xf32, #tpu.memory_space<vmem>>, %arg7: memref<1x32xf32, #tpu.memory_space<vmem>>, %arg8: memref<1x32xf32, #tpu.memory_space<vmem>>, %arg9: memref<32x96xbf16, #tpu.memory_space<vmem>>, %arg10: memref<1x96xf32, #tpu.memory_space<vmem>>, %arg11: memref<32x32xbf16, #tpu.memory_space<vmem>>, %arg12: memref<1x32xf32, #tpu.memory_space<vmem>>, %arg13: memref<32x32xbf16, #tpu.memory_space<vmem>>, %arg14: memref<1x32xf32, #tpu.memory_space<vmem>>, %arg15: memref<32x64xbf16, #tpu.memory_space<vmem>>, %arg16: memref<1x64xf32, #tpu.memory_space<vmem>>, %arg17: memref<32x32xbf16, #tpu.memory_space<vmem>>, %arg18: memref<1x32xf32, #tpu.memory_space<vmem>>, %arg19: memref<32x64xbf16, #tpu.memory_space<vmem>>, %arg20: memref<1x64xf32, #tpu.memory_space<vmem>>, %arg21: memref<64x32xbf16, #tpu.memory_space<vmem>>, %arg22: memref<1x32xf32, #tpu.memory_space<vmem>>, %arg23: memref<2x8x32xf32, #tpu.memory_space<vmem>>) attributes {dimension_semantics = [#tpu.dimension_semantics<parallel>], iteration_bounds = array<i64: 2>, scalar_prefetch = 0 : i64, scratch_operands = 0 : i64, tpu.core_type = #tpu.core_type<tc>, window_params = [{transform_indices = @transform_0, window_bounds = array<i64: 2, 8, 32>}, {transform_indices = @transform_1, window_bounds = array<i64: 2, 16, 32>}, {pipeline_mode = #tpu.pipeline_mode<synchronous>, transform_indices = @transform_2, window_bounds = array<i64: 1, 32>}, {pipeline_mode = #tpu.pipeline_mode<synchronous>, transform_indices = @transform_3, window_bounds = array<i64: 1, 32>}, {pipeline_mode = #tpu.pipeline_mode<synchronous>, transform_indices = @transform_4, window_bounds = array<i64: 1, 32>}, {pipeline_mode = #tpu.pipeline_mode<synchronous>, transform_indices = @transform_5, window_bounds = array<i64: 1, 32>}, {pipeline_mode = #tpu.pipeline_mode<synchronous>, transform_indices = @transform_6, window_bounds = array<i64: 1, 32>}, {pipeline_mode = #tpu.pipeline_mode<synchronous>, transform_indices = @transform_7, window_bounds = array<i64: 1, 32>}, {pipeline_mode = #tpu.pipeline_mode<synchronous>, transform_indices = @transform_8, window_bounds = array<i64: 32, 96>}, {pipeline_mode = #tpu.pipeline_mode<synchronous>, transform_indices = @transform_9, window_bounds = array<i64: 1, 96>}, {pipeline_mode = #tpu.pipeline_mode<synchronous>, transform_indices = @transform_10, window_bounds = array<i64: 32, 32>}, {pipeline_mode = #tpu.pipeline_mode<synchronous>, transform_indices = @transform_11, window_bounds = array<i64: 1, 32>}, {pipeline_mode = #tpu.pipeline_mode<synchronous>, transform_indices = @transform_12, window_bounds = array<i64: 32, 32>}, {pipeline_mode = #tpu.pipeline_mode<synchronous>, transform_indices = @transform_13, window_bounds = array<i64: 1, 32>}, {pipeline_mode = #tpu.pipeline_mode<synchronous>, transform_indices = @transform_14, window_bounds = array<i64: 32, 64>}, {pipeline_mode = #tpu.pipeline_mode<synchronous>, transform_indices = @transform_15, window_bounds = array<i64: 1, 64>}, {pipeline_mode = #tpu.pipeline_mode<synchronous>, transform_indices = @transform_16, window_bounds = array<i64: 32, 32>}, {pipeline_mode = #tpu.pipeline_mode<synchronous>, transform_indices = @transform_17, window_bounds = array<i64: 1, 32>}, {pipeline_mode = #tpu.pipeline_mode<synchronous>, transform_indices = @transform_18, window_bounds = array<i64: 32, 64>}, {pipeline_mode = #tpu.pipeline_mode<synchronous>, transform_indices = @transform_19, window_bounds = array<i64: 1, 64>}, {pipeline_mode = #tpu.pipeline_mode<synchronous>, transform_indices = @transform_20, window_bounds = array<i64: 64, 32>}, {pipeline_mode = #tpu.pipeline_mode<synchronous>, transform_indices = @transform_21, window_bounds = array<i64: 1, 32>}, {transform_indices = @transform_22, window_bounds = array<i64: 2, 8, 32>}]} {
    %c0 = arith.constant 0 : index
    %c0_0 = arith.constant 0 : index
    %c0_1 = arith.constant 0 : index
    %0 = vector.load %arg1[%c0, %c0_0, %c0_1] : memref<2x8x32xf32, #tpu.memory_space<vmem>>, vector<2x8x32xf32>
    %1 = vector.shape_cast %0 : vector<2x8x32xf32> to vector<16x32xf32>
    %c0_2 = arith.constant 0 : index
    %c0_3 = arith.constant 0 : index
    %c0_4 = arith.constant 0 : index
    %2 = vector.load %arg2[%c0_2, %c0_3, %c0_4] : memref<2x16x32xf32, #tpu.memory_space<vmem>>, vector<2x16x32xf32>
    %3 = vector.shape_cast %2 : vector<2x16x32xf32> to vector<32x32xf32>
    %4 = tpu.iota {dimensions = array<i32: 0>} : vector<8x8xi32>
    %5 = tpu.iota {dimensions = array<i32: 1>} : vector<8x8xi32>
    %6 = arith.cmpi sle, %5, %4 : vector<8x8xi32>
    %cst = arith.constant 0.000000e+00 : f32
    %cst_5 = arith.constant -1.000000e+30 : f32
    %7 = vector.broadcast %cst : f32 to vector<8x8xf32>
    %8 = vector.broadcast %cst_5 : f32 to vector<8x8xf32>
    %9 = arith.select %6, %7, %8 : vector<8x8xi1>, vector<8x8xf32>
    %10 = vector.shape_cast %9 : vector<8x8xf32> to vector<1x8x8xf32>
    %cst_6 = arith.constant dense<0.000000e+00> : vector<16xf32>
    %11 = vector.multi_reduction <add>, %1, %cst_6 [1] : vector<16x32xf32> to vector<16xf32>
    %12 = vector.shape_cast %11 : vector<16xf32> to vector<16x1xf32>
    %cst_7 = arith.constant 3.200000e+01 : f32
    %13 = vector.broadcast %cst_7 : f32 to vector<16x1xf32>
    %14 = arith.divf %12, %13 : vector<16x1xf32>
    %15 = vector.broadcast %14 : vector<16x1xf32> to vector<16x32xf32>
    %16 = arith.subf %1, %15 : vector<16x32xf32>
    %17 = arith.mulf %16, %16 : vector<16x32xf32>
    %cst_8 = arith.constant dense<0.000000e+00> : vector<16xf32>
    %18 = vector.multi_reduction <add>, %17, %cst_8 [1] : vector<16x32xf32> to vector<16xf32>
    %19 = vector.shape_cast %18 : vector<16xf32> to vector<16x1xf32>
    %cst_9 = arith.constant 3.200000e+01 : f32
    %20 = vector.broadcast %cst_9 : f32 to vector<16x1xf32>
    %21 = arith.divf %19, %20 : vector<16x1xf32>
    %c0_10 = arith.constant 0 : index
    %c0_11 = arith.constant 0 : index
    %22 = vector.load %arg3[%c0_10, %c0_11] : memref<1x32xf32, #tpu.memory_space<vmem>>, vector<1x32xf32>
    %cst_12 = arith.constant 9.99999996E-13 : f32
    %23 = vector.broadcast %cst_12 : f32 to vector<16x1xf32>
    %24 = arith.addf %21, %23 : vector<16x1xf32>
    %25 = math.rsqrt %24 : vector<16x1xf32>
    %26 = vector.broadcast %25 : vector<16x1xf32> to vector<16x32xf32>
    %27 = arith.mulf %16, %26 : vector<16x32xf32>
    %28 = vector.broadcast %22 : vector<1x32xf32> to vector<16x32xf32>
    %29 = arith.mulf %28, %27 : vector<16x32xf32>
    %c0_13 = arith.constant 0 : index
    %c0_14 = arith.constant 0 : index
    %30 = vector.load %arg4[%c0_13, %c0_14] : memref<1x32xf32, #tpu.memory_space<vmem>>, vector<1x32xf32>
    %31 = vector.broadcast %30 : vector<1x32xf32> to vector<16x32xf32>
    %32 = arith.addf %29, %31 : vector<16x32xf32>
    %33 = arith.truncf %32 : vector<16x32xf32> to vector<16x32xbf16>
    %c0_15 = arith.constant 0 : index
    %c0_16 = arith.constant 0 : index
    %34 = vector.load %arg9[%c0_15, %c0_16] : memref<32x96xbf16, #tpu.memory_space<vmem>>, vector<32x96xbf16>
    %cst_17 = arith.constant dense<0.000000e+00> : vector<16x96xf32>
    %35 = tpu.matmul %33, %34, %cst_17 {dimension_numbers = #tpu.dot_dimension_numbers<[1], [0], [0], [1], [0, 0, 1, 1], [], []>} : vector<16x32xbf16>, vector<32x96xbf16>, vector<16x96xf32> -> vector<16x96xf32>
    %c0_18 = arith.constant 0 : index
    %c0_19 = arith.constant 0 : index
    %36 = vector.load %arg10[%c0_18, %c0_19] : memref<1x96xf32, #tpu.memory_space<vmem>>, vector<1x96xf32>
    %37 = vector.broadcast %36 : vector<1x96xf32> to vector<16x96xf32>
    %38 = arith.addf %35, %37 : vector<16x96xf32>
    %39 = vector.extract_strided_slice %38 {offsets = [0, 0], sizes = [16, 32], strides = [1, 1]} : vector<16x96xf32> to vector<16x32xf32>
    %40 = vector.extract_strided_slice %38 {offsets = [0, 32], sizes = [16, 32], strides = [1, 1]} : vector<16x96xf32> to vector<16x32xf32>
    %41 = vector.extract_strided_slice %38 {offsets = [0, 64], sizes = [16, 32], strides = [1, 1]} : vector<16x96xf32> to vector<16x32xf32>
    %42 = vector.extract_strided_slice %39 {offsets = [0, 0], sizes = [16, 8], strides = [1, 1]} : vector<16x32xf32> to vector<16x8xf32>
    %43 = vector.extract_strided_slice %39 {offsets = [0, 8], sizes = [16, 8], strides = [1, 1]} : vector<16x32xf32> to vector<16x8xf32>
    %44 = vector.extract_strided_slice %39 {offsets = [0, 16], sizes = [16, 8], strides = [1, 1]} : vector<16x32xf32> to vector<16x8xf32>
    %45 = vector.extract_strided_slice %39 {offsets = [0, 24], sizes = [16, 8], strides = [1, 1]} : vector<16x32xf32> to vector<16x8xf32>
    %46 = vector.shape_cast %42 : vector<16x8xf32> to vector<1x16x8xf32>
    %47 = vector.shape_cast %43 : vector<16x8xf32> to vector<1x16x8xf32>
    %48 = vector.shape_cast %44 : vector<16x8xf32> to vector<1x16x8xf32>
    %49 = vector.shape_cast %45 : vector<16x8xf32> to vector<1x16x8xf32>
    %50 = tpu.concatenate %46, %47, %48, %49 in 0 : vector<1x16x8xf32>, vector<1x16x8xf32>, vector<1x16x8xf32>, vector<1x16x8xf32> -> vector<4x16x8xf32>
    %51 = vector.shape_cast %50 : vector<4x16x8xf32> to vector<8x8x8xf32>
    %52 = arith.truncf %51 : vector<8x8x8xf32> to vector<8x8x8xbf16>
    %53 = vector.extract_strided_slice %40 {offsets = [0, 0], sizes = [16, 8], strides = [1, 1]} : vector<16x32xf32> to vector<16x8xf32>
    %54 = vector.extract_strided_slice %40 {offsets = [0, 8], sizes = [16, 8], strides = [1, 1]} : vector<16x32xf32> to vector<16x8xf32>
    %55 = vector.extract_strided_slice %40 {offsets = [0, 16], sizes = [16, 8], strides = [1, 1]} : vector<16x32xf32> to vector<16x8xf32>
    %56 = vector.extract_strided_slice %40 {offsets = [0, 24], sizes = [16, 8], strides = [1, 1]} : vector<16x32xf32> to vector<16x8xf32>
    %57 = vector.shape_cast %53 : vector<16x8xf32> to vector<1x16x8xf32>
    %58 = vector.shape_cast %54 : vector<16x8xf32> to vector<1x16x8xf32>
    %59 = vector.shape_cast %55 : vector<16x8xf32> to vector<1x16x8xf32>
    %60 = vector.shape_cast %56 : vector<16x8xf32> to vector<1x16x8xf32>
    %61 = tpu.concatenate %57, %58, %59, %60 in 0 : vector<1x16x8xf32>, vector<1x16x8xf32>, vector<1x16x8xf32>, vector<1x16x8xf32> -> vector<4x16x8xf32>
    %62 = vector.shape_cast %61 : vector<4x16x8xf32> to vector<8x8x8xf32>
    %63 = arith.truncf %62 : vector<8x8x8xf32> to vector<8x8x8xbf16>
    %64 = vector.extract_strided_slice %41 {offsets = [0, 0], sizes = [16, 8], strides = [1, 1]} : vector<16x32xf32> to vector<16x8xf32>
    %65 = vector.extract_strided_slice %41 {offsets = [0, 8], sizes = [16, 8], strides = [1, 1]} : vector<16x32xf32> to vector<16x8xf32>
    %66 = vector.extract_strided_slice %41 {offsets = [0, 16], sizes = [16, 8], strides = [1, 1]} : vector<16x32xf32> to vector<16x8xf32>
    %67 = vector.extract_strided_slice %41 {offsets = [0, 24], sizes = [16, 8], strides = [1, 1]} : vector<16x32xf32> to vector<16x8xf32>
    %68 = vector.shape_cast %64 : vector<16x8xf32> to vector<1x16x8xf32>
    %69 = vector.shape_cast %65 : vector<16x8xf32> to vector<1x16x8xf32>
    %70 = vector.shape_cast %66 : vector<16x8xf32> to vector<1x16x8xf32>
    %71 = vector.shape_cast %67 : vector<16x8xf32> to vector<1x16x8xf32>
    %72 = tpu.concatenate %68, %69, %70, %71 in 0 : vector<1x16x8xf32>, vector<1x16x8xf32>, vector<1x16x8xf32>, vector<1x16x8xf32> -> vector<4x16x8xf32>
    %73 = vector.shape_cast %72 : vector<4x16x8xf32> to vector<8x8x8xf32>
    %74 = arith.truncf %73 : vector<8x8x8xf32> to vector<8x8x8xbf16>
    "tpu.trace_start"() <{level = 10 : i32, message = "nqd,nkd->nqk"}> : () -> ()
    %cst_20 = arith.constant dense<0.000000e+00> : vector<8x8x8xf32>
    %75 = tpu.matmul %52, %63, %cst_20 {dimension_numbers = #tpu.dot_dimension_numbers<[2], [2], [1], [1], [0, 0, 0, 1, 1, 1], [0], [0]>} : vector<8x8x8xbf16>, vector<8x8x8xbf16>, vector<8x8x8xf32> -> vector<8x8x8xf32>
    "tpu.trace_stop"() : () -> ()
    %76 = vector.broadcast %10 : vector<1x8x8xf32> to vector<8x8x8xf32>
    %77 = arith.addf %75, %76 : vector<8x8x8xf32>
    %cst_21 = arith.constant dense<0xFF800000> : vector<8x8xf32>
    %78 = vector.multi_reduction <maximumf>, %77, %cst_21 [2] : vector<8x8x8xf32> to vector<8x8xf32>
    %79 = vector.shape_cast %78 : vector<8x8xf32> to vector<8x8x1xf32>
    %80 = vector.broadcast %79 : vector<8x8x1xf32> to vector<8x8x8xf32>
    %81 = arith.subf %77, %80 : vector<8x8x8xf32>
    %82 = math.exp %81 : vector<8x8x8xf32>
    %cst_22 = arith.constant dense<0.000000e+00> : vector<8x8xf32>
    %83 = vector.multi_reduction <add>, %82, %cst_22 [2] : vector<8x8x8xf32> to vector<8x8xf32>
    %84 = vector.shape_cast %83 : vector<8x8xf32> to vector<8x8x1xf32>
    %85 = arith.truncf %82 : vector<8x8x8xf32> to vector<8x8x8xbf16>
    "tpu.trace_start"() <{level = 10 : i32, message = "nqk,nkd->nqd"}> : () -> ()
    %cst_23 = arith.constant dense<0.000000e+00> : vector<8x8x8xf32>
    %86 = tpu.matmul %85, %74, %cst_23 {dimension_numbers = #tpu.dot_dimension_numbers<[2], [1], [1], [2], [0, 0, 0, 1, 1, 2], [0], [0]>} : vector<8x8x8xbf16>, vector<8x8x8xbf16>, vector<8x8x8xf32> -> vector<8x8x8xf32>
    "tpu.trace_stop"() : () -> ()
    %87 = tpu.reciprocal %84 {approx = true} : vector<8x8x1xf32> -> vector<8x8x1xf32>
    %88 = vector.broadcast %87 : vector<8x8x1xf32> to vector<8x8x8xf32>
    %89 = arith.mulf %86, %88 : vector<8x8x8xf32>
    %90 = vector.shape_cast %89 : vector<8x8x8xf32> to vector<4x16x8xf32>
    %91 = vector.extract_strided_slice %90 {offsets = [0, 0, 0], sizes = [1, 16, 8], strides = [1, 1, 1]} : vector<4x16x8xf32> to vector<1x16x8xf32>
    %92 = vector.shape_cast %91 : vector<1x16x8xf32> to vector<16x8xf32>
    %93 = vector.extract_strided_slice %90 {offsets = [1, 0, 0], sizes = [1, 16, 8], strides = [1, 1, 1]} : vector<4x16x8xf32> to vector<1x16x8xf32>
    %94 = vector.shape_cast %93 : vector<1x16x8xf32> to vector<16x8xf32>
    %95 = vector.extract_strided_slice %90 {offsets = [2, 0, 0], sizes = [1, 16, 8], strides = [1, 1, 1]} : vector<4x16x8xf32> to vector<1x16x8xf32>
    %96 = vector.shape_cast %95 : vector<1x16x8xf32> to vector<16x8xf32>
    %97 = vector.extract_strided_slice %90 {offsets = [3, 0, 0], sizes = [1, 16, 8], strides = [1, 1, 1]} : vector<4x16x8xf32> to vector<1x16x8xf32>
    %98 = vector.shape_cast %97 : vector<1x16x8xf32> to vector<16x8xf32>
    %99 = tpu.concatenate %92, %94, %96, %98 in 1 : vector<16x8xf32>, vector<16x8xf32>, vector<16x8xf32>, vector<16x8xf32> -> vector<16x32xf32>
    %100 = arith.truncf %99 : vector<16x32xf32> to vector<16x32xbf16>
    %c0_24 = arith.constant 0 : index
    %c0_25 = arith.constant 0 : index
    %101 = vector.load %arg11[%c0_24, %c0_25] : memref<32x32xbf16, #tpu.memory_space<vmem>>, vector<32x32xbf16>
    %cst_26 = arith.constant dense<0.000000e+00> : vector<16x32xf32>
    %102 = tpu.matmul %100, %101, %cst_26 {dimension_numbers = #tpu.dot_dimension_numbers<[1], [0], [0], [1], [0, 0, 1, 1], [], []>} : vector<16x32xbf16>, vector<32x32xbf16>, vector<16x32xf32> -> vector<16x32xf32>
    %c0_27 = arith.constant 0 : index
    %c0_28 = arith.constant 0 : index
    %103 = vector.load %arg12[%c0_27, %c0_28] : memref<1x32xf32, #tpu.memory_space<vmem>>, vector<1x32xf32>
    %104 = vector.broadcast %103 : vector<1x32xf32> to vector<16x32xf32>
    %105 = arith.addf %102, %104 : vector<16x32xf32>
    %106 = arith.addf %1, %105 : vector<16x32xf32>
    %cst_29 = arith.constant dense<0.000000e+00> : vector<16xf32>
    %107 = vector.multi_reduction <add>, %106, %cst_29 [1] : vector<16x32xf32> to vector<16xf32>
    %108 = vector.shape_cast %107 : vector<16xf32> to vector<16x1xf32>
    %cst_30 = arith.constant 3.200000e+01 : f32
    %109 = vector.broadcast %cst_30 : f32 to vector<16x1xf32>
    %110 = arith.divf %108, %109 : vector<16x1xf32>
    %111 = vector.broadcast %110 : vector<16x1xf32> to vector<16x32xf32>
    %112 = arith.subf %106, %111 : vector<16x32xf32>
    %113 = arith.mulf %112, %112 : vector<16x32xf32>
    %cst_31 = arith.constant dense<0.000000e+00> : vector<16xf32>
    %114 = vector.multi_reduction <add>, %113, %cst_31 [1] : vector<16x32xf32> to vector<16xf32>
    %115 = vector.shape_cast %114 : vector<16xf32> to vector<16x1xf32>
    %cst_32 = arith.constant 3.200000e+01 : f32
    %116 = vector.broadcast %cst_32 : f32 to vector<16x1xf32>
    %117 = arith.divf %115, %116 : vector<16x1xf32>
    %c0_33 = arith.constant 0 : index
    %c0_34 = arith.constant 0 : index
    %118 = vector.load %arg5[%c0_33, %c0_34] : memref<1x32xf32, #tpu.memory_space<vmem>>, vector<1x32xf32>
    %cst_35 = arith.constant 9.99999996E-13 : f32
    %119 = vector.broadcast %cst_35 : f32 to vector<16x1xf32>
    %120 = arith.addf %117, %119 : vector<16x1xf32>
    %121 = math.rsqrt %120 : vector<16x1xf32>
    %122 = vector.broadcast %121 : vector<16x1xf32> to vector<16x32xf32>
    %123 = arith.mulf %112, %122 : vector<16x32xf32>
    %124 = vector.broadcast %118 : vector<1x32xf32> to vector<16x32xf32>
    %125 = arith.mulf %124, %123 : vector<16x32xf32>
    %c0_36 = arith.constant 0 : index
    %c0_37 = arith.constant 0 : index
    %126 = vector.load %arg6[%c0_36, %c0_37] : memref<1x32xf32, #tpu.memory_space<vmem>>, vector<1x32xf32>
    %127 = vector.broadcast %126 : vector<1x32xf32> to vector<16x32xf32>
    %128 = arith.addf %125, %127 : vector<16x32xf32>
    %129 = arith.truncf %128 : vector<16x32xf32> to vector<16x32xbf16>
    %c0_38 = arith.constant 0 : index
    %c0_39 = arith.constant 0 : index
    %130 = vector.load %arg13[%c0_38, %c0_39] : memref<32x32xbf16, #tpu.memory_space<vmem>>, vector<32x32xbf16>
    %cst_40 = arith.constant dense<0.000000e+00> : vector<16x32xf32>
    %131 = tpu.matmul %129, %130, %cst_40 {dimension_numbers = #tpu.dot_dimension_numbers<[1], [0], [0], [1], [0, 0, 1, 1], [], []>} : vector<16x32xbf16>, vector<32x32xbf16>, vector<16x32xf32> -> vector<16x32xf32>
    %c0_41 = arith.constant 0 : index
    %c0_42 = arith.constant 0 : index
    %132 = vector.load %arg14[%c0_41, %c0_42] : memref<1x32xf32, #tpu.memory_space<vmem>>, vector<1x32xf32>
    %133 = vector.broadcast %132 : vector<1x32xf32> to vector<16x32xf32>
    %134 = arith.addf %131, %133 : vector<16x32xf32>
    %135 = arith.truncf %3 : vector<32x32xf32> to vector<32x32xbf16>
    %c0_43 = arith.constant 0 : index
    %c0_44 = arith.constant 0 : index
    %136 = vector.load %arg15[%c0_43, %c0_44] : memref<32x64xbf16, #tpu.memory_space<vmem>>, vector<32x64xbf16>
    %cst_45 = arith.constant dense<0.000000e+00> : vector<32x64xf32>
    %137 = tpu.matmul %135, %136, %cst_45 {dimension_numbers = #tpu.dot_dimension_numbers<[1], [0], [0], [1], [0, 0, 1, 1], [], []>} : vector<32x32xbf16>, vector<32x64xbf16>, vector<32x64xf32> -> vector<32x64xf32>
    %c0_46 = arith.constant 0 : index
    %c0_47 = arith.constant 0 : index
    %138 = vector.load %arg16[%c0_46, %c0_47] : memref<1x64xf32, #tpu.memory_space<vmem>>, vector<1x64xf32>
    %139 = vector.broadcast %138 : vector<1x64xf32> to vector<32x64xf32>
    %140 = arith.addf %137, %139 : vector<32x64xf32>
    %141 = vector.extract_strided_slice %140 {offsets = [0, 0], sizes = [32, 32], strides = [1, 1]} : vector<32x64xf32> to vector<32x32xf32>
    %142 = vector.extract_strided_slice %140 {offsets = [0, 32], sizes = [32, 32], strides = [1, 1]} : vector<32x64xf32> to vector<32x32xf32>
    %143 = vector.extract_strided_slice %134 {offsets = [0, 0], sizes = [16, 8], strides = [1, 1]} : vector<16x32xf32> to vector<16x8xf32>
    %144 = vector.extract_strided_slice %134 {offsets = [0, 8], sizes = [16, 8], strides = [1, 1]} : vector<16x32xf32> to vector<16x8xf32>
    %145 = vector.extract_strided_slice %134 {offsets = [0, 16], sizes = [16, 8], strides = [1, 1]} : vector<16x32xf32> to vector<16x8xf32>
    %146 = vector.extract_strided_slice %134 {offsets = [0, 24], sizes = [16, 8], strides = [1, 1]} : vector<16x32xf32> to vector<16x8xf32>
    %147 = vector.shape_cast %143 : vector<16x8xf32> to vector<1x16x8xf32>
    %148 = vector.shape_cast %144 : vector<16x8xf32> to vector<1x16x8xf32>
    %149 = vector.shape_cast %145 : vector<16x8xf32> to vector<1x16x8xf32>
    %150 = vector.shape_cast %146 : vector<16x8xf32> to vector<1x16x8xf32>
    %151 = tpu.concatenate %147, %148, %149, %150 in 0 : vector<1x16x8xf32>, vector<1x16x8xf32>, vector<1x16x8xf32>, vector<1x16x8xf32> -> vector<4x16x8xf32>
    %152 = vector.shape_cast %151 : vector<4x16x8xf32> to vector<8x8x8xf32>
    %153 = arith.truncf %152 : vector<8x8x8xf32> to vector<8x8x8xbf16>
    %154 = vector.extract_strided_slice %141 {offsets = [0, 0], sizes = [32, 8], strides = [1, 1]} : vector<32x32xf32> to vector<32x8xf32>
    %155 = vector.extract_strided_slice %141 {offsets = [0, 8], sizes = [32, 8], strides = [1, 1]} : vector<32x32xf32> to vector<32x8xf32>
    %156 = vector.extract_strided_slice %141 {offsets = [0, 16], sizes = [32, 8], strides = [1, 1]} : vector<32x32xf32> to vector<32x8xf32>
    %157 = vector.extract_strided_slice %141 {offsets = [0, 24], sizes = [32, 8], strides = [1, 1]} : vector<32x32xf32> to vector<32x8xf32>
    %158 = vector.shape_cast %154 : vector<32x8xf32> to vector<1x32x8xf32>
    %159 = vector.shape_cast %155 : vector<32x8xf32> to vector<1x32x8xf32>
    %160 = vector.shape_cast %156 : vector<32x8xf32> to vector<1x32x8xf32>
    %161 = vector.shape_cast %157 : vector<32x8xf32> to vector<1x32x8xf32>
    %162 = tpu.concatenate %158, %159, %160, %161 in 0 : vector<1x32x8xf32>, vector<1x32x8xf32>, vector<1x32x8xf32>, vector<1x32x8xf32> -> vector<4x32x8xf32>
    %163 = vector.shape_cast %162 : vector<4x32x8xf32> to vector<8x16x8xf32>
    %164 = arith.truncf %163 : vector<8x16x8xf32> to vector<8x16x8xbf16>
    %165 = vector.extract_strided_slice %142 {offsets = [0, 0], sizes = [32, 8], strides = [1, 1]} : vector<32x32xf32> to vector<32x8xf32>
    %166 = vector.extract_strided_slice %142 {offsets = [0, 8], sizes = [32, 8], strides = [1, 1]} : vector<32x32xf32> to vector<32x8xf32>
    %167 = vector.extract_strided_slice %142 {offsets = [0, 16], sizes = [32, 8], strides = [1, 1]} : vector<32x32xf32> to vector<32x8xf32>
    %168 = vector.extract_strided_slice %142 {offsets = [0, 24], sizes = [32, 8], strides = [1, 1]} : vector<32x32xf32> to vector<32x8xf32>
    %169 = vector.shape_cast %165 : vector<32x8xf32> to vector<1x32x8xf32>
    %170 = vector.shape_cast %166 : vector<32x8xf32> to vector<1x32x8xf32>
    %171 = vector.shape_cast %167 : vector<32x8xf32> to vector<1x32x8xf32>
    %172 = vector.shape_cast %168 : vector<32x8xf32> to vector<1x32x8xf32>
    %173 = tpu.concatenate %169, %170, %171, %172 in 0 : vector<1x32x8xf32>, vector<1x32x8xf32>, vector<1x32x8xf32>, vector<1x32x8xf32> -> vector<4x32x8xf32>
    %174 = vector.shape_cast %173 : vector<4x32x8xf32> to vector<8x16x8xf32>
    %175 = arith.truncf %174 : vector<8x16x8xf32> to vector<8x16x8xbf16>
    "tpu.trace_start"() <{level = 10 : i32, message = "nqd,nkd->nqk"}> : () -> ()
    %cst_48 = arith.constant dense<0.000000e+00> : vector<8x8x16xf32>
    %176 = tpu.matmul %153, %164, %cst_48 {dimension_numbers = #tpu.dot_dimension_numbers<[2], [2], [1], [1], [0, 0, 0, 1, 1, 1], [0], [0]>} : vector<8x8x8xbf16>, vector<8x16x8xbf16>, vector<8x8x16xf32> -> vector<8x8x16xf32>
    "tpu.trace_stop"() : () -> ()
    %cst_49 = arith.constant dense<0xFF800000> : vector<8x8xf32>
    %177 = vector.multi_reduction <maximumf>, %176, %cst_49 [2] : vector<8x8x16xf32> to vector<8x8xf32>
    %178 = vector.shape_cast %177 : vector<8x8xf32> to vector<8x8x1xf32>
    %179 = vector.broadcast %178 : vector<8x8x1xf32> to vector<8x8x16xf32>
    %180 = arith.subf %176, %179 : vector<8x8x16xf32>
    %181 = math.exp %180 : vector<8x8x16xf32>
    %cst_50 = arith.constant dense<0.000000e+00> : vector<8x8xf32>
    %182 = vector.multi_reduction <add>, %181, %cst_50 [2] : vector<8x8x16xf32> to vector<8x8xf32>
    %183 = vector.shape_cast %182 : vector<8x8xf32> to vector<8x8x1xf32>
    %184 = arith.truncf %181 : vector<8x8x16xf32> to vector<8x8x16xbf16>
    "tpu.trace_start"() <{level = 10 : i32, message = "nqk,nkd->nqd"}> : () -> ()
    %cst_51 = arith.constant dense<0.000000e+00> : vector<8x8x8xf32>
    %185 = tpu.matmul %184, %175, %cst_51 {dimension_numbers = #tpu.dot_dimension_numbers<[2], [1], [1], [2], [0, 0, 0, 1, 1, 2], [0], [0]>} : vector<8x8x16xbf16>, vector<8x16x8xbf16>, vector<8x8x8xf32> -> vector<8x8x8xf32>
    "tpu.trace_stop"() : () -> ()
    %186 = tpu.reciprocal %183 {approx = true} : vector<8x8x1xf32> -> vector<8x8x1xf32>
    %187 = vector.broadcast %186 : vector<8x8x1xf32> to vector<8x8x8xf32>
    %188 = arith.mulf %185, %187 : vector<8x8x8xf32>
    %189 = vector.shape_cast %188 : vector<8x8x8xf32> to vector<4x16x8xf32>
    %190 = vector.extract_strided_slice %189 {offsets = [0, 0, 0], sizes = [1, 16, 8], strides = [1, 1, 1]} : vector<4x16x8xf32> to vector<1x16x8xf32>
    %191 = vector.shape_cast %190 : vector<1x16x8xf32> to vector<16x8xf32>
    %192 = vector.extract_strided_slice %189 {offsets = [1, 0, 0], sizes = [1, 16, 8], strides = [1, 1, 1]} : vector<4x16x8xf32> to vector<1x16x8xf32>
    %193 = vector.shape_cast %192 : vector<1x16x8xf32> to vector<16x8xf32>
    %194 = vector.extract_strided_slice %189 {offsets = [2, 0, 0], sizes = [1, 16, 8], strides = [1, 1, 1]} : vector<4x16x8xf32> to vector<1x16x8xf32>
    %195 = vector.shape_cast %194 : vector<1x16x8xf32> to vector<16x8xf32>
    %196 = vector.extract_strided_slice %189 {offsets = [3, 0, 0], sizes = [1, 16, 8], strides = [1, 1, 1]} : vector<4x16x8xf32> to vector<1x16x8xf32>
    %197 = vector.shape_cast %196 : vector<1x16x8xf32> to vector<16x8xf32>
    %198 = tpu.concatenate %191, %193, %195, %197 in 1 : vector<16x8xf32>, vector<16x8xf32>, vector<16x8xf32>, vector<16x8xf32> -> vector<16x32xf32>
    %199 = arith.truncf %198 : vector<16x32xf32> to vector<16x32xbf16>
    %c0_52 = arith.constant 0 : index
    %c0_53 = arith.constant 0 : index
    %200 = vector.load %arg17[%c0_52, %c0_53] : memref<32x32xbf16, #tpu.memory_space<vmem>>, vector<32x32xbf16>
    %cst_54 = arith.constant dense<0.000000e+00> : vector<16x32xf32>
    %201 = tpu.matmul %199, %200, %cst_54 {dimension_numbers = #tpu.dot_dimension_numbers<[1], [0], [0], [1], [0, 0, 1, 1], [], []>} : vector<16x32xbf16>, vector<32x32xbf16>, vector<16x32xf32> -> vector<16x32xf32>
    %c0_55 = arith.constant 0 : index
    %c0_56 = arith.constant 0 : index
    %202 = vector.load %arg18[%c0_55, %c0_56] : memref<1x32xf32, #tpu.memory_space<vmem>>, vector<1x32xf32>
    %203 = vector.broadcast %202 : vector<1x32xf32> to vector<16x32xf32>
    %204 = arith.addf %201, %203 : vector<16x32xf32>
    %205 = arith.addf %106, %204 : vector<16x32xf32>
    %cst_57 = arith.constant dense<0.000000e+00> : vector<16xf32>
    %206 = vector.multi_reduction <add>, %205, %cst_57 [1] : vector<16x32xf32> to vector<16xf32>
    %207 = vector.shape_cast %206 : vector<16xf32> to vector<16x1xf32>
    %cst_58 = arith.constant 3.200000e+01 : f32
    %208 = vector.broadcast %cst_58 : f32 to vector<16x1xf32>
    %209 = arith.divf %207, %208 : vector<16x1xf32>
    %210 = vector.broadcast %209 : vector<16x1xf32> to vector<16x32xf32>
    %211 = arith.subf %205, %210 : vector<16x32xf32>
    %212 = arith.mulf %211, %211 : vector<16x32xf32>
    %cst_59 = arith.constant dense<0.000000e+00> : vector<16xf32>
    %213 = vector.multi_reduction <add>, %212, %cst_59 [1] : vector<16x32xf32> to vector<16xf32>
    %214 = vector.shape_cast %213 : vector<16xf32> to vector<16x1xf32>
    %cst_60 = arith.constant 3.200000e+01 : f32
    %215 = vector.broadcast %cst_60 : f32 to vector<16x1xf32>
    %216 = arith.divf %214, %215 : vector<16x1xf32>
    %c0_61 = arith.constant 0 : index
    %c0_62 = arith.constant 0 : index
    %217 = vector.load %arg7[%c0_61, %c0_62] : memref<1x32xf32, #tpu.memory_space<vmem>>, vector<1x32xf32>
    %cst_63 = arith.constant 9.99999996E-13 : f32
    %218 = vector.broadcast %cst_63 : f32 to vector<16x1xf32>
    %219 = arith.addf %216, %218 : vector<16x1xf32>
    %220 = math.rsqrt %219 : vector<16x1xf32>
    %221 = vector.broadcast %220 : vector<16x1xf32> to vector<16x32xf32>
    %222 = arith.mulf %211, %221 : vector<16x32xf32>
    %223 = vector.broadcast %217 : vector<1x32xf32> to vector<16x32xf32>
    %224 = arith.mulf %223, %222 : vector<16x32xf32>
    %c0_64 = arith.constant 0 : index
    %c0_65 = arith.constant 0 : index
    %225 = vector.load %arg8[%c0_64, %c0_65] : memref<1x32xf32, #tpu.memory_space<vmem>>, vector<1x32xf32>
    %226 = vector.broadcast %225 : vector<1x32xf32> to vector<16x32xf32>
    %227 = arith.addf %224, %226 : vector<16x32xf32>
    %228 = arith.truncf %227 : vector<16x32xf32> to vector<16x32xbf16>
    %c0_66 = arith.constant 0 : index
    %c0_67 = arith.constant 0 : index
    %229 = vector.load %arg19[%c0_66, %c0_67] : memref<32x64xbf16, #tpu.memory_space<vmem>>, vector<32x64xbf16>
    %cst_68 = arith.constant dense<0.000000e+00> : vector<16x64xf32>
    %230 = tpu.matmul %228, %229, %cst_68 {dimension_numbers = #tpu.dot_dimension_numbers<[1], [0], [0], [1], [0, 0, 1, 1], [], []>} : vector<16x32xbf16>, vector<32x64xbf16>, vector<16x64xf32> -> vector<16x64xf32>
    %c0_69 = arith.constant 0 : index
    %c0_70 = arith.constant 0 : index
    %231 = vector.load %arg20[%c0_69, %c0_70] : memref<1x64xf32, #tpu.memory_space<vmem>>, vector<1x64xf32>
    %232 = vector.broadcast %231 : vector<1x64xf32> to vector<16x64xf32>
    %233 = arith.addf %230, %232 : vector<16x64xf32>
    %cst_71 = arith.constant 5.000000e-01 : f32
    %234 = vector.broadcast %cst_71 : f32 to vector<16x64xf32>
    %235 = arith.mulf %234, %233 : vector<16x64xf32>
    %cst_72 = arith.constant 4.471500e-02 : f32
    %236 = vector.broadcast %cst_72 : f32 to vector<16x64xf32>
    %237 = arith.mulf %236, %233 : vector<16x64xf32>
    %238 = arith.mulf %237, %233 : vector<16x64xf32>
    %239 = arith.mulf %238, %233 : vector<16x64xf32>
    %240 = arith.addf %233, %239 : vector<16x64xf32>
    %cst_73 = arith.constant 0.797884583 : f32
    %241 = vector.broadcast %cst_73 : f32 to vector<16x64xf32>
    %242 = arith.mulf %241, %240 : vector<16x64xf32>
    %243 = math.tanh %242 : vector<16x64xf32>
    %cst_74 = arith.constant 1.000000e+00 : f32
    %244 = vector.broadcast %cst_74 : f32 to vector<16x64xf32>
    %245 = arith.addf %244, %243 : vector<16x64xf32>
    %246 = arith.mulf %235, %245 : vector<16x64xf32>
    %247 = arith.truncf %246 : vector<16x64xf32> to vector<16x64xbf16>
    %c0_75 = arith.constant 0 : index
    %c0_76 = arith.constant 0 : index
    %248 = vector.load %arg21[%c0_75, %c0_76] : memref<64x32xbf16, #tpu.memory_space<vmem>>, vector<64x32xbf16>
    %cst_77 = arith.constant dense<0.000000e+00> : vector<16x32xf32>
    %249 = tpu.matmul %247, %248, %cst_77 {dimension_numbers = #tpu.dot_dimension_numbers<[1], [0], [0], [1], [0, 0, 1, 1], [], []>} : vector<16x64xbf16>, vector<64x32xbf16>, vector<16x32xf32> -> vector<16x32xf32>
    %c0_78 = arith.constant 0 : index
    %c0_79 = arith.constant 0 : index
    %250 = vector.load %arg22[%c0_78, %c0_79] : memref<1x32xf32, #tpu.memory_space<vmem>>, vector<1x32xf32>
    %251 = vector.broadcast %250 : vector<1x32xf32> to vector<16x32xf32>
    %252 = arith.addf %249, %251 : vector<16x32xf32>
    %253 = arith.addf %205, %252 : vector<16x32xf32>
    %254 = vector.shape_cast %253 : vector<16x32xf32> to vector<2x8x32xf32>
    %c0_80 = arith.constant 0 : index
    %c0_81 = arith.constant 0 : index
    %c0_82 = arith.constant 0 : index
    %255 = vector.load %arg23[%c0_80, %c0_81, %c0_82] : memref<2x8x32xf32, #tpu.memory_space<vmem>>, vector<2x8x32xf32>
    tpu.vector_store %arg23[%c0_80, %c0_81, %c0_82], %254 {strides = array<i32>} : memref<2x8x32xf32, #tpu.memory_space<vmem>>, vector<2x8x32xf32>,
    return
  }
  func.func @transform_0(%arg0: i32) -> (i32, i32, i32) {
    %c0_i32 = arith.constant 0 : i32
    %c0_i32_0 = arith.constant 0 : i32
    %c0_i32_1 = arith.constant 0 : i32
    return %arg0, %c0_i32, %c0_i32_0 : i32, i32, i32
  }
  func.func @transform_1(%arg0: i32) -> (i32, i32, i32) {
    %c0_i32 = arith.constant 0 : i32
    %c0_i32_0 = arith.constant 0 : i32
    %c0_i32_1 = arith.constant 0 : i32
    return %arg0, %c0_i32, %c0_i32_0 : i32, i32, i32
  }
  func.func @transform_2(%arg0: i32) -> (i32, i32) {
    %c0_i32 = arith.constant 0 : i32
    %c0_i32_0 = arith.constant 0 : i32
    %c0_i32_1 = arith.constant 0 : i32
    return %c0_i32, %c0_i32_0 : i32, i32
  }
  func.func @transform_3(%arg0: i32) -> (i32, i32) {
    %c0_i32 = arith.constant 0 : i32
    %c0_i32_0 = arith.constant 0 : i32
    %c0_i32_1 = arith.constant 0 : i32
    return %c0_i32, %c0_i32_0 : i32, i32
  }
  func.func @transform_4(%arg0: i32) -> (i32, i32) {
    %c0_i32 = arith.constant 0 : i32
    %c0_i32_0 = arith.constant 0 : i32
    %c0_i32_1 = arith.constant 0 : i32
    return %c0_i32, %c0_i32_0 : i32, i32
  }
  func.func @transform_5(%arg0: i32) -> (i32, i32) {
    %c0_i32 = arith.constant 0 : i32
    %c0_i32_0 = arith.constant 0 : i32
    %c0_i32_1 = arith.constant 0 : i32
    return %c0_i32, %c0_i32_0 : i32, i32
  }
  func.func @transform_6(%arg0: i32) -> (i32, i32) {
    %c0_i32 = arith.constant 0 : i32
    %c0_i32_0 = arith.constant 0 : i32
    %c0_i32_1 = arith.constant 0 : i32
    return %c0_i32, %c0_i32_0 : i32, i32
  }
  func.func @transform_7(%arg0: i32) -> (i32, i32) {
    %c0_i32 = arith.constant 0 : i32
    %c0_i32_0 = arith.constant 0 : i32
    %c0_i32_1 = arith.constant 0 : i32
    return %c0_i32, %c0_i32_0 : i32, i32
  }
  func.func @transform_8(%arg0: i32) -> (i32, i32) {
    %c0_i32 = arith.constant 0 : i32
    %c0_i32_0 = arith.constant 0 : i32
    %c0_i32_1 = arith.constant 0 : i32
    return %c0_i32, %c0_i32_0 : i32, i32
  }
  func.func @transform_9(%arg0: i32) -> (i32, i32) {
    %c0_i32 = arith.constant 0 : i32
    %c0_i32_0 = arith.constant 0 : i32
    %c0_i32_1 = arith.constant 0 : i32
    return %c0_i32, %c0_i32_0 : i32, i32
  }
  func.func @transform_10(%arg0: i32) -> (i32, i32) {
    %c0_i32 = arith.constant 0 : i32
    %c0_i32_0 = arith.constant 0 : i32
    %c0_i32_1 = arith.constant 0 : i32
    return %c0_i32, %c0_i32_0 : i32, i32
  }
  func.func @transform_11(%arg0: i32) -> (i32, i32) {
    %c0_i32 = arith.constant 0 : i32
    %c0_i32_0 = arith.constant 0 : i32
    %c0_i32_1 = arith.constant 0 : i32
    return %c0_i32, %c0_i32_0 : i32, i32
  }
  func.func @transform_12(%arg0: i32) -> (i32, i32) {
    %c0_i32 = arith.constant 0 : i32
    %c0_i32_0 = arith.constant 0 : i32
    %c0_i32_1 = arith.constant 0 : i32
    return %c0_i32, %c0_i32_0 : i32, i32
  }
  func.func @transform_13(%arg0: i32) -> (i32, i32) {
    %c0_i32 = arith.constant 0 : i32
    %c0_i32_0 = arith.constant 0 : i32
    %c0_i32_1 = arith.constant 0 : i32
    return %c0_i32, %c0_i32_0 : i32, i32
  }
  func.func @transform_14(%arg0: i32) -> (i32, i32) {
    %c0_i32 = arith.constant 0 : i32
    %c0_i32_0 = arith.constant 0 : i32
    %c0_i32_1 = arith.constant 0 : i32
    return %c0_i32, %c0_i32_0 : i32, i32
  }
  func.func @transform_15(%arg0: i32) -> (i32, i32) {
    %c0_i32 = arith.constant 0 : i32
    %c0_i32_0 = arith.constant 0 : i32
    %c0_i32_1 = arith.constant 0 : i32
    return %c0_i32, %c0_i32_0 : i32, i32
  }
  func.func @transform_16(%arg0: i32) -> (i32, i32) {
    %c0_i32 = arith.constant 0 : i32
    %c0_i32_0 = arith.constant 0 : i32
    %c0_i32_1 = arith.constant 0 : i32
    return %c0_i32, %c0_i32_0 : i32, i32
  }
  func.func @transform_17(%arg0: i32) -> (i32, i32) {
    %c0_i32 = arith.constant 0 : i32
    %c0_i32_0 = arith.constant 0 : i32
    %c0_i32_1 = arith.constant 0 : i32
    return %c0_i32, %c0_i32_0 : i32, i32
  }
  func.func @transform_18(%arg0: i32) -> (i32, i32) {
    %c0_i32 = arith.constant 0 : i32
    %c0_i32_0 = arith.constant 0 : i32
    %c0_i32_1 = arith.constant 0 : i32
    return %c0_i32, %c0_i32_0 : i32, i32
  }
  func.func @transform_19(%arg0: i32) -> (i32, i32) {
    %c0_i32 = arith.constant 0 : i32
    %c0_i32_0 = arith.constant 0 : i32
    %c0_i32_1 = arith.constant 0 : i32
    return %c0_i32, %c0_i32_0 : i32, i32
  }
  func.func @transform_20(%arg0: i32) -> (i32, i32) {
    %c0_i32 = arith.constant 0 : i32
    %c0_i32_0 = arith.constant 0 : i32
    %c0_i32_1 = arith.constant 0 : i32
    return %c0_i32, %c0_i32_0 : i32, i32
  }
  func.func @transform_21(%arg0: i32) -> (i32, i32) {
    %c0_i32 = arith.constant 0 : i32
    %c0_i32_0 = arith.constant 0 : i32
    %c0_i32_1 = arith.constant 0 : i32
    return %c0_i32, %c0_i32_0 : i32, i32
  }
  func.func @transform_22(%arg0: i32) -> (i32, i32, i32) {
    %c0_i32 = arith.constant 0 : i32
    %c0_i32_0 = arith.constant 0 : i32
    %c0_i32_1 = arith.constant 0 : i32
    return %arg0, %c0_i32, %c0_i32_0 : i32, i32, i32
  }
}

module attributes {stable_mosaic.version = 11 : i64} {
  func.func @_decoder_layer_kernel(%arg0: i32, %arg1: memref<2x8x32xf32, #tpu.memory_space<vmem>>, %arg2: memref<2x16x32xf32, #tpu.memory_space<vmem>>, %arg3: memref<1x32xf32, #tpu.memory_space<vmem>>, %arg4: memref<1x32xf32, #tpu.memory_space<vmem>>, %arg5: memref<1x32xf32, #tpu.memory_space<vmem>>, %arg6: memref<1x32xf32, #tpu.memory_space<vmem>>, %arg7: memref<1x32xf32, #tpu.memory_space<vmem>>, %arg8: memref<1x32xf32, #tpu.memory_space<vmem>>, %arg9: memref<32x96xbf16, #tpu.memory_space<vmem>>, %arg10: memref<1x96xf32, #tpu.memory_space<vmem>>, %arg11: memref<32x32xbf16, #tpu.memory_space<vmem>>, %arg12: memref<1x32xf32, #tpu.memory_space<vmem>>, %arg13: memref<32x32xbf16, #tpu.memory_space<vmem>>, %arg14: memref<1x32xf32, #tpu.memory_space<vmem>>, %arg15: memref<32x64xbf16, #tpu.memory_space<vmem>>, %arg16: memref<1x64xf32, #tpu.memory_space<vmem>>, %arg17: memref<32x32xbf16, #tpu.memory_space<vmem>>, %arg18: memref<1x32xf32, #tpu.memory_space<vmem>>, %arg19: memref<32x64xbf16, #tpu.memory_space<vmem>>, %arg20: memref<1x64xf32, #tpu.memory_space<vmem>>, %arg21: memref<64x32xbf16, #tpu.memory_space<vmem>>, %arg22: memref<1x32xf32, #tpu.memory_space<vmem>>, %arg23: memref<2x8x32xf32, #tpu.memory_space<vmem>>) attributes {dimension_semantics = [#tpu.dimension_semantics<parallel>], iteration_bounds = array<i64: 2>, scalar_prefetch = 0 : i64, scratch_operands = 0 : i64, tpu.core_type = #tpu.core_type<tc>, window_params = [{transform_indices = @transform_0, window_bounds = array<i64: 2, 8, 32>}, {transform_indices = @transform_1, window_bounds = array<i64: 2, 16, 32>}, {pipeline_mode = #tpu.pipeline_mode<synchronous>, transform_indices = @transform_2, window_bounds = array<i64: 1, 32>}, {pipeline_mode = #tpu.pipeline_mode<synchronous>, transform_indices = @transform_3, window_bounds = array<i64: 1, 32>}, {pipeline_mode = #tpu.pipeline_mode<synchronous>, transform_indices = @transform_4, window_bounds = array<i64: 1, 32>}, {pipeline_mode = #tpu.pipeline_mode<synchronous>, transform_indices = @transform_5, window_bounds = array<i64: 1, 32>}, {pipeline_mode = #tpu.pipeline_mode<synchronous>, transform_indices = @transform_6, window_bounds = array<i64: 1, 32>}, {pipeline_mode = #tpu.pipeline_mode<synchronous>, transform_indices = @transform_7, window_bounds = array<i64: 1, 32>}, {pipeline_mode = #tpu.pipeline_mode<synchronous>, transform_indices = @transform_8, window_bounds = array<i64: 32, 96>}, {pipeline_mode = #tpu.pipeline_mode<synchronous>, transform_indices = @transform_9, window_bounds = array<i64: 1, 96>}, {pipeline_mode = #tpu.pipeline_mode<synchronous>, transform_indices = @transform_10, window_bounds = array<i64: 32, 32>}, {pipeline_mode = #tpu.pipeline_mode<synchronous>, transform_indices = @transform_11, window_bounds = array<i64: 1, 32>}, {pipeline_mode = #tpu.pipeline_mode<synchronous>, transform_indices = @transform_12, window_bounds = array<i64: 32, 32>}, {pipeline_mode = #tpu.pipeline_mode<synchronous>, transform_indices = @transform_13, window_bounds = array<i64: 1, 32>}, {pipeline_mode = #tpu.pipeline_mode<synchronous>, transform_indices = @transform_14, window_bounds = array<i64: 32, 64>}, {pipeline_mode = #tpu.pipeline_mode<synchronous>, transform_indices = @transform_15, window_bounds = array<i64: 1, 64>}, {pipeline_mode = #tpu.pipeline_mode<synchronous>, transform_indices = @transform_16, window_bounds = array<i64: 32, 32>}, {pipeline_mode = #tpu.pipeline_mode<synchronous>, transform_indices = @transform_17, window_bounds = array<i64: 1, 32>}, {pipeline_mode = #tpu.pipeline_mode<synchronous>, transform_indices = @transform_18, window_bounds = array<i64: 32, 64>}, {pipeline_mode = #tpu.pipeline_mode<synchronous>, transform_indices = @transform_19, window_bounds = array<i64: 1, 64>}, {pipeline_mode = #tpu.pipeline_mode<synchronous>, transform_indices = @transform_20, window_bounds = array<i64: 64, 32>}, {pipeline_mode = #tpu.pipeline_mode<synchronous>, transform_indices = @transform_21, window_bounds = array<i64: 1, 32>}, {transform_indices = @transform_22, window_bounds = array<i64: 2, 8, 32>}]} {
    %c0 = arith.constant 0 : index
    %c0_0 = arith.constant 0 : index
    %c0_1 = arith.constant 0 : index
    %0 = vector.load %arg1[%c0, %c0_0, %c0_1] : memref<2x8x32xf32, #tpu.memory_space<vmem>>, vector<2x8x32xf32>
    %1 = vector.shape_cast %0 : vector<2x8x32xf32> to vector<16x32xf32>
    %c0_2 = arith.constant 0 : index
    %c0_3 = arith.constant 0 : index
    %c0_4 = arith.constant 0 : index
    %2 = vector.load %arg2[%c0_2, %c0_3, %c0_4] : memref<2x16x32xf32, #tpu.memory_space<vmem>>, vector<2x16x32xf32>
    %3 = vector.shape_cast %2 : vector<2x16x32xf32> to vector<32x32xf32>
    %4 = tpu.iota {dimensions = array<i32: 0>} : vector<8x8xi32>
    %5 = tpu.iota {dimensions = array<i32: 1>} : vector<8x8xi32>
    %6 = arith.cmpi sle, %5, %4 : vector<8x8xi32>
    %cst = arith.constant 0.000000e+00 : f32
    %cst_5 = arith.constant -1.000000e+30 : f32
    %7 = vector.broadcast %cst : f32 to vector<8x8xf32>
    %8 = vector.broadcast %cst_5 : f32 to vector<8x8xf32>
    %9 = arith.select %6, %7, %8 : vector<8x8xi1>, vector<8x8xf32>
    %10 = vector.shape_cast %9 : vector<8x8xf32> to vector<1x8x8xf32>
    %cst_6 = arith.constant dense<0.000000e+00> : vector<16xf32>
    %11 = vector.multi_reduction <add>, %1, %cst_6 [1] : vector<16x32xf32> to vector<16xf32>
    %12 = vector.shape_cast %11 : vector<16xf32> to vector<16x1xf32>
    %cst_7 = arith.constant 3.200000e+01 : f32
    %13 = vector.broadcast %cst_7 : f32 to vector<16x1xf32>
    %14 = arith.divf %12, %13 : vector<16x1xf32>
    %15 = vector.broadcast %14 : vector<16x1xf32> to vector<16x32xf32>
    %16 = arith.subf %1, %15 : vector<16x32xf32>
    %17 = arith.mulf %16, %16 : vector<16x32xf32>
    %cst_8 = arith.constant dense<0.000000e+00> : vector<16xf32>
    %18 = vector.multi_reduction <add>, %17, %cst_8 [1] : vector<16x32xf32> to vector<16xf32>
    %19 = vector.shape_cast %18 : vector<16xf32> to vector<16x1xf32>
    %cst_9 = arith.constant 3.200000e+01 : f32
    %20 = vector.broadcast %cst_9 : f32 to vector<16x1xf32>
    %21 = arith.divf %19, %20 : vector<16x1xf32>
    %c0_10 = arith.constant 0 : index
    %c0_11 = arith.constant 0 : index
    %22 = vector.load %arg3[%c0_10, %c0_11] : memref<1x32xf32, #tpu.memory_space<vmem>>, vector<1x32xf32>
    %cst_12 = arith.constant 9.99999996E-13 : f32
    %23 = vector.broadcast %cst_12 : f32 to vector<16x1xf32>
    %24 = arith.addf %21, %23 : vector<16x1xf32>
    %25 = math.rsqrt %24 : vector<16x1xf32>
    %26 = vector.broadcast %25 : vector<16x1xf32> to vector<16x32xf32>
    %27 = arith.mulf %16, %26 : vector<16x32xf32>
    %28 = vector.broadcast %22 : vector<1x32xf32> to vector<16x32xf32>
    %29 = arith.mulf %28, %27 : vector<16x32xf32>
    %c0_13 = arith.constant 0 : index
    %c0_14 = arith.constant 0 : index
    %30 = vector.load %arg4[%c0_13, %c0_14] : memref<1x32xf32, #tpu.memory_space<vmem>>, vector<1x32xf32>
    %31 = vector.broadcast %30 : vector<1x32xf32> to vector<16x32xf32>
    %32 = arith.addf %29, %31 : vector<16x32xf32>
    %33 = arith.truncf %32 : vector<16x32xf32> to vector<16x32xbf16>
    %c0_15 = arith.constant 0 : index
    %c0_16 = arith.constant 0 : index
    %34 = vector.load %arg9[%c0_15, %c0_16] : memref<32x96xbf16, #tpu.memory_space<vmem>>, vector<32x96xbf16>
    %cst_17 = arith.constant dense<0.000000e+00> : vector<16x96xf32>
    %35 = tpu.matmul %33, %34, %cst_17 {dimension_numbers = #tpu.dot_dimension_numbers<[1], [0], [0], [1], [0, 0, 1, 1], [], []>} : vector<16x32xbf16>, vector<32x96xbf16>, vector<16x96xf32> -> vector<16x96xf32>
    %c0_18 = arith.constant 0 : index
    %c0_19 = arith.constant 0 : index
    %36 = vector.load %arg10[%c0_18, %c0_19] : memref<1x96xf32, #tpu.memory_space<vmem>>, vector<1x96xf32>
    %37 = vector.broadcast %36 : vector<1x96xf32> to vector<16x96xf32>
    %38 = arith.addf %35, %37 : vector<16x96xf32>
    %39 = vector.extract_strided_slice %38 {offsets = [0, 0], sizes = [16, 32], strides = [1, 1]} : vector<16x96xf32> to vector<16x32xf32>
    %40 = vector.extract_strided_slice %38 {offsets = [0, 32], sizes = [16, 32], strides = [1, 1]} : vector<16x96xf32> to vector<16x32xf32>
    %41 = vector.extract_strided_slice %38 {offsets = [0, 64], sizes = [16, 32], strides = [1, 1]} : vector<16x96xf32> to vector<16x32xf32>
    %42 = vector.extract_strided_slice %39 {offsets = [0, 0], sizes = [16, 8], strides = [1, 1]} : vector<16x32xf32> to vector<16x8xf32>
    %43 = vector.extract_strided_slice %39 {offsets = [0, 8], sizes = [16, 8], strides = [1, 1]} : vector<16x32xf32> to vector<16x8xf32>
    %44 = vector.extract_strided_slice %39 {offsets = [0, 16], sizes = [16, 8], strides = [1, 1]} : vector<16x32xf32> to vector<16x8xf32>
    %45 = vector.extract_strided_slice %39 {offsets = [0, 24], sizes = [16, 8], strides = [1, 1]} : vector<16x32xf32> to vector<16x8xf32>
    %46 = vector.shape_cast %42 : vector<16x8xf32> to vector<1x16x8xf32>
    %47 = vector.shape_cast %43 : vector<16x8xf32> to vector<1x16x8xf32>
    %48 = vector.shape_cast %44 : vector<16x8xf32> to vector<1x16x8xf32>
    %49 = vector.shape_cast %45 : vector<16x8xf32> to vector<1x16x8xf32>
    %50 = tpu.concatenate %46, %47, %48, %49 in 0 : vector<1x16x8xf32>, vector<1x16x8xf32>, vector<1x16x8xf32>, vector<1x16x8xf32> -> vector<4x16x8xf32>
    %51 = vector.shape_cast %50 : vector<4x16x8xf32> to vector<8x8x8xf32>
    %52 = arith.truncf %51 : vector<8x8x8xf32> to vector<8x8x8xbf16>
    %53 = vector.extract_strided_slice %40 {offsets = [0, 0], sizes = [16, 8], strides = [1, 1]} : vector<16x32xf32> to vector<16x8xf32>
    %54 = vector.extract_strided_slice %40 {offsets = [0, 8], sizes = [16, 8], strides = [1, 1]} : vector<16x32xf32> to vector<16x8xf32>
    %55 = vector.extract_strided_slice %40 {offsets = [0, 16], sizes = [16, 8], strides = [1, 1]} : vector<16x32xf32> to vector<16x8xf32>
    %56 = vector.extract_strided_slice %40 {offsets = [0, 24], sizes = [16, 8], strides = [1, 1]} : vector<16x32xf32> to vector<16x8xf32>
    %57 = vector.shape_cast %53 : vector<16x8xf32> to vector<1x16x8xf32>
    %58 = vector.shape_cast %54 : vector<16x8xf32> to vector<1x16x8xf32>
    %59 = vector.shape_cast %55 : vector<16x8xf32> to vector<1x16x8xf32>
    %60 = vector.shape_cast %56 : vector<16x8xf32> to vector<1x16x8xf32>
    %61 = tpu.concatenate %57, %58, %59, %60 in 0 : vector<1x16x8xf32>, vector<1x16x8xf32>, vector<1x16x8xf32>, vector<1x16x8xf32> -> vector<4x16x8xf32>
    %62 = vector.shape_cast %61 : vector<4x16x8xf32> to vector<8x8x8xf32>
    %63 = arith.truncf %62 : vector<8x8x8xf32> to vector<8x8x8xbf16>
    %64 = vector.extract_strided_slice %41 {offsets = [0, 0], sizes = [16, 8], strides = [1, 1]} : vector<16x32xf32> to vector<16x8xf32>
    %65 = vector.extract_strided_slice %41 {offsets = [0, 8], sizes = [16, 8], strides = [1, 1]} : vector<16x32xf32> to vector<16x8xf32>
    %66 = vector.extract_strided_slice %41 {offsets = [0, 16], sizes = [16, 8], strides = [1, 1]} : vector<16x32xf32> to vector<16x8xf32>
    %67 = vector.extract_strided_slice %41 {offsets = [0, 24], sizes = [16, 8], strides = [1, 1]} : vector<16x32xf32> to vector<16x8xf32>
    %68 = vector.shape_cast %64 : vector<16x8xf32> to vector<1x16x8xf32>
    %69 = vector.shape_cast %65 : vector<16x8xf32> to vector<1x16x8xf32>
    %70 = vector.shape_cast %66 : vector<16x8xf32> to vector<1x16x8xf32>
    %71 = vector.shape_cast %67 : vector<16x8xf32> to vector<1x16x8xf32>
    %72 = tpu.concatenate %68, %69, %70, %71 in 0 : vector<1x16x8xf32>, vector<1x16x8xf32>, vector<1x16x8xf32>, vector<1x16x8xf32> -> vector<4x16x8xf32>
    %73 = vector.shape_cast %72 : vector<4x16x8xf32> to vector<8x8x8xf32>
    %74 = arith.truncf %73 : vector<8x8x8xf32> to vector<8x8x8xbf16>
    "tpu.trace_start"() <{level = 10 : i32, message = "nqd,nkd->nqk"}> : () -> ()
    %cst_20 = arith.constant dense<0.000000e+00> : vector<8x8x8xf32>
    %75 = tpu.matmul %52, %63, %cst_20 {dimension_numbers = #tpu.dot_dimension_numbers<[2], [2], [1], [1], [0, 0, 0, 1, 1, 1], [0], [0]>} : vector<8x8x8xbf16>, vector<8x8x8xbf16>, vector<8x8x8xf32> -> vector<8x8x8xf32>
    "tpu.trace_stop"() : () -> ()
    %76 = vector.broadcast %10 : vector<1x8x8xf32> to vector<8x8x8xf32>
    %77 = arith.addf %75, %76 : vector<8x8x8xf32>
    %cst_21 = arith.constant dense<0xFF800000> : vector<8x8xf32>
    %78 = vector.multi_reduction <maximumf>, %77, %cst_21 [2] : vector<8x8x8xf32> to vector<8x8xf32>
    %79 = vector.shape_cast %78 : vector<8x8xf32> to vector<8x8x1xf32>
    %80 = vector.broadcast %79 : vector<8x8x1xf32> to vector<8x8x8xf32>
    %81 = arith.subf %77, %80 : vector<8x8x8xf32>
    %82 = math.exp %81 : vector<8x8x8xf32>
    %cst_22 = arith.constant dense<0.000000e+00> : vector<8x8xf32>
    %83 = vector.multi_reduction <add>, %82, %cst_22 [2] : vector<8x8x8xf32> to vector<8x8xf32>
    %84 = vector.shape_cast %83 : vector<8x8xf32> to vector<8x8x1xf32>
    %85 = arith.truncf %82 : vector<8x8x8xf32> to vector<8x8x8xbf16>
    "tpu.trace_start"() <{level = 10 : i32, message = "nqk,nkd->nqd"}> : () -> ()
    %cst_23 = arith.constant dense<0.000000e+00> : vector<8x8x8xf32>
    %86 = tpu.matmul %85, %74, %cst_23 {dimension_numbers = #tpu.dot_dimension_numbers<[2], [1], [1], [2], [0, 0, 0, 1, 1, 2], [0], [0]>} : vector<8x8x8xbf16>, vector<8x8x8xbf16>, vector<8x8x8xf32> -> vector<8x8x8xf32>
    "tpu.trace_stop"() : () -> ()
    %87 = tpu.reciprocal %84 {approx = true} : vector<8x8x1xf32> -> vector<8x8x1xf32>
    %88 = vector.broadcast %87 : vector<8x8x1xf32> to vector<8x8x8xf32>
    %89 = arith.mulf %86, %88 : vector<8x8x8xf32>
    %90 = vector.shape_cast %89 : vector<8x8x8xf32> to vector<4x16x8xf32>
    %91 = vector.extract_strided_slice %90 {offsets = [0, 0, 0], sizes = [1, 16, 8], strides = [1, 1, 1]} : vector<4x16x8xf32> to vector<1x16x8xf32>
    %92 = vector.shape_cast %91 : vector<1x16x8xf32> to vector<16x8xf32>
    %93 = vector.extract_strided_slice %90 {offsets = [1, 0, 0], sizes = [1, 16, 8], strides = [1, 1, 1]} : vector<4x16x8xf32> to vector<1x16x8xf32>
    %94 = vector.shape_cast %93 : vector<1x16x8xf32> to vector<16x8xf32>
    %95 = vector.extract_strided_slice %90 {offsets = [2, 0, 0], sizes = [1, 16, 8], strides = [1, 1, 1]} : vector<4x16x8xf32> to vector<1x16x8xf32>
    %96 = vector.shape_cast %95 : vector<1x16x8xf32> to vector<16x8xf32>
    %97 = vector.extract_strided_slice %90 {offsets = [3, 0, 0], sizes = [1, 16, 8], strides = [1, 1, 1]} : vector<4x16x8xf32> to vector<1x16x8xf32>
    %98 = vector.shape_cast %97 : vector<1x16x8xf32> to vector<16x8xf32>
    %99 = tpu.concatenate %92, %94, %96, %98 in 1 : vector<16x8xf32>, vector<16x8xf32>, vector<16x8xf32>, vector<16x8xf32> -> vector<16x32xf32>
    %100 = arith.truncf %99 : vector<16x32xf32> to vector<16x32xbf16>
    %c0_24 = arith.constant 0 : index
    %c0_25 = arith.constant 0 : index
    %101 = vector.load %arg11[%c0_24, %c0_25] : memref<32x32xbf16, #tpu.memory_space<vmem>>, vector<32x32xbf16>
    %cst_26 = arith.constant dense<0.000000e+00> : vector<16x32xf32>
    %102 = tpu.matmul %100, %101, %cst_26 {dimension_numbers = #tpu.dot_dimension_numbers<[1], [0], [0], [1], [0, 0, 1, 1], [], []>} : vector<16x32xbf16>, vector<32x32xbf16>, vector<16x32xf32> -> vector<16x32xf32>
    %c0_27 = arith.constant 0 : index
    %c0_28 = arith.constant 0 : index
    %103 = vector.load %arg12[%c0_27, %c0_28] : memref<1x32xf32, #tpu.memory_space<vmem>>, vector<1x32xf32>
    %104 = vector.broadcast %103 : vector<1x32xf32> to vector<16x32xf32>
    %105 = arith.addf %102, %104 : vector<16x32xf32>
    %106 = arith.addf %1, %105 : vector<16x32xf32>
    %cst_29 = arith.constant dense<0.000000e+00> : vector<16xf32>
    %107 = vector.multi_reduction <add>, %106, %cst_29 [1] : vector<16x32xf32> to vector<16xf32>
    %108 = vector.shape_cast %107 : vector<16xf32> to vector<16x1xf32>
    %cst_30 = arith.constant 3.200000e+01 : f32
    %109 = vector.broadcast %cst_30 : f32 to vector<16x1xf32>
    %110 = arith.divf %108, %109 : vector<16x1xf32>
    %111 = vector.broadcast %110 : vector<16x1xf32> to vector<16x32xf32>
    %112 = arith.subf %106, %111 : vector<16x32xf32>
    %113 = arith.mulf %112, %112 : vector<16x32xf32>
    %cst_31 = arith.constant dense<0.000000e+00> : vector<16xf32>
    %114 = vector.multi_reduction <add>, %113, %cst_31 [1] : vector<16x32xf32> to vector<16xf32>
    %115 = vector.shape_cast %114 : vector<16xf32> to vector<16x1xf32>
    %cst_32 = arith.constant 3.200000e+01 : f32
    %116 = vector.broadcast %cst_32 : f32 to vector<16x1xf32>
    %117 = arith.divf %115, %116 : vector<16x1xf32>
    %c0_33 = arith.constant 0 : index
    %c0_34 = arith.constant 0 : index
    %118 = vector.load %arg5[%c0_33, %c0_34] : memref<1x32xf32, #tpu.memory_space<vmem>>, vector<1x32xf32>
    %cst_35 = arith.constant 9.99999996E-13 : f32
    %119 = vector.broadcast %cst_35 : f32 to vector<16x1xf32>
    %120 = arith.addf %117, %119 : vector<16x1xf32>
    %121 = math.rsqrt %120 : vector<16x1xf32>
    %122 = vector.broadcast %121 : vector<16x1xf32> to vector<16x32xf32>
    %123 = arith.mulf %112, %122 : vector<16x32xf32>
    %124 = vector.broadcast %118 : vector<1x32xf32> to vector<16x32xf32>
    %125 = arith.mulf %124, %123 : vector<16x32xf32>
    %c0_36 = arith.constant 0 : index
    %c0_37 = arith.constant 0 : index
    %126 = vector.load %arg6[%c0_36, %c0_37] : memref<1x32xf32, #tpu.memory_space<vmem>>, vector<1x32xf32>
    %127 = vector.broadcast %126 : vector<1x32xf32> to vector<16x32xf32>
    %128 = arith.addf %125, %127 : vector<16x32xf32>
    %129 = arith.truncf %128 : vector<16x32xf32> to vector<16x32xbf16>
    %c0_38 = arith.constant 0 : index
    %c0_39 = arith.constant 0 : index
    %130 = vector.load %arg13[%c0_38, %c0_39] : memref<32x32xbf16, #tpu.memory_space<vmem>>, vector<32x32xbf16>
    %cst_40 = arith.constant dense<0.000000e+00> : vector<16x32xf32>
    %131 = tpu.matmul %129, %130, %cst_40 {dimension_numbers = #tpu.dot_dimension_numbers<[1], [0], [0], [1], [0, 0, 1, 1], [], []>} : vector<16x32xbf16>, vector<32x32xbf16>, vector<16x32xf32> -> vector<16x32xf32>
    %c0_41 = arith.constant 0 : index
    %c0_42 = arith.constant 0 : index
    %132 = vector.load %arg14[%c0_41, %c0_42] : memref<1x32xf32, #tpu.memory_space<vmem>>, vector<1x32xf32>
    %133 = vector.broadcast %132 : vector<1x32xf32> to vector<16x32xf32>
    %134 = arith.addf %131, %133 : vector<16x32xf32>
    %135 = arith.truncf %3 : vector<32x32xf32> to vector<32x32xbf16>
    %c0_43 = arith.constant 0 : index
    %c0_44 = arith.constant 0 : index
    %136 = vector.load %arg15[%c0_43, %c0_44] : memref<32x64xbf16, #tpu.memory_space<vmem>>, vector<32x64xbf16>
    %cst_45 = arith.constant dense<0.000000e+00> : vector<32x64xf32>
    %137 = tpu.matmul %135, %136, %cst_45 {dimension_numbers = #tpu.dot_dimension_numbers<[1], [0], [0], [1], [0, 0, 1, 1], [], []>} : vector<32x32xbf16>, vector<32x64xbf16>, vector<32x64xf32> -> vector<32x64xf32>
    %c0_46 = arith.constant 0 : index
    %c0_47 = arith.constant 0 : index
    %138 = vector.load %arg16[%c0_46, %c0_47] : memref<1x64xf32, #tpu.memory_space<vmem>>, vector<1x64xf32>
    %139 = vector.broadcast %138 : vector<1x64xf32> to vector<32x64xf32>
    %140 = arith.addf %137, %139 : vector<32x64xf32>
    %141 = vector.extract_strided_slice %140 {offsets = [0, 0], sizes = [32, 32], strides = [1, 1]} : vector<32x64xf32> to vector<32x32xf32>
    %142 = vector.extract_strided_slice %140 {offsets = [0, 32], sizes = [32, 32], strides = [1, 1]} : vector<32x64xf32> to vector<32x32xf32>
    %143 = vector.extract_strided_slice %134 {offsets = [0, 0], sizes = [16, 8], strides = [1, 1]} : vector<16x32xf32> to vector<16x8xf32>
    %144 = vector.extract_strided_slice %134 {offsets = [0, 8], sizes = [16, 8], strides = [1, 1]} : vector<16x32xf32> to vector<16x8xf32>
    %145 = vector.extract_strided_slice %134 {offsets = [0, 16], sizes = [16, 8], strides = [1, 1]} : vector<16x32xf32> to vector<16x8xf32>
    %146 = vector.extract_strided_slice %134 {offsets = [0, 24], sizes = [16, 8], strides = [1, 1]} : vector<16x32xf32> to vector<16x8xf32>
    %147 = vector.shape_cast %143 : vector<16x8xf32> to vector<1x16x8xf32>
    %148 = vector.shape_cast %144 : vector<16x8xf32> to vector<1x16x8xf32>
    %149 = vector.shape_cast %145 : vector<16x8xf32> to vector<1x16x8xf32>
    %150 = vector.shape_cast %146 : vector<16x8xf32> to vector<1x16x8xf32>
    %151 = tpu.concatenate %147, %148, %149, %150 in 0 : vector<1x16x8xf32>, vector<1x16x8xf32>, vector<1x16x8xf32>, vector<1x16x8xf32> -> vector<4x16x8xf32>
    %152 = vector.shape_cast %151 : vector<4x16x8xf32> to vector<8x8x8xf32>
    %153 = arith.truncf %152 : vector<8x8x8xf32> to vector<8x8x8xbf16>
    %154 = vector.extract_strided_slice %141 {offsets = [0, 0], sizes = [32, 8], strides = [1, 1]} : vector<32x32xf32> to vector<32x8xf32>
    %155 = vector.extract_strided_slice %141 {offsets = [0, 8], sizes = [32, 8], strides = [1, 1]} : vector<32x32xf32> to vector<32x8xf32>
    %156 = vector.extract_strided_slice %141 {offsets = [0, 16], sizes = [32, 8], strides = [1, 1]} : vector<32x32xf32> to vector<32x8xf32>
    %157 = vector.extract_strided_slice %141 {offsets = [0, 24], sizes = [32, 8], strides = [1, 1]} : vector<32x32xf32> to vector<32x8xf32>
    %158 = vector.shape_cast %154 : vector<32x8xf32> to vector<1x32x8xf32>
    %159 = vector.shape_cast %155 : vector<32x8xf32> to vector<1x32x8xf32>
    %160 = vector.shape_cast %156 : vector<32x8xf32> to vector<1x32x8xf32>
    %161 = vector.shape_cast %157 : vector<32x8xf32> to vector<1x32x8xf32>
    %162 = tpu.concatenate %158, %159, %160, %161 in 0 : vector<1x32x8xf32>, vector<1x32x8xf32>, vector<1x32x8xf32>, vector<1x32x8xf32> -> vector<4x32x8xf32>
    %163 = vector.shape_cast %162 : vector<4x32x8xf32> to vector<8x16x8xf32>
    %164 = arith.truncf %163 : vector<8x16x8xf32> to vector<8x16x8xbf16>
    %165 = vector.extract_strided_slice %142 {offsets = [0, 0], sizes = [32, 8], strides = [1, 1]} : vector<32x32xf32> to vector<32x8xf32>
    %166 = vector.extract_strided_slice %142 {offsets = [0, 8], sizes = [32, 8], strides = [1, 1]} : vector<32x32xf32> to vector<32x8xf32>
    %167 = vector.extract_strided_slice %142 {offsets = [0, 16], sizes = [32, 8], strides = [1, 1]} : vector<32x32xf32> to vector<32x8xf32>
    %168 = vector.extract_strided_slice %142 {offsets = [0, 24], sizes = [32, 8], strides = [1, 1]} : vector<32x32xf32> to vector<32x8xf32>
    %169 = vector.shape_cast %165 : vector<32x8xf32> to vector<1x32x8xf32>
    %170 = vector.shape_cast %166 : vector<32x8xf32> to vector<1x32x8xf32>
    %171 = vector.shape_cast %167 : vector<32x8xf32> to vector<1x32x8xf32>
    %172 = vector.shape_cast %168 : vector<32x8xf32> to vector<1x32x8xf32>
    %173 = tpu.concatenate %169, %170, %171, %172 in 0 : vector<1x32x8xf32>, vector<1x32x8xf32>, vector<1x32x8xf32>, vector<1x32x8xf32> -> vector<4x32x8xf32>
    %174 = vector.shape_cast %173 : vector<4x32x8xf32> to vector<8x16x8xf32>
    %175 = arith.truncf %174 : vector<8x16x8xf32> to vector<8x16x8xbf16>
    "tpu.trace_start"() <{level = 10 : i32, message = "nqd,nkd->nqk"}> : () -> ()
    %cst_48 = arith.constant dense<0.000000e+00> : vector<8x8x16xf32>
    %176 = tpu.matmul %153, %164, %cst_48 {dimension_numbers = #tpu.dot_dimension_numbers<[2], [2], [1], [1], [0, 0, 0, 1, 1, 1], [0], [0]>} : vector<8x8x8xbf16>, vector<8x16x8xbf16>, vector<8x8x16xf32> -> vector<8x8x16xf32>
    "tpu.trace_stop"() : () -> ()
    %cst_49 = arith.constant dense<0xFF800000> : vector<8x8xf32>
    %177 = vector.multi_reduction <maximumf>, %176, %cst_49 [2] : vector<8x8x16xf32> to vector<8x8xf32>
    %178 = vector.shape_cast %177 : vector<8x8xf32> to vector<8x8x1xf32>
    %179 = vector.broadcast %178 : vector<8x8x1xf32> to vector<8x8x16xf32>
    %180 = arith.subf %176, %179 : vector<8x8x16xf32>
    %181 = math.exp %180 : vector<8x8x16xf32>
    %cst_50 = arith.constant dense<0.000000e+00> : vector<8x8xf32>
    %182 = vector.multi_reduction <add>, %181, %cst_50 [2] : vector<8x8x16xf32> to vector<8x8xf32>
    %183 = vector.shape_cast %182 : vector<8x8xf32> to vector<8x8x1xf32>
    %184 = arith.truncf %181 : vector<8x8x16xf32> to vector<8x8x16xbf16>
    "tpu.trace_start"() <{level = 10 : i32, message = "nqk,nkd->nqd"}> : () -> ()
    %cst_51 = arith.constant dense<0.000000e+00> : vector<8x8x8xf32>
    %185 = tpu.matmul %184, %175, %cst_51 {dimension_numbers = #tpu.dot_dimension_numbers<[2], [1], [1], [2], [0, 0, 0, 1, 1, 2], [0], [0]>} : vector<8x8x16xbf16>, vector<8x16x8xbf16>, vector<8x8x8xf32> -> vector<8x8x8xf32>
    "tpu.trace_stop"() : () -> ()
    %186 = tpu.reciprocal %183 {approx = true} : vector<8x8x1xf32> -> vector<8x8x1xf32>
    %187 = vector.broadcast %186 : vector<8x8x1xf32> to vector<8x8x8xf32>
    %188 = arith.mulf %185, %187 : vector<8x8x8xf32>
    %189 = vector.shape_cast %188 : vector<8x8x8xf32> to vector<4x16x8xf32>
    %190 = vector.extract_strided_slice %189 {offsets = [0, 0, 0], sizes = [1, 16, 8], strides = [1, 1, 1]} : vector<4x16x8xf32> to vector<1x16x8xf32>
    %191 = vector.shape_cast %190 : vector<1x16x8xf32> to vector<16x8xf32>
    %192 = vector.extract_strided_slice %189 {offsets = [1, 0, 0], sizes = [1, 16, 8], strides = [1, 1, 1]} : vector<4x16x8xf32> to vector<1x16x8xf32>
    %193 = vector.shape_cast %192 : vector<1x16x8xf32> to vector<16x8xf32>
    %194 = vector.extract_strided_slice %189 {offsets = [2, 0, 0], sizes = [1, 16, 8], strides = [1, 1, 1]} : vector<4x16x8xf32> to vector<1x16x8xf32>
    %195 = vector.shape_cast %194 : vector<1x16x8xf32> to vector<16x8xf32>
    %196 = vector.extract_strided_slice %189 {offsets = [3, 0, 0], sizes = [1, 16, 8], strides = [1, 1, 1]} : vector<4x16x8xf32> to vector<1x16x8xf32>
    %197 = vector.shape_cast %196 : vector<1x16x8xf32> to vector<16x8xf32>
    %198 = tpu.concatenate %191, %193, %195, %197 in 1 : vector<16x8xf32>, vector<16x8xf32>, vector<16x8xf32>, vector<16x8xf32> -> vector<16x32xf32>
    %199 = arith.truncf %198 : vector<16x32xf32> to vector<16x32xbf16>
    %c0_52 = arith.constant 0 : index
    %c0_53 = arith.constant 0 : index
    %200 = vector.load %arg17[%c0_52, %c0_53] : memref<32x32xbf16, #tpu.memory_space<vmem>>, vector<32x32xbf16>
    %cst_54 = arith.constant dense<0.000000e+00> : vector<16x32xf32>
    %201 = tpu.matmul %199, %200, %cst_54 {dimension_numbers = #tpu.dot_dimension_numbers<[1], [0], [0], [1], [0, 0, 1, 1], [], []>} : vector<16x32xbf16>, vector<32x32xbf16>, vector<16x32xf32> -> vector<16x32xf32>
    %c0_55 = arith.constant 0 : index
    %c0_56 = arith.constant 0 : index
    %202 = vector.load %arg18[%c0_55, %c0_56] : memref<1x32xf32, #tpu.memory_space<vmem>>, vector<1x32xf32>
    %203 = vector.broadcast %202 : vector<1x32xf32> to vector<16x32xf32>
    %204 = arith.addf %201, %203 : vector<16x32xf32>
    %205 = arith.addf %106, %204 : vector<16x32xf32>
    %cst_57 = arith.constant dense<0.000000e+00> : vector<16xf32>
    %206 = vector.multi_reduction <add>, %205, %cst_57 [1] : vector<16x32xf32> to vector<16xf32>
    %207 = vector.shape_cast %206 : vector<16xf32> to vector<16x1xf32>
    %cst_58 = arith.constant 3.200000e+01 : f32
    %208 = vector.broadcast %cst_58 : f32 to vector<16x1xf32>
    %209 = arith.divf %207, %208 : vector<16x1xf32>
    %210 = vector.broadcast %209 : vector<16x1xf32> to vector<16x32xf32>
    %211 = arith.subf %205, %210 : vector<16x32xf32>
    %212 = arith.mulf %211, %211 : vector<16x32xf32>
    %cst_59 = arith.constant dense<0.000000e+00> : vector<16xf32>
    %213 = vector.multi_reduction <add>, %212, %cst_59 [1] : vector<16x32xf32> to vector<16xf32>
    %214 = vector.shape_cast %213 : vector<16xf32> to vector<16x1xf32>
    %cst_60 = arith.constant 3.200000e+01 : f32
    %215 = vector.broadcast %cst_60 : f32 to vector<16x1xf32>
    %216 = arith.divf %214, %215 : vector<16x1xf32>
    %c0_61 = arith.constant 0 : index
    %c0_62 = arith.constant 0 : index
    %217 = vector.load %arg7[%c0_61, %c0_62] : memref<1x32xf32, #tpu.memory_space<vmem>>, vector<1x32xf32>
    %cst_63 = arith.constant 9.99999996E-13 : f32
    %218 = vector.broadcast %cst_63 : f32 to vector<16x1xf32>
    %219 = arith.addf %216, %218 : vector<16x1xf32>
    %220 = math.rsqrt %219 : vector<16x1xf32>
    %221 = vector.broadcast %220 : vector<16x1xf32> to vector<16x32xf32>
    %222 = arith.mulf %211, %221 : vector<16x32xf32>
    %223 = vector.broadcast %217 : vector<1x32xf32> to vector<16x32xf32>
    %224 = arith.mulf %223, %222 : vector<16x32xf32>
    %c0_64 = arith.constant 0 : index
    %c0_65 = arith.constant 0 : index
    %225 = vector.load %arg8[%c0_64, %c0_65] : memref<1x32xf32, #tpu.memory_space<vmem>>, vector<1x32xf32>
    %226 = vector.broadcast %225 : vector<1x32xf32> to vector<16x32xf32>
    %227 = arith.addf %224, %226 : vector<16x32xf32>
    %228 = arith.truncf %227 : vector<16x32xf32> to vector<16x32xbf16>
    %c0_66 = arith.constant 0 : index
    %c0_67 = arith.constant 0 : index
    %229 = vector.load %arg19[%c0_66, %c0_67] : memref<32x64xbf16, #tpu.memory_space<vmem>>, vector<32x64xbf16>
    %cst_68 = arith.constant dense<0.000000e+00> : vector<16x64xf32>
    %230 = tpu.matmul %228, %229, %cst_68 {dimension_numbers = #tpu.dot_dimension_numbers<[1], [0], [0], [1], [0, 0, 1, 1], [], []>} : vector<16x32xbf16>, vector<32x64xbf16>, vector<16x64xf32> -> vector<16x64xf32>
    %c0_69 = arith.constant 0 : index
    %c0_70 = arith.constant 0 : index
    %231 = vector.load %arg20[%c0_69, %c0_70] : memref<1x64xf32, #tpu.memory_space<vmem>>, vector<1x64xf32>
    %232 = vector.broadcast %231 : vector<1x64xf32> to vector<16x64xf32>
    %233 = arith.addf %230, %232 : vector<16x64xf32>
    %cst_71 = arith.constant 5.000000e-01 : f32
    %234 = vector.broadcast %cst_71 : f32 to vector<16x64xf32>
    %235 = arith.mulf %234, %233 : vector<16x64xf32>
    %cst_72 = arith.constant 4.471500e-02 : f32
    %236 = vector.broadcast %cst_72 : f32 to vector<16x64xf32>
    %237 = arith.mulf %236, %233 : vector<16x64xf32>
    %238 = arith.mulf %237, %233 : vector<16x64xf32>
    %239 = arith.mulf %238, %233 : vector<16x64xf32>
    %240 = arith.addf %233, %239 : vector<16x64xf32>
    %cst_73 = arith.constant 0.797884583 : f32
    %241 = vector.broadcast %cst_73 : f32 to vector<16x64xf32>
    %242 = arith.mulf %241, %240 : vector<16x64xf32>
    %243 = math.tanh %242 : vector<16x64xf32>
    %cst_74 = arith.constant 1.000000e+00 : f32
    %244 = vector.broadcast %cst_74 : f32 to vector<16x64xf32>
    %245 = arith.addf %244, %243 : vector<16x64xf32>
    %246 = arith.mulf %235, %245 : vector<16x64xf32>
    %247 = arith.truncf %246 : vector<16x64xf32> to vector<16x64xbf16>
    %c0_75 = arith.constant 0 : index
    %c0_76 = arith.constant 0 : index
    %248 = vector.load %arg21[%c0_75, %c0_76] : memref<64x32xbf16, #tpu.memory_space<vmem>>, vector<64x32xbf16>
    %cst_77 = arith.constant dense<0.000000e+00> : vector<16x32xf32>
    %249 = tpu.matmul %247, %248, %cst_77 {dimension_numbers = #tpu.dot_dimension_numbers<[1], [0], [0], [1], [0, 0, 1, 1], [], []>} : vector<16x64xbf16>, vector<64x32xbf16>, vector<16x32xf32> -> vector<16x32xf32>
    %c0_78 = arith.constant 0 : index
    %c0_79 = arith.constant 0 : index
    %250 = vector.load %arg22[%c0_78, %c0_79] : memref<1x32xf32, #tpu.memory_space<vmem>>, vector<1x32xf32>
    %251 = vector.broadcast %250 : vector<1x32xf32> to vector<16x32xf32>
    %252 = arith.addf %249, %251 : vector<16x32xf32>
    %253 = arith.addf %205, %252 : vector<16x32xf32>
    %254 = vector.shape_cast %253 : vector<16x32xf32> to vector<2x8x32xf32>
    %c0_80 = arith.constant 0 : index
    %c0_81 = arith.constant 0 : index
    %c0_82 = arith.constant 0 : index
    %255 = vector.load %arg23[%c0_80, %c0_81, %c0_82] : memref<2x8x32xf32, #tpu.memory_space<vmem>>, vector<2x8x32xf32>
    tpu.vector_store %arg23[%c0_80, %c0_81, %c0_82], %254 {strides = array<i32>} : memref<2x8x32xf32, #tpu.memory_space<vmem>>, vector<2x8x32xf32>,
    return
  }
  func.func @transform_0(%arg0: i32) -> (i32, i32, i32) {
    %c0_i32 = arith.constant 0 : i32
    %c0_i32_0 = arith.constant 0 : i32
    %c0_i32_1 = arith.constant 0 : i32
    return %arg0, %c0_i32, %c0_i32_0 : i32, i32, i32
  }
  func.func @transform_1(%arg0: i32) -> (i32, i32, i32) {
    %c0_i32 = arith.constant 0 : i32
    %c0_i32_0 = arith.constant 0 : i32
    %c0_i32_1 = arith.constant 0 : i32
    return %arg0, %c0_i32, %c0_i32_0 : i32, i32, i32
  }
  func.func @transform_2(%arg0: i32) -> (i32, i32) {
    %c0_i32 = arith.constant 0 : i32
    %c0_i32_0 = arith.constant 0 : i32
    %c0_i32_1 = arith.constant 0 : i32
    return %c0_i32, %c0_i32_0 : i32, i32
  }
  func.func @transform_3(%arg0: i32) -> (i32, i32) {
    %c0_i32 = arith.constant 0 : i32
    %c0_i32_0 = arith.constant 0 : i32
    %c0_i32_1 = arith.constant 0 : i32
    return %c0_i32, %c0_i32_0 : i32, i32
  }
  func.func @transform_4(%arg0: i32) -> (i32, i32) {
    %c0_i32 = arith.constant 0 : i32
    %c0_i32_0 = arith.constant 0 : i32
    %c0_i32_1 = arith.constant 0 : i32
    return %c0_i32, %c0_i32_0 : i32, i32
  }
  func.func @transform_5(%arg0: i32) -> (i32, i32) {
    %c0_i32 = arith.constant 0 : i32
    %c0_i32_0 = arith.constant 0 : i32
    %c0_i32_1 = arith.constant 0 : i32
    return %c0_i32, %c0_i32_0 : i32, i32
  }
  func.func @transform_6(%arg0: i32) -> (i32, i32) {
    %c0_i32 = arith.constant 0 : i32
    %c0_i32_0 = arith.constant 0 : i32
    %c0_i32_1 = arith.constant 0 : i32
    return %c0_i32, %c0_i32_0 : i32, i32
  }
  func.func @transform_7(%arg0: i32) -> (i32, i32) {
    %c0_i32 = arith.constant 0 : i32
    %c0_i32_0 = arith.constant 0 : i32
    %c0_i32_1 = arith.constant 0 : i32
    return %c0_i32, %c0_i32_0 : i32, i32
  }
  func.func @transform_8(%arg0: i32) -> (i32, i32) {
    %c0_i32 = arith.constant 0 : i32
    %c0_i32_0 = arith.constant 0 : i32
    %c0_i32_1 = arith.constant 0 : i32
    return %c0_i32, %c0_i32_0 : i32, i32
  }
  func.func @transform_9(%arg0: i32) -> (i32, i32) {
    %c0_i32 = arith.constant 0 : i32
    %c0_i32_0 = arith.constant 0 : i32
    %c0_i32_1 = arith.constant 0 : i32
    return %c0_i32, %c0_i32_0 : i32, i32
  }
  func.func @transform_10(%arg0: i32) -> (i32, i32) {
    %c0_i32 = arith.constant 0 : i32
    %c0_i32_0 = arith.constant 0 : i32
    %c0_i32_1 = arith.constant 0 : i32
    return %c0_i32, %c0_i32_0 : i32, i32
  }
  func.func @transform_11(%arg0: i32) -> (i32, i32) {
    %c0_i32 = arith.constant 0 : i32
    %c0_i32_0 = arith.constant 0 : i32
    %c0_i32_1 = arith.constant 0 : i32
    return %c0_i32, %c0_i32_0 : i32, i32
  }
  func.func @transform_12(%arg0: i32) -> (i32, i32) {
    %c0_i32 = arith.constant 0 : i32
    %c0_i32_0 = arith.constant 0 : i32
    %c0_i32_1 = arith.constant 0 : i32
    return %c0_i32, %c0_i32_0 : i32, i32
  }
  func.func @transform_13(%arg0: i32) -> (i32, i32) {
    %c0_i32 = arith.constant 0 : i32
    %c0_i32_0 = arith.constant 0 : i32
    %c0_i32_1 = arith.constant 0 : i32
    return %c0_i32, %c0_i32_0 : i32, i32
  }
  func.func @transform_14(%arg0: i32) -> (i32, i32) {
    %c0_i32 = arith.constant 0 : i32
    %c0_i32_0 = arith.constant 0 : i32
    %c0_i32_1 = arith.constant 0 : i32
    return %c0_i32, %c0_i32_0 : i32, i32
  }
  func.func @transform_15(%arg0: i32) -> (i32, i32) {
    %c0_i32 = arith.constant 0 : i32
    %c0_i32_0 = arith.constant 0 : i32
    %c0_i32_1 = arith.constant 0 : i32
    return %c0_i32, %c0_i32_0 : i32, i32
  }
  func.func @transform_16(%arg0: i32) -> (i32, i32) {
    %c0_i32 = arith.constant 0 : i32
    %c0_i32_0 = arith.constant 0 : i32
    %c0_i32_1 = arith.constant 0 : i32
    return %c0_i32, %c0_i32_0 : i32, i32
  }
  func.func @transform_17(%arg0: i32) -> (i32, i32) {
    %c0_i32 = arith.constant 0 : i32
    %c0_i32_0 = arith.constant 0 : i32
    %c0_i32_1 = arith.constant 0 : i32
    return %c0_i32, %c0_i32_0 : i32, i32
  }
  func.func @transform_18(%arg0: i32) -> (i32, i32) {
    %c0_i32 = arith.constant 0 : i32
    %c0_i32_0 = arith.constant 0 : i32
    %c0_i32_1 = arith.constant 0 : i32
    return %c0_i32, %c0_i32_0 : i32, i32
  }
  func.func @transform_19(%arg0: i32) -> (i32, i32) {
    %c0_i32 = arith.constant 0 : i32
    %c0_i32_0 = arith.constant 0 : i32
    %c0_i32_1 = arith.constant 0 : i32
    return %c0_i32, %c0_i32_0 : i32, i32
  }
  func.func @transform_20(%arg0: i32) -> (i32, i32) {
    %c0_i32 = arith.constant 0 : i32
    %c0_i32_0 = arith.constant 0 : i32
    %c0_i32_1 = arith.constant 0 : i32
    return %c0_i32, %c0_i32_0 : i32, i32
  }
  func.func @transform_21(%arg0: i32) -> (i32, i32) {
    %c0_i32 = arith.constant 0 : i32
    %c0_i32_0 = arith.constant 0 : i32
    %c0_i32_1 = arith.constant 0 : i32
    return %c0_i32, %c0_i32_0 : i32, i32
  }
  func.func @transform_22(%arg0: i32) -> (i32, i32, i32) {
    %c0_i32 = arith.constant 0 : i32
    %c0_i32_0 = arith.constant 0 : i32
    %c0_i32_1 = arith.constant 0 : i32
    return %arg0, %c0_i32, %c0_i32_0 : i32, i32, i32
  }
}

</mosaic_0001>

<bundles_post_ra>
// kernel: tpu_custom_call.1
= control target key start
LH: loop header
LB: loop body
LE: loop exit
PB: predicated region body
PF: predicated region fallthrough
CT: control target
= control target key end

     0   :  { %s6050_s0 = inlined_call_operand.vmem [shape: f32[4,8,32], index: 0, kind: input, shape index: {}]   ;;  %s6051_s1 = inlined_call_operand.hbm [shape: f32[4,16,32], index: 1, kind: input, shape index: {}]   ;;  %s6052_s2 = inlined_call_operand.hbm [shape: f32[1,32], index: 2, kind: input, shape index: {}]   ;;  %s6053_s3 = inlined_call_operand.hbm [shape: f32[1,32], index: 3, kind: input, shape index: {}]   ;;  %s6054_s4 = inlined_call_operand.hbm [shape: f32[1,32], index: 4, kind: input, shape index: {}]   ;;  %s6055_s5 = inlined_call_operand.hbm [shape: f32[1,32], index: 5, kind: input, shape index: {}]   ;;  %s6056_s6 = inlined_call_operand.hbm [shape: f32[1,32], index: 6, kind: input, shape index: {}]   ;;  %s6057_s7 = inlined_call_operand.hbm [shape: f32[1,32], index: 7, kind: input, shape index: {}]   ;;  %s6058_s8 = inlined_call_operand.vmem [shape: bf16[32,96], index: 8, kind: input, shape index: {}]   ;;  %s6059_s9 = inlined_call_operand.hbm [shape: f32[1,96], index: 9, kind: input, shape index: {}]   ;;  %s6060_s10 = inlined_call_operand.vmem [shape: bf16[32,32], index: 10, kind: input, shape index: {}]   ;;  %s6061_s11 = inlined_call_operand.hbm [shape: f32[1,32], index: 11, kind: input, shape index: {}]   ;;  %s6062_s12 = inlined_call_operand.hbm [shape: bf16[32,32], index: 12, kind: input, shape index: {}]   ;;  %s6063_s13 = inlined_call_operand.hbm [shape: f32[1,32], index: 13, kind: input, shape index: {}]   ;;  %s6064_s14 = inlined_call_operand.hbm [shape: bf16[32,64], index: 14, kind: input, shape index: {}]   ;;  %s6065_s15 = inlined_call_operand.hbm [shape: f32[1,64], index: 15, kind: input, shape index: {}]   ;;  %s6066_s16 = inlined_call_operand.hbm [shape: bf16[32,32], index: 16, kind: input, shape index: {}]   ;;  %s6067_s17 = inlined_call_operand.hbm [shape: f32[1,32], index: 17, kind: input, shape index: {}]   ;;  %s6068_s18 = inlined_call_operand.hbm [shape: bf16[32,64], index: 18, kind: input, shape index: {}]   ;;  %s6069_s19 = inlined_call_operand.vmem [shape: f32[1,64], index: 19, kind: input, shape index: {}]   ;;  %s6070_s20 = inlined_call_operand.vmem [shape: bf16[64,32], index: 20, kind: input, shape index: {}]   ;;  %s6071_s21 = inlined_call_operand.vmem [shape: f32[1,32], index: 21, kind: input, shape index: {}]   ;;  %s6072_s22 = inlined_call_operand.hbm [shape: f32[4,8,32], index: 22, kind: output, shape index: {}]  }
   0x1   :  { %6081 = sst [smem:[#allocation39_spill]] %s6050_s0 }
   0x2   :  { %6082 = sst [smem:[#allocation40_spill]] %s6051_s1 }
   0x3   :  { %6083 = sst [smem:[#allocation41_spill]] %s6052_s2 }
   0x4   :  { %6084 = sst [smem:[#allocation42_spill]] %s6053_s3 }
   0x5   :  { %6085 = sst [smem:[#allocation43_spill]] %s6054_s4 }
   0x6   :  { %6086 = sst [smem:[#allocation44_spill]] %s6055_s5 }
   0x7   :  { %6087 = sst [smem:[#allocation45_spill]] %s6056_s6 }
   0x8   :  { %6088 = sst [smem:[#allocation46_spill]] %s6057_s7 }
   0x9   :  { %6089 = sst [smem:[#allocation47_spill]] %s6059_s9 }
   0xa   :  { %6090 = sst [smem:[#allocation48_spill]] %s6061_s11 }
   0xb   :  { %6091 = sst [smem:[#allocation49_spill]] %s6062_s12 }
   0xc   :  { %6092 = sst [smem:[#allocation50_spill]] %s6063_s13 }
   0xd   :  { %6093 = sst [smem:[#allocation51_spill]] %s6064_s14 }
   0xe   :  { %6094 = sst [smem:[#allocation52_spill]] %s6065_s15 }
   0xf   :  { %6095 = sst [smem:[#allocation53_spill]] %s6069_s19 }
  0x10   :  { %6096 = sst [smem:[#allocation54_spill]] %s6071_s21 }
  0x11   :  { %6097 = sst [smem:[#allocation55_spill]] %s6072_s22 }
  0x12   :  { %27 = vsyncpa [#allocation3], 0 }
  0x13   :  { %29 = vsyncpa [#allocation3 + $0x1], 0 }
  0x14   :  { %30 = vsyncpa [#allocation6], 0 }
  0x15   :  { %31 = vsyncpa [#allocation9], 0 }
  0x16   :  { %32 = vsyncpa [#allocation12], 0 }
  0x17   :  { %33 = vsyncpa [#allocation15], 0 }
  0x18   :  { %34 = vsyncpa [#allocation18], 0 }
  0x19   :  { %35 = vsyncpa [#allocation21], 0 }
  0x1a   :  { %36 = vsyncpa [#allocation24], 0 }
  0x1b   :  { %37 = vsyncpa [#allocation27], 0 }
  0x1c   :  { %38 = vsyncpa [#allocation4], 0 }
  0x1d   :  { %40 = vsyncpa [#allocation4 + $0x1], 0  ;;  %s5245_s3 = smov 0   ;;  %s5247_s28 = smov 0  }
  0x1e   :  { %s5249_s29 = smov 0   ;;  %s5251_s30 = smov 0  }
  0x1f LB: > { %s5097_s4 = smov [#allocation5]   ;;  %s5266_s23 = sadd.s32 4294967295, %s5095_s30   ;;  %s5095_s30 = sphi %s5251_s30, %s6149_s30   ;;  %s5091_s29 = sphi %s5249_s29, %s6148_s29   ;;  %s5087_s28 = sphi %s5247_s28, %s6147_s28   ;;  %s5083_s3 = sphi %s5245_s3, %s6146_s3  }
  0x20   : > { %s562_s0 = sshll.u32 %s5097_s4, 4  ;;  %p3724_p0 = scmp.ge.s32.totalorder %s5095_s30, 1  ;;  %s563_s0 = int_to_ptr.vmem [resolvable:$true] %s562_s0 }
  0x21   : > { %p6075_p1 = scmp.eq.s32.totalorder %s5266_s23, 0  ;;  %p549_p2 = scmp.lt.s32.totalorder %s5095_s30, 3 }
  0x22   : > { %s5098_s5 = smov [#allocation8]   ;;  %s5099_s6 = smov [#allocation11]  }
  0x23   : > { %p5271_p3 = pnand %p3724_p0, %p549_p2  ;;  %s584_s24 = sshll.u32 %s5098_s5, 4  ;;  %s5278_s24 = int_to_ptr.vmem [resolvable:$true] %s584_s24 }
  0x24   : > { %s606_s25 = sshll.u32 %s5099_s6, 4  ;;  %s5100_s2 = smov [#allocation14]   ;;  %s5286_s25 = int_to_ptr.vmem [resolvable:$true] %s606_s25 }
  0x25   : > { %s6098_s1 = scalar_select %p5271_p3, 1, 0 }
  0x26   : > { %p4246_p5 = pneg %p5271_p3  ;;  %s5288_s27 = sshll.u32 %s5100_s2, 4  ;;  %s632_s27 = int_to_ptr.vmem [resolvable:$true] %s5288_s27 }
  0x27   : > { %s4592_s5 = scalar_lea.vmem %s563_s0, 16  ;;  %s4599_s6 = scalar_lea.vmem %s563_s0, 32 }
  0x28   : > { %p5282_p6 = pnand %p4246_p5, %p6075_p1  ;;  %p4593_p8 = scmp.ne.s32.totalorder %s563_s0, %s4592_s5 }
  0x29   : > { %p4600_p11 = scmp.lt.s32.totalorder %s563_s0, %s563_s0  ;;  %p4601_p12 = scmp.lt.s32.totalorder %s4599_s6, %s4592_s5 }
  0x2a   : > { %p5292_p7 = pneg %p5282_p6 }
  0x2b   : > { %p4602_p13 = por %p4601_p12, %p4600_p11 }
  0x2c   : > { %p4595_p9 = pnand %p4593_p8, %p5292_p7 }
  0x2e   : > { %p4596_p10 = pneg %p4595_p9 }
  0x30   : > { %p4603_p0 = pnand %p4602_p13, %p4596_p10 }
  0x32   : > { %4606 = shalt.err (!%p4603_p0)
}
  0x33   : > { %s6101_s21 = sld [smem:[#allocation41_spill]]  ;;  %s4618_s19 = scalar_lea.vmem %s5278_s24, 16 }
  0x34   : > { %p4619_p2 = scmp.ne.s32.totalorder %s5278_s24, %s4618_s19  ;;  %s4625_s5 = scalar_lea.vmem %s5278_s24, 32 }
  0x35   : > { %p4626_p9 = scmp.lt.s32.totalorder %s5278_s24, %s5278_s24  ;;  %p4627_p10 = scmp.lt.s32.totalorder %s4625_s5, %s4618_s19 }
  0x36   : > { %p4621_p5 = pnand %p4619_p2, %p5292_p7 }
  0x37   : > { %p4628_p11 = por %p4627_p10, %p4626_p9 }
  0x38   : > { %p4622_p8 = pneg %p4621_p5 }
  0x39   : > { %4249 = dma.hbm_to_vmem [thread:$0]  (!%p5282_p6), %s6101_s21, 16, %s563_s0, [#allocation6]  }
  0x3a   : > { %p4629_p12 = pnand %p4628_p11, %p4622_p8 }
  0x3c   : > { %4632 = shalt.err (!%p4629_p12)
}
  0x3d   : > { %s6102_s2 = sld [smem:[#allocation43_spill]]  ;;  %s4644_s21 = scalar_lea.vmem %s5286_s25, 16 }
  0x3e   : > { %p4645_p13 = scmp.ne.s32.totalorder %s5286_s25, %s4644_s21  ;;  %s4651_s19 = scalar_lea.vmem %s5286_s25, 32 }
  0x3f   : > { %p4652_p5 = scmp.lt.s32.totalorder %s5286_s25, %s5286_s25  ;;  %p4653_p8 = scmp.lt.s32.totalorder %s4651_s19, %s4644_s21 }
  0x40   : > { %p4647_p0 = pnand %p4645_p13, %p5292_p7 }
  0x41   : > { %p4654_p9 = por %p4653_p8, %p4652_p5 }
  0x42   : > { %p4648_p2 = pneg %p4647_p0 }
  0x43   : > { %4255 = dma.hbm_to_vmem [thread:$0]  (!%p5282_p6), %s6102_s2, 16, %s5278_s24, [#allocation9]  }
  0x44   : > { %p4655_p10 = pnand %p4654_p9, %p4648_p2 }
  0x46   : > { %4658 = shalt.err (!%p4655_p10)
}
  0x47   : > { %s6103_s22 = sld [smem:[#allocation45_spill]]  ;;  %s5101_s24 = smov [#allocation17]  }
  0x48   : > { %s655_s6 = sshll.u32 %s5101_s24, 4  ;;  %s4670_s2 = scalar_lea.vmem %s632_s27, 16  ;;  %s656_s6 = int_to_ptr.vmem [resolvable:$true] %s655_s6 }
  0x49   : > { %p4671_p11 = scmp.ne.s32.totalorder %s632_s27, %s4670_s2  ;;  %s4677_s21 = scalar_lea.vmem %s632_s27, 32 }
  0x4a   : > { %p4678_p0 = scmp.lt.s32.totalorder %s632_s27, %s632_s27  ;;  %p4679_p2 = scmp.lt.s32.totalorder %s4677_s21, %s4670_s2 }
  0x4b   : > { %p4673_p12 = pnand %p4671_p11, %p5292_p7 }
  0x4c   : > { %p4680_p5 = por %p4679_p2, %p4678_p0 }
  0x4d   : > { %4261 = dma.hbm_to_vmem [thread:$0]  (!%p5282_p6), %s6103_s22, 16, %s5286_s25, [#allocation12]  }
  0x4e   : > { %p4674_p13 = pneg %p4673_p12 }
  0x50   : > { %p4681_p8 = pnand %p4680_p5, %p4674_p13 }
  0x52   : > { %4684 = shalt.err (!%p4681_p8)
}
  0x53   : > { %s6104_s9 = sld [smem:[#allocation47_spill]]  ;;  %s4696_s25 = scalar_lea.vmem %s656_s6, 256 }
  0x54   : > { %p4697_p9 = scmp.ne.s32.totalorder %s656_s6, %s4696_s25  ;;  %p4704_p12 = scmp.lt.s32.totalorder %s656_s6, %s656_s6 }
  0x55   : > { %p4705_p4 = scmp.lt.s32.totalorder %s4696_s25, %s4696_s25 }
  0x56   : > { %p4699_p10 = pnand %p4697_p9, %p5292_p7 }
  0x57   : > { %p4706_p1 = por %p4705_p4, %p4704_p12 }
  0x58   : > { %p4700_p11 = pneg %p4699_p10 }
  0x59   : > { %4267 = dma.hbm_to_vmem [thread:$0]  (!%p5282_p6), %s6104_s9, 16, %s632_s27, [#allocation15]  }
  0x5a   : > { %p4707_p3 = pnand %p4706_p1, %p4700_p11 }
  0x5c   : > { %4710 = shalt.err (!%p4707_p3)
}
  0x5d   : > { %s6077_s5 = smov 64   ;;  %s6078_s22 = smov 4  }
  0x5e   : > { %s6105_s12 = sld [smem:[#allocation49_spill]]  ;;  %s5104_s2 = smov [#allocation20]  }
  0x5f   : > { %s679_s21 = sshll.u32 %s5104_s2, 4  ;;  %s5105_s19 = smov [#allocation23]   ;;  %s680_s21 = int_to_ptr.vmem [resolvable:$true] %s679_s21 }
  0x60   : > { %s703_s0 = sshll.u32 %s5105_s19, 4  ;;  %s4722_s25 = scalar_lea.vmem %s680_s21, 256  ;;  %s704_s0 = int_to_ptr.vmem [resolvable:$true] %s703_s0 }
  0x61   : > { %p4723_p1 = scmp.ne.s32.totalorder %s680_s21, %s4722_s25  ;;  %p4730_p13 = scmp.lt.s32.totalorder %s680_s21, %s680_s21 }
  0x62   : > { %p4731_p0 = scmp.lt.s32.totalorder %s4722_s25, %s4722_s25 }
  0x63   : > { %p4725_p3 = pnand %p4723_p1, %p5292_p7 }
  0x64   : > { %4273 = dma.hbm_to_vmem [thread:$0]  (!%p5282_p6), %s6105_s12, 256, %s656_s6, [#allocation18], %s6077_s5, %s6077_s5, %s6078_s22  }
  0x65   : > { %p4726_p4 = pneg %p4725_p3  ;;  %p4732_p2 = por %p4731_p0, %p4730_p13 }
  0x67   : > { %p4733_p5 = pnand %p4732_p2, %p4726_p4 }
  0x69   : > { %4736 = shalt.err (!%p4733_p5)
}
  0x6a   : > { %s6106_s14 = sld [smem:[#allocation51_spill]]  ;;  %s4748_s24 = scalar_lea.vmem %s704_s0, 256 }
  0x6b   : > { %p4749_p8 = scmp.ne.s32.totalorder %s704_s0, %s4748_s24  ;;  %p4756_p11 = scmp.lt.s32.totalorder %s704_s0, %s704_s0 }
  0x6c   : > { %p4757_p12 = scmp.lt.s32.totalorder %s4748_s24, %s4748_s24 }
  0x6d   : > { %p4751_p9 = pnand %p4749_p8, %p5292_p7 }
  0x6e   : > { %p4758_p1 = por %p4757_p12, %p4756_p11 }
  0x6f   : > { %p4752_p10 = pneg %p4751_p9 }
  0x70   : > { %4279 = dma.hbm_to_vmem [thread:$0]  (!%p5282_p6), %s6106_s14, 256, %s680_s21, [#allocation21], %s6077_s5, %s6077_s5, %s6078_s22  }
  0x71   : > { %p4759_p3 = pnand %p4758_p1, %p4752_p10 }
  0x73   : > { %4762 = shalt.err (!%p4759_p3)
}
  0x74   : > { %4285 = dma.hbm_to_vmem [thread:$0]  (!%p5282_p6), %s6066_s16, 256, %s704_s0, [#allocation24], %s6077_s5, %s6077_s5, %s6078_s22  }
  0x75   : > { %s5106_s21 = smov [#allocation7]   ;;  %s5107_s6 = smov [#allocation10]  }
  0x76   : > { %s573_s25 = sshll.u32 %s5106_s21, 4  ;;  %s595_s27 = sshll.u32 %s5107_s6, 4  ;;  %s574_s25 = int_to_ptr.vmem [resolvable:$true] %s573_s25  ;;  %s596_s27 = int_to_ptr.vmem [resolvable:$true] %s595_s27 }
  0x77   : > { %s4774_s9 = scalar_lea.vmem %s574_s25, 16  ;;  %s4781_s24 = scalar_lea.vmem %s574_s25, 32 }
  0x78   : > { %p4775_p4 = scmp.ne.s32.totalorder %s574_s25, %s4774_s9  ;;  %p4782_p2 = scmp.lt.s32.totalorder %s574_s25, %s574_s25 }
  0x79   : > { %p4783_p5 = scmp.lt.s32.totalorder %s4781_s24, %s4774_s9 }
  0x7a   : > { %p4777_p13 = pnand %p4775_p4, %p5292_p7 }
  0x7b   : > { %p4784_p8 = por %p4783_p5, %p4782_p2 }
  0x7c   : > { %p4778_p0 = pneg %p4777_p13 }
  0x7e   : > { %p4785_p9 = pnand %p4784_p8, %p4778_p0 }
  0x80   : > { %4788 = shalt.err (!%p4785_p9)
}
  0x81   : > { %s6107_s19 = sld [smem:[#allocation42_spill]]  ;;  %s4800_s21 = scalar_lea.vmem %s596_s27, 16 }
  0x82   : > { %p4801_p10 = scmp.ne.s32.totalorder %s596_s27, %s4800_s21  ;;  %s4807_s6 = scalar_lea.vmem %s596_s27, 32 }
  0x83   : > { %p4808_p1 = scmp.lt.s32.totalorder %s596_s27, %s596_s27  ;;  %p4809_p3 = scmp.lt.s32.totalorder %s4807_s6, %s4800_s21 }
  0x84   : > { %p4803_p11 = pnand %p4801_p10, %p5292_p7 }
  0x85   : > { %p4810_p4 = por %p4809_p3, %p4808_p1 }
  0x86   : > { %p4804_p12 = pneg %p4803_p11 }
  0x87   : > { %4252 = dma.hbm_to_vmem [thread:$0]  (!%p5282_p6), %s6107_s19, 16, %s574_s25, [#allocation6]  }
  0x88   : > { %p4811_p13 = pnand %p4810_p4, %p4804_p12 }
  0x8a   : > { %4814 = shalt.err (!%p4811_p13)
}
  0x8b   : > { %s6108_s5 = sld [smem:[#allocation44_spill]]  ;;  %s5108_s25 = smov [#allocation13]  }
  0x8c   : > { %s617_s2 = sshll.u32 %s5108_s25, 4  ;;  %s5109_s0 = smov [#allocation16]   ;;  %s618_s2 = int_to_ptr.vmem [resolvable:$true] %s617_s2 }
  0x8d   : > { %s645_s19 = sshll.u32 %s5109_s0, 4  ;;  %s4826_s22 = scalar_lea.vmem %s618_s2, 16  ;;  %s646_s19 = int_to_ptr.vmem [resolvable:$true] %s645_s19 }
  0x8e   : > { %p4827_p0 = scmp.ne.s32.totalorder %s618_s2, %s4826_s22  ;;  %s4833_s21 = scalar_lea.vmem %s618_s2, 32 }
  0x8f   : > { %p4834_p8 = scmp.lt.s32.totalorder %s618_s2, %s618_s2  ;;  %p4835_p9 = scmp.lt.s32.totalorder %s4833_s21, %s4826_s22 }
  0x90   : > { %p4829_p2 = pnand %p4827_p0, %p5292_p7 }
  0x91   : > { %4258 = dma.hbm_to_vmem [thread:$0]  (!%p5282_p6), %s6108_s5, 16, %s596_s27, [#allocation9]  }
  0x92   : > { %p4830_p5 = pneg %p4829_p2  ;;  %p4836_p10 = por %p4835_p9, %p4834_p8 }
  0x94   : > { %p4837_p11 = pnand %p4836_p10, %p4830_p5 }
  0x96   : > { %4840 = shalt.err (!%p4837_p11)
}
  0x97   : > { %s6109_s7 = sld [smem:[#allocation46_spill]]  ;;  %s4852_s27 = scalar_lea.vmem %s646_s19, 16 }
  0x98   : > { %p4853_p12 = scmp.ne.s32.totalorder %s646_s19, %s4852_s27  ;;  %s4859_s9 = scalar_lea.vmem %s646_s19, 32 }
  0x99   : > { %p4860_p4 = scmp.lt.s32.totalorder %s646_s19, %s646_s19  ;;  %p4861_p13 = scmp.lt.s32.totalorder %s4859_s9, %s4852_s27 }
  0x9a   : > { %p4855_p1 = pnand %p4853_p12, %p5292_p7 }
  0x9b   : > { %p4862_p0 = por %p4861_p13, %p4860_p4 }
  0x9c   : > { %p4856_p3 = pneg %p4855_p1 }
  0x9d   : > { %4264 = dma.hbm_to_vmem [thread:$0]  (!%p5282_p6), %s6109_s7, 16, %s618_s2, [#allocation12]  }
  0x9e   : > { %p4863_p2 = pnand %p4862_p0, %p4856_p3 }
  0xa0   : > { %4866 = shalt.err (!%p4863_p2)
}
  0xa1   : > { %s6110_s11 = sld [smem:[#allocation48_spill]]  ;;  %s5110_s25 = smov [#allocation19]  }
  0xa2   : > { %s669_s2 = sshll.u32 %s5110_s25, 4  ;;  %s5111_s0 = smov [#allocation22]   ;;  %s670_s2 = int_to_ptr.vmem [resolvable:$true] %s669_s2 }
  0xa3   : > { %s693_s21 = sshll.u32 %s5111_s0, 4  ;;  %s4878_s6 = scalar_lea.vmem %s670_s2, 16  ;;  %s694_s21 = int_to_ptr.vmem [resolvable:$true] %s693_s21 }
  0xa4   : > { %p4879_p5 = scmp.ne.s32.totalorder %s670_s2, %s4878_s6  ;;  %s4885_s5 = scalar_lea.vmem %s670_s2, 32 }
  0xa5   : > { %p4886_p10 = scmp.lt.s32.totalorder %s670_s2, %s670_s2  ;;  %p4887_p11 = scmp.lt.s32.totalorder %s4885_s5, %s4878_s6 }
  0xa6   : > { %p4881_p8 = pnand %p4879_p5, %p5292_p7 }
  0xa7   : > { %4270 = dma.hbm_to_vmem [thread:$0]  (!%p5282_p6), %s6110_s11, 16, %s646_s19, [#allocation15]  }
  0xa8   : > { %p4882_p9 = pneg %p4881_p8  ;;  %p4888_p12 = por %p4887_p11, %p4886_p10 }
  0xaa   : > { %p4889_p1 = pnand %p4888_p12, %p4882_p9 }
  0xac   : > { %4892 = shalt.err (!%p4889_p1)
}
  0xad   : > { %s6111_s13 = sld [smem:[#allocation50_spill]]  ;;  %s4904_s9 = scalar_lea.vmem %s694_s21, 16 }
  0xae   : > { %p4905_p3 = scmp.ne.s32.totalorder %s694_s21, %s4904_s9  ;;  %s4911_s22 = scalar_lea.vmem %s694_s21, 32 }
  0xaf   : > { %p4912_p0 = scmp.lt.s32.totalorder %s694_s21, %s694_s21  ;;  %p4913_p2 = scmp.lt.s32.totalorder %s4911_s22, %s4904_s9 }
  0xb0   : > { %p4907_p4 = pnand %p4905_p3, %p5292_p7 }
  0xb1   : > { %p4914_p5 = por %p4913_p2, %p4912_p0 }
  0xb2   : > { %p4908_p13 = pneg %p4907_p4 }
  0xb3   : > { %4276 = dma.hbm_to_vmem [thread:$0]  (!%p5282_p6), %s6111_s13, 16, %s670_s2, [#allocation18]  }
  0xb4   : > { %p4915_p8 = pnand %p4914_p5, %p4908_p13 }
  0xb6   : > { %4918 = shalt.err (!%p4915_p8)
}
  0xb7   : > { %s6112_s15 = sld [smem:[#allocation52_spill]]  ;;  %s5112_s2 = smov [#allocation25]  }
  0xb8   : > { %s717_s0 = sshll.u32 %s5112_s2, 4  ;;  %s5113_s6 = smov [#allocation26]   ;;  %s718_s0 = int_to_ptr.vmem [resolvable:$true] %s717_s0 }
  0xb9   : > { %s727_s5 = sshll.u32 %s5113_s6, 4  ;;  %s4930_s27 = scalar_lea.vmem %s718_s0, 16  ;;  %s728_s5 = int_to_ptr.vmem [resolvable:$true] %s727_s5 }
  0xba   : > { %p4931_p9 = scmp.ne.s32.totalorder %s718_s0, %s4930_s27  ;;  %s4937_s19 = scalar_lea.vmem %s718_s0, 32 }
  0xbb   : > { %p4938_p12 = scmp.lt.s32.totalorder %s718_s0, %s718_s0  ;;  %p4939_p1 = scmp.lt.s32.totalorder %s4937_s19, %s4930_s27 }
  0xbc   : > { %p4933_p10 = pnand %p4931_p9, %p5292_p7 }
  0xbd   : > { %4282 = dma.hbm_to_vmem [thread:$0]  (!%p5282_p6), %s6112_s15, 16, %s694_s21, [#allocation21]  }
  0xbe   : > { %p4934_p11 = pneg %p4933_p10  ;;  %p4940_p3 = por %p4939_p1, %p4938_p12 }
  0xc0   : > { %p4941_p4 = pnand %p4940_p3, %p4934_p11 }
  0xc2   : > { %4944 = shalt.err (!%p4941_p4)
}
  0xc3   : > { %4288 = dma.hbm_to_vmem [thread:$0]  (!%p5282_p6), %s6067_s17, 16, %s718_s0, [#allocation24]  }
  0xc4   : > { %s4956_s22 = scalar_lea.vmem %s728_s5, 256  ;;  %p4964_p5 = scmp.lt.s32.totalorder %s728_s5, %s728_s5 }
  0xc5   : > { %p4957_p13 = scmp.ne.s32.totalorder %s728_s5, %s4956_s22  ;;  %p4965_p8 = scmp.lt.s32.totalorder %s4956_s22, %s4956_s22 }
  0xc7   : > { %p4959_p0 = pnand %p4957_p13, %p5292_p7  ;;  %p4966_p9 = por %p4965_p8, %p4964_p5 }
  0xc9   : > { %p4960_p2 = pneg %p4959_p0 }
  0xcb   : > { %p4967_p10 = pnand %p4966_p9, %p4960_p2 }
  0xcd   : > { %4970 = shalt.err (!%p4967_p10)
}
  0xce   : > { %s6113_s24 = smov 4   ;;  %s6114_s25 = smov 64  }
  0xcf   : > { %4291 = dma.hbm_to_vmem [thread:$0]  (!%p5282_p6), %s6068_s18, 256, %s728_s5, [#allocation27], %s6114_s25, %s6114_s25, %s6113_s24  }
  0xd0   : > { %s3723_s26 = sadd.s32 4294967294, %s5095_s30   ;;  %s5428_s4 = sadd.s32 1, %s5095_s30  }
  0xd1   : > { %s79_s0 = sadd.s32 1, %s5091_s29  ;;  %s76_s27 = ssub.s32 %s5095_s30, %s5428_s4 }
  0xd2   : > { %p86_p7 = scmp.ne.s32.totalorder %s5091_s29, %s5087_s28  ;;  %p77_p11 = scmp.eq.s32.totalorder %s76_s27, 0 }
  0xd3   : > { %p87_p12 = scmp.eq.s32.totalorder %s5095_s30, 0  ;;  %p92_p1 = scmp.ne.s32.totalorder %s5087_s28, %s5083_s3 }
  0xd4   : > { %p536_p3 = scmp.eq.s32.totalorder %s5266_s23, 1  ;;  %p6115_p13 = scmp.eq.s32.totalorder %s5266_s23, 0 }
  0xd5   : > { %s5440_s19 = scalar_select %p77_p11, %s5091_s29, %s79_s0  }
  0xd6   : > { %p88_p4 = por %p87_p12, %p86_p7  ;;  %p5444_p0 = por %p6115_p13, %p92_p1 }
  0xd7   : > { %p5448_p6 = por %p536_p3, %p86_p7  ;;  %p542_p2 = scmp.eq.s32.totalorder %s3723_s26, 1 }
  0xd8   : > { %s6116_s9 = scalar_select %p5444_p0, 1, 0 }
  0xd9   : > { %s6117_s5 = scalar_select %p5448_p6, 1, 0 }
  0xda   : > { %p4315_p5 = scmp.lt.s32.totalorder %s5095_s30, 2  ;;  %s759_s21 = sand.u32 1, %s5091_s29  }
  0xdb   : > { %p5454_p8 = por %p542_p2, %p92_p1  ;;  %s3741_s24 = sshll.u32 %s759_s21, 5 }
  0xdc   : > { %s3840_s25 = sshll.u32 %s5095_s30, 9  ;;  %s6119_s0 = sld [smem:[#allocation40_spill]] }
  0xdd   : > { %s6118_s22 = scalar_select %p5454_p8, 1, 0 }
  0xde   : > { %s763_s7 = scalar_lea.vmem [#allocation2], %s3741_s24  ;;  %p5464_p9 = pnand %p4315_p5, %p88_p4 }
  0xdf   : > { %s771_s11 = sshll.u32 %s763_s7, 4  ;;  %s5470_s12 = scalar_lea.sflag [#allocation3], %s759_s21  ;;  %s5468_s11 = int_to_ptr.vmem [resolvable:$true] %s771_s11 }
  0xe0   : > { %p4973_p7 = pneg %p5464_p9 }
  0xe2   : > { %s5462_s27 = scalar_lea.hbm %s6119_s0, %s3840_s25  ;;  %s4976_s24 = scalar_lea.hbm %s6119_s0, 1024 }
  0xe3   : > { %s4971_s13 = scalar_lea.hbm %s5462_s27, 512  ;;  %p4977_p1 = scmp.lt.s32.totalorder %s5462_s27, %s6119_s0 }
  0xe4   : > { %p4972_p10 = scmp.ne.s32.totalorder %s5462_s27, %s4971_s13  ;;  %p4978_p3 = scmp.lt.s32.totalorder %s4976_s24, %s4971_s13 }
  0xe6   : > { %p4974_p11 = pnand %p4973_p7, %p4972_p10  ;;  %p4979_p4 = por %p4978_p3, %p4977_p1 }
  0xe8   : > { %p4975_p12 = pneg %p4974_p11 }
  0xea   : > { %p4980_p13 = pnand %p4979_p4, %p4975_p12 }
  0xec   : > { %4983 = shalt.err (!%p4980_p13)
}
  0xed   : > { %s4984_s21 = scalar_lea.vmem %s5468_s11, 512  ;;  %s5114_s14 = smov [#allocation2]  }
  0xee   : > { %p4985_p2 = scmp.ne.s32.totalorder %s5468_s11, %s4984_s21  ;;  %s4989_s15 = sshll.u32 %s5114_s14, 4  ;;  %s4990_s15 = int_to_ptr.vmem [resolvable:$false] %s4989_s15 }
  0xef   : > { %s4991_s25 = scalar_lea.vmem %s4990_s15, 1024  ;;  %p4992_p11 = scmp.lt.s32.totalorder %s5468_s11, %s4990_s15 }
  0xf0   : > { %p4987_p5 = pnand %p4985_p2, %p4973_p7  ;;  %p4993_p8 = scmp.lt.s32.totalorder %s4991_s25, %s4984_s21 }
  0xf2   : > { %p4988_p10 = pneg %p4987_p5  ;;  %p4994_p6 = por %p4993_p8, %p4992_p11 }
  0xf4   : > { %p4995_p0 = pnand %p4994_p6, %p4988_p10 }
  0xf6   : > { %4998 = shalt.err (!%p4995_p0)
}
  0xf7   : > { %s5115_s13 = smov 128   ;;  %s5116_s2 = smov 8  }
  0xf8   : > { %4295 = dma.hbm_to_vmem [thread:$0]  (!%p5464_p9), %s5462_s27, 512, %s5468_s11, %s5470_s12, %s5115_s13, %s5115_s13, %s5116_s2  }
  0xf9   : > { %p6121_p7 = scmp.ne.s32.totalorder %s6098_s1, 0 }
  0xfa   : > { %s5494_s14 = sand.u32 (!%p6121_p7), 1, %s5087_s28   ;;  %p6122_p0 = scmp.ne.s32.totalorder (!%p6121_p7), %s6116_s9, 0 }
  0xfb   : > { %783 = sbr.rel (%p6121_p7) target bundleno = 4295 (0x10c7), region = 108  ;;  %s3746_s15 = sshll.u32 (!%p6121_p7), %s5494_s14, 5 }
  0xfc   : > { %s786_s24 = scalar_lea.sflag (!%p6121_p7), [#allocation3], %s5494_s14  ;;  %s5498_s7 = scalar_lea.vmem (!%p6121_p7), [#allocation2], %s3746_s15 }
 0x100   : > { %5042 = dma.done.wait (%p6122_p0), %s786_s24, 512  }
 0x101   : > { %5044 = vsyncadd (%p6122_p0), %s786_s24, 4294966784  ;;  %p6123_p6 = scmp.eq.s32.totalorder %s5266_s23, 0 }
 0x103   : > { %5046 = dma.done.wait (%p6123_p6), [#allocation6], 32   ;;  %p6124_p8 = pmov %p6123_p6 }
 0x104   : > { %p6125_p9 = pmov %p6123_p6 }
 0x105   : > { %5048 = vsyncadd (%p6124_p8), [#allocation6], 4294967264 }
 0x106   : > { %5050 = dma.done.wait (%p6125_p9), [#allocation9], 32   ;;  %p6126_p12 = pmov %p6123_p6 }
 0x107   : > { %p6127_p1 = pmov %p6123_p6 }
 0x108   : > { %5052 = vsyncadd (%p6126_p12), [#allocation9], 4294967264 }
 0x109   : > { %5054 = dma.done.wait (%p6127_p1), [#allocation12], 32   ;;  %p6128_p3 = pmov %p6127_p1 }
 0x10a   : > { %p6129_p4 = pmov %p6127_p1 }
 0x10b   : > { %5056 = vsyncadd (%p6128_p3), [#allocation12], 4294967264 }
 0x10c   : > { %5058 = dma.done.wait (%p6129_p4), [#allocation15], 32   ;;  %p6130_p13 = pmov %p6127_p1 }
 0x10d   : > { %p6131_p2 = pmov %p6127_p1 }
 0x10e   : > { %5060 = vsyncadd (%p6130_p13), [#allocation15], 4294967264 }
 0x10f   : > { %5062 = dma.done.wait (%p6131_p2), [#allocation18], 272   ;;  %p6132_p5 = pmov %p6127_p1 }
 0x110   : > { %p6133_p10 = pmov %p6127_p1 }
 0x111   : > { %5064 = vsyncadd (%p6132_p5), [#allocation18], 4294967024 }
 0x112   : > { %5066 = dma.done.wait (%p6133_p10), [#allocation21], 272   ;;  %p6134_p11 = pmov %p6127_p1 }
 0x113   : > { %p6135_p7 = pmov %p6127_p1 }
 0x114   : > { %5068 = vsyncadd (%p6134_p11), [#allocation21], 4294967024 }
 0x115   : > { %5070 = dma.done.wait (%p6135_p7), [#allocation24], 272   ;;  %p6136_p0 = pmov %p6127_p1 }
 0x117   : > { %5072 = vsyncadd (%p6136_p0), [#allocation24], 4294967024  ;;  %p6137_p6 = pmov %p6136_p0 }
 0x118   : > { %p6138_p8 = pmov %p6136_p0 }
 0x119   : > { %5074 = dma.done.wait (%p6137_p6), [#allocation27], 256  }
 0x11a   : > { %5076 = vsyncadd (%p6138_p8), [#allocation27], 4294967040  ;;  %s3763_s11 = sshll.u32 %s5266_s23, 1  ;;  %vm936_vm0 = vcmask 261120   ;;  %s6139_s27 = sld [smem:[#allocation39_spill]]  ;;  %v4485_v14 = vld [vmem:[%s6058_s8 + $0x8] sm:$0xff]  }
 0x11b   : > { %p916_p9 = scmp.lt.s32.totalorder %s3763_s11, 3  ;;  %v5117_v15 = vmov 0.0   ;;  %vm5118_vm1 = vmmov 0   ;;  %v4486_v16 = vld [vmem:[%s6058_s8] sm:$0xff]   ;;  %v3767_v35 = vld [vmem:[#allocation14] ss:$0 sm:$0xff] }
 0x11c   : > { %3930 = vmatprep.subr.bf16.mxu1 %v5117_v15  ;;  %3934 = vmatprep.mubr.msk.bf16.mxu1 %vm5118_vm1, %v5117_v15  ;;  %v3765_v25 = vld [vmem:[#allocation5] ss:$0 sm:$0xff]  ;;  %v3766_v29 = vld [vmem:[#allocation7] ss:$0 sm:$0xff]  ;;  %s5119_s2 = smov 112   ;;  %s5120_s15 = smov 120  }
 0x11d   : > { %s6151_s11 = smov (!%p916_p9, %s3763_s11), 3  ;;  %3931 = vmatpush3.bf16.msra.mxu1 %v4485_v14  ;;  %3944 = vmatprep.subr.bf16.mxu0 %v5117_v15  ;;  %s5121_s24 = smov 104   ;;  %vm1081_vm2 = vcmask 64512   ;;  %vm1556_vm3 = vcmask 1043456   ;;  %vm1978_vm5 = vcmask 130048   ;;  %vm1981_vm6 = vcmask 195584  }
 0x11e   : > { %s3764_s12 = sshll.u32 %s6151_s11, 3  ;;  %3932 = vmatprep.subr.bf16.mxu1 %v5117_v15  ;;  %3946 = vmatprep.mubr.msk.bf16.mxu0 %vm5118_vm1, %v5117_v15  ;;  %s5122_s11 = smov 96   ;;  %vm3432_vm7 = vcmask 523264  }
 0x11f   : > { %s5127_s25 = smov 24   ;;  %s6140_s6 = sld [smem:[#allocation53_spill]] }
 0x120   : > { %s919_s26 = scalar_lea.vmem %s6139_s27, %s3764_s12  ;;  %s5123_s12 = smov 64  }
 0x121   : > { %v5540_v0 = vld [vmem:[%s919_s26] sm:$0xff]  ;;  %v5542_v1 = vld [vmem:[%s919_s26 + $0x8] sm:$0xff]  ;;  %3933 = vmatpush3.bf16.msra.mxu1 %v4486_v16  ;;  %s5125_s27 = smov 8   ;;  %s5126_s26 = smov 16  }
 0x122   : > { %v937_v2 = vsel %vm936_vm0, %v5540_v0, 0.0  ;;  %v940_v3 = vsel %vm936_vm0, %v5542_v1, 0.0  ;;  %3938 = vmatprep.subr.bf16.mxu1 %v5117_v15  ;;  %s3762_s13 = sshll.u32 %s5494_s14, 4  ;;  %s6142_s1 = sld [smem:[#allocation55_spill]] }
 0x123   : > { %938 = vadd.xlane.f32.xlu0 %v937_v2  ;;  %p6143_p1 = scmp.ne.s32.totalorder %s6117_s5, 0 }
 0x127   : > { %941 = vadd.xlane.f32.xlu0 %v940_v3 }
 0x1ac   : > { %v939_v4 = vpop.xlane.xlu0 %938 }
 0x1ad   : > { %v944_v5 = vmul.f32 0.03125, %v939_v4 }
 0x1af   : > { %v946_v6 = vsub.f32 %v5540_v0, %v944_v5 }
 0x1b0   : > { %v942_v7 = vpop.xlane.xlu0 %941 }
 0x1b1   : > { %v945_v8 = vmul.f32 0.03125, %v942_v7  ;;  %v948_v9 = vmul.f32 %v946_v6, %v946_v6 }
 0x1b3   : > { %v947_v10 = vsub.f32 %v5542_v1, %v945_v8  ;;  %v950_v11 = vsel %vm936_vm0, %v948_v9, 0.0 }
 0x1b4   : > { %951 = vadd.xlane.f32.xlu1 %v950_v11 }
 0x1b5   : > { %v949_v12 = vmul.f32 %v947_v10, %v947_v10 }
 0x1b7   : > { %v953_v13 = vsel %vm936_vm0, %v949_v12, 0.0 }
 0x1b8   : > { %954 = vadd.xlane.f32.xlu1 %v953_v13 }
 0x23d   : > { %v952_v17 = vpop.xlane.xlu1 %951 }
 0x23e   : > { %v956_v18 = vmul.f32 0.03125, %v952_v17 }
 0x240   : > { %v959_v19 = vadd.f32 1e-12, %v956_v18  ;;  %v930_v18 = vlaneseq }
 0x241   : > { %v955_v20 = vpop.xlane.xlu1 %954 }
 0x242   : > { %4501 = vrsqrt.f32 %v959_v19  ;;  %v957_v21 = vmul.f32 0.03125, %v955_v20  ;;  %v931_v19 = vshrl.u32 %v930_v18, 7  ;;  %v933_v20 = vand.u32 127, %v930_v18 }
 0x244   : > { %v960_v22 = vadd.f32 1e-12, %v957_v21  ;;  %vm934_vm4 = vcmp.le.s32.totalorder %v933_v20, %v931_v19  ;;  %v5124_v21 = vmov -1e+30  }
 0x246   : > { %4503 = vrsqrt.f32 %v960_v22  ;;  %v5644_v22 = vsel %vm934_vm4, 0.0, %v5124_v21 }
 0x24f   : > { %v4502_v23 = vpop.eup %4501 }
 0x250   : > { %v963_v24 = vmul.f32 %v4502_v23, %v946_v6 }
 0x252   : > { %v971_v28 = vmul.f32 %v3765_v25, %v963_v24 }
 0x253   : > { %v4504_v26 = vpop.eup %4503 }
 0x254   : > { %v964_v27 = vmul.f32 %v4504_v26, %v947_v10  ;;  %v980_v31 = vadd.f32 %v3766_v29, %v971_v28 }
 0x256   : > { %v972_v30 = vmul.f32 %v3765_v25, %v964_v27 }
 0x258   : > { %v981_v32 = vadd.f32 %v3766_v29, %v972_v30 }
 0x25a   : > { %v982_v33 = vpack.c.bf16 %v981_v32, %v980_v31 }
 0x25c   : > { %3935 = vmatmul.mubr.msk.bf16.vlgmr.msra.gmra.mxu1 %vm936_vm0, %v982_v33 }
 0x25d   : > { %3940 = vmatprep.mubr.msk.bf16.mxu1 %vm5118_vm1, %v5117_v15 }
 0x31c   : > { %v1043_v34 = vpop.f32.mrf.mxu1 }
 0x31d   : > { %v1044_v38 = vadd.f32 %v3767_v35, %v1043_v34 }
 0x31e   : > { %v3936_v36 = vpop.f32.mrf.mxu1 }
 0x31f   : > { %v1070_v43 = vpack.c.bf16 %v1044_v38, %v1044_v38 }
 0x320   : > { %v1046_v37 = vpop.f32.mrf.mxu1 }
 0x321   : > { %v1047_v39 = vadd.f32 %v3767_v35, %v1046_v37 }
 0x322   : > { %v3937_v40 = vpop.f32.mrf.mxu1 }
 0x323   : > { %v4400_v41 = vpack.i.bf16 %v1047_v39, %v1044_v38  ;;  %v1071_v42 = vpack.c.bf16 %v1047_v39, %v1047_v39 }
 0x325   : > { %4401 = vrot.lane.b32.xlu1 %v4400_v41, %s5119_s2  ;;  %4396 = vrot.lane.b32.xlu0 %v4400_v41, %s5120_s15 }
 0x329   : > { %4406 = vrot.lane.b32.xlu1 %v4400_v41, %s5121_s24  ;;  %1129 = vrot.lane.b32.xlu0 %v1071_v42, %s5122_s11 }
 0x32d   : > { %1079 = vrot.lane.b32.xlu1 %v1070_v43, %s5122_s11 }
 0x397   : > { %v4402_v44 = vpop.permute.xlu1 %4401  ;;  %v4397_v45 = vpop.permute.xlu0 %4396 }
 0x398   : > { %v4399_v46 = vunpack.i.h.bf16 %v4397_v45  ;;  %v4398_v47 = vunpack.i.l.bf16 %v4397_v45  ;;  %v4404_v48 = vunpack.i.h.bf16 %v4402_v44  ;;  %v4403_v49 = vunpack.i.l.bf16 %v4402_v44 }
 0x39a   : > { %v1073_v50 = vpack.c.bf16 %v4399_v46, %v4399_v46  ;;  %v1072_v51 = vpack.c.bf16 %v4398_v47, %v4398_v47  ;;  %v5577_v55 = vpack.c.bf16 %v4404_v48, %v4404_v48  ;;  %v5579_v56 = vpack.c.bf16 %v4403_v49, %v4403_v49 }
 0x39b   : > { %v4407_v52 = vpop.permute.xlu1 %4406  ;;  %v1130_v53 = vpop.permute.xlu0 %1129 }
 0x39c   : > { %1178 = vrot.lane.b32.xlu1 %v1072_v51, %s5122_s11  ;;  %1227 = vrot.lane.b32.xlu0 %v1073_v50, %s5122_s11  ;;  %v1135_v54 = vsel %vm1081_vm2, %v1130_v53, 0  ;;  %v4409_v57 = vunpack.i.h.bf16 %v4407_v52  ;;  %v4408_v58 = vunpack.i.l.bf16 %v4407_v52 }
 0x39d   : > { %3945 = vmatpush3.bf16.xpose.msra.mxu0 %v1135_v54 }
 0x39e   : > { %3956 = vmatprep.subr.bf16.mxu0 %v5117_v15  ;;  %v5587_v61 = vpack.c.bf16 %v4409_v57, %v4409_v57  ;;  %v5589_v62 = vpack.c.bf16 %v4408_v58, %v4408_v58 }
 0x39f   : > { %v1080_v59 = vpop.permute.xlu1 %1079 }
 0x3a0   : > { %v1086_v60 = vsel %vm1081_vm2, %v1080_v59, 0  ;;  %1276 = vrot.lane.b32.xlu1 %v5579_v56, %s5122_s11  ;;  %1325 = vrot.lane.b32.xlu0 %v5577_v55, %s5122_s11 }
 0x3a1   : > { %3939 = vmatpush3.bf16.xpose.msra.mxu1 %v1086_v60 }
 0x3a2   : > { %3950 = vmatprep.subr.bf16.mxu1 %v5117_v15 }
 0x3a4   : > { %1374 = vrot.lane.b32.xlu1 %v5589_v62, %s5122_s11  ;;  %1423 = vrot.lane.b32.xlu0 %v5587_v61, %s5122_s11 }
 0x3a5   : > { %3947 = vmatmul.mubr.msk.bf16.vlgmr.msra.gmra.mxu0 %vm1081_vm2, %v1071_v42 }
 0x3a6   : > { %3958 = vmatprep.mubr.msk.bf16.mxu0 %vm5118_vm1, %v5117_v15 }
 0x3a8   : > { %3941 = vmatmul.mubr.msk.bf16.vlgmr.msra.gmra.mxu1 %vm1081_vm2, %v1070_v43  ;;  %1551 = vrot.lane.b32.xlu1 %v1070_v43, %s5123_s12 }
 0x3a9   : > { %1600 = vrot.lane.b32.xlu0 %v1071_v42, %s5123_s12  ;;  %3952 = vmatprep.mubr.msk.bf16.mxu1 %vm5118_vm1, %v5117_v15 }
 0x3ac   : > { %1648 = vrot.lane.b32.xlu1 %v1072_v51, %s5123_s12 }
 0x3b0   : > { %1696 = vrot.lane.b32.xlu1 %v1073_v50, %s5123_s12 }
 0x40e   : > { %v1179_v63 = vpop.permute.xlu1 %1178  ;;  %v1228_v2 = vpop.permute.xlu0 %1227 }
 0x40f   : > { %v1184_v3 = vsel %vm1081_vm2, %v1179_v63, 0  ;;  %v1233_v4 = vsel %vm1081_vm2, %v1228_v2, 0 }
 0x410   : > { %3951 = vmatpush3.bf16.xpose.msra.mxu1 %v1184_v3  ;;  %3957 = vmatpush3.bf16.xpose.msra.mxu0 %v1233_v4 }
 0x411   : > { %3962 = vmatprep.subr.bf16.mxu1 %v5117_v15  ;;  %3968 = vmatprep.subr.bf16.mxu0 %v5117_v15 }
 0x412   : > { %v1277_v5 = vpop.permute.xlu1 %1276  ;;  %v1326_v6 = vpop.permute.xlu0 %1325 }
 0x413   : > { %v1282_v7 = vsel %vm1081_vm2, %v1277_v5, 0  ;;  %v1331_v8 = vsel %vm1081_vm2, %v1326_v6, 0 }
 0x416   : > { %v1375_v9 = vpop.permute.xlu1 %1374  ;;  %v1424_v10 = vpop.permute.xlu0 %1423 }
 0x417   : > { %3953 = vmatmul.mubr.msk.bf16.vlgmr.msra.gmra.mxu1 %vm1081_vm2, %v1072_v51  ;;  %3959 = vmatmul.mubr.msk.bf16.vlgmr.msra.gmra.mxu0 %vm1081_vm2, %v1073_v50  ;;  %v1380_v11 = vsel %vm1081_vm2, %v1375_v9, 0  ;;  %v1429_v12 = vsel %vm1081_vm2, %v1424_v10, 0 }
 0x418   : > { %3963 = vmatpush3.bf16.xpose.msra.mxu1 %v1282_v7  ;;  %3969 = vmatpush3.bf16.xpose.msra.mxu0 %v1331_v8 }
 0x419   : > { %3964 = vmatprep.mubr.msk.bf16.mxu1 %vm5118_vm1, %v5117_v15  ;;  %3970 = vmatprep.mubr.msk.bf16.mxu0 %vm5118_vm1, %v5117_v15 }
 0x41a   : > { %3974 = vmatprep.subr.bf16.mxu1 %v5117_v15  ;;  %3980 = vmatprep.subr.bf16.mxu0 %v5117_v15  ;;  %v1552_v13 = vpop.permute.xlu1 %1551 }
 0x41b   : > { %v1601_v14 = vpop.permute.xlu0 %1600  ;;  %v1558_v16 = vsel %vm1556_vm3, %v1552_v13, 0 }
 0x41c   : > { %v1606_v17 = vsel %vm1556_vm3, %v1601_v14, 0 }
 0x41e   : > { %v1649_v5 = vpop.permute.xlu1 %1648 }
 0x41f   : > { %3965 = vmatmul.mubr.msk.bf16.vlgmr.msra.gmra.mxu1 %vm1081_vm2, %v5579_v56  ;;  %3971 = vmatmul.mubr.msk.bf16.vlgmr.msra.gmra.mxu0 %vm1081_vm2, %v5577_v55 }
 0x420   : > { %3975 = vmatpush3.bf16.xpose.msra.mxu1 %v1380_v11  ;;  %3981 = vmatpush3.bf16.xpose.msra.mxu0 %v1429_v12 }
 0x421   : > { %3976 = vmatprep.mubr.msk.bf16.mxu1 %vm5118_vm1, %v5117_v15  ;;  %3982 = vmatprep.mubr.msk.bf16.mxu0 %vm5118_vm1, %v5117_v15 }
 0x422   : > { %3986 = vmatprep.subr.bf16.mxu1 %v5117_v15  ;;  %3992 = vmatprep.subr.bf16.mxu0 %v5117_v15  ;;  %v1697_v11 = vpop.permute.xlu1 %1696 }
 0x427   : > { %3977 = vmatmul.mubr.msk.bf16.vlgmr.msra.gmra.mxu1 %vm1081_vm2, %v5589_v62  ;;  %3983 = vmatmul.mubr.msk.bf16.vlgmr.msra.gmra.mxu0 %vm1081_vm2, %v5587_v61 }
 0x428   : > { %3987 = vmatpush3.bf16.msra.mxu1 %v1558_v16  ;;  %3993 = vmatpush3.bf16.msra.mxu0 %v1606_v17 }
 0x429   : > { %3994 = vmatprep.mubr.msk.bf16.mxu0 %vm5118_vm1, %v5117_v15  ;;  %4004 = vmatprep.subr.bf16.mxu0 %v5117_v15 }
 0x42a   : > { %3988 = vmatprep.mubr.msk.bf16.mxu1 %vm5118_vm1, %v5117_v15  ;;  %3998 = vmatprep.subr.bf16.mxu1 %v5117_v15 }
 0x465   : > { %v1171_v23 = vpop.f32.mrf.mxu0 }
 0x466   : > { %v1172_v24 = vadd.f32 %v1171_v23, %v5644_v22  ;;  %v1702_v23 = vsel %vm1556_vm3, %v1697_v11, 0 }
 0x467   : > { %v3948_v25 = vpop.f32.mrf.mxu0 }
 0x468   : > { %v1474_v26 = vsel %vm1081_vm2, %v1172_v24, -inf  ;;  %v1122_v27 = vpop.f32.mrf.mxu1 }
 0x469   : > { %1475 = vmax.xlane.f32.xlu0 %v1474_v26  ;;  %v1123_v28 = vadd.f32 %v1122_v27, %v5644_v22  ;;  %v1174_v29 = vpop.f32.mrf.mxu0 }
 0x46a   : > { %v3942_v30 = vpop.f32.mrf.mxu1 }
 0x46b   : > { %v3949_v31 = vpop.f32.mrf.mxu0  ;;  %v1471_v32 = vsel %vm1081_vm2, %v1123_v28, -inf }
 0x46c   : > { %1472 = vmax.xlane.f32.xlu1 %v1471_v32  ;;  %v1125_v33 = vpop.f32.mrf.mxu1 }
 0x46e   : > { %v3943_v34 = vpop.f32.mrf.mxu1 }
 0x47d   : > { %1744 = vrot.lane.b32.xlu1 %v5579_v56, %s5123_s12 }
 0x4d7   : > { %v1220_v35 = vpop.f32.mrf.mxu1  ;;  %v1269_v36 = vpop.f32.mrf.mxu0 }
 0x4d8   : > { %v5653_v37 = vadd.f32 %v1220_v35, %v5644_v22  ;;  %v5656_v40 = vadd.f32 %v1269_v36, %v5644_v22 }
 0x4d9   : > { %v3954_v38 = vpop.f32.mrf.mxu1  ;;  %v3960_v39 = vpop.f32.mrf.mxu0 }
 0x4da   : > { %v1477_v41 = vsel %vm1081_vm2, %v5653_v37, -inf  ;;  %v1480_v46 = vsel %vm1081_vm2, %v5656_v40, -inf }
 0x4db   : > { %v1272_v42 = vpop.f32.mrf.mxu0  ;;  %1478 = vmax.xlane.f32.xlu0 %v1477_v41  ;;  %v1223_v43 = vpop.f32.mrf.mxu1 }
 0x4dd   : > { %v3955_v44 = vpop.f32.mrf.mxu1  ;;  %v3961_v45 = vpop.f32.mrf.mxu0 }
 0x4df   : > { %v1367_v47 = vpop.f32.mrf.mxu0  ;;  %1481 = vmax.xlane.f32.xlu0 %v1480_v46  ;;  %v1318_v48 = vpop.f32.mrf.mxu1 }
 0x4e0   : > { %v5663_v49 = vadd.f32 %v1367_v47, %v5644_v22  ;;  %v5666_v50 = vadd.f32 %v1318_v48, %v5644_v22 }
 0x4e1   : > { %v3966_v51 = vpop.f32.mrf.mxu1  ;;  %v3972_v52 = vpop.f32.mrf.mxu0 }
 0x4e2   : > { %v1486_v53 = vsel %vm1081_vm2, %v5663_v49, -inf  ;;  %v1483_v54 = vsel %vm1081_vm2, %v5666_v50, -inf }
 0x4e3   : > { %v1370_v56 = vpop.f32.mrf.mxu0  ;;  %1487 = vmax.xlane.f32.xlu0 %v1486_v53  ;;  %1484 = vmax.xlane.f32.xlu1 %v1483_v54  ;;  %v1321_v57 = vpop.f32.mrf.mxu1 }
 0x4e5   : > { %v3967_v58 = vpop.f32.mrf.mxu1  ;;  %v3973_v59 = vpop.f32.mrf.mxu0 }
 0x4e7   : > { %v1416_v60 = vpop.f32.mrf.mxu1  ;;  %v1465_v63 = vpop.f32.mrf.mxu0 }
 0x4e8   : > { %v1417_v2 = vadd.f32 %v1416_v60, %v5644_v22 }
 0x4e9   : > { %v3978_v3 = vpop.f32.mrf.mxu1  ;;  %v3984_v4 = vpop.f32.mrf.mxu0 }
 0x4ea   : > { %v1489_v6 = vsel %vm1081_vm2, %v1417_v2, -inf }
 0x4eb   : > { %v1468_v7 = vpop.f32.mrf.mxu0  ;;  %1490 = vmax.xlane.f32.xlu1 %v1489_v6  ;;  %v1419_v8 = vpop.f32.mrf.mxu1 }
 0x4ed   : > { %v3979_v9 = vpop.f32.mrf.mxu1  ;;  %v3985_v10 = vpop.f32.mrf.mxu0 }
 0x4f2   : > { %v1476_v12 = vpop.xlane.xlu0 %1475 }
 0x4f3   : > { %v1496_v13 = vsub.f32 %v1172_v24, %v1476_v12 }
 0x4f5   : > { %v1505_v14 = vmul.f32 1.442695, %v1496_v13  ;;  %v1473_v16 = vpop.xlane.xlu1 %1472 }
 0x4f6   : > { %v1495_v17 = vsub.f32 %v1123_v28, %v1473_v16 }
 0x4f7   : > { %4505 = vpow2.f32 %v1505_v14 }
 0x4f8   : > { %v1503_v18 = vmul.f32 1.442695, %v1495_v17 }
 0x4f9   : > { %1792 = vrot.lane.b32.xlu0 %v5577_v55, %s5123_s12  ;;  %v1654_v55 = vsel %vm1556_vm3, %v1649_v5, 0  ;;  %v1745_v29 = vpop.permute.xlu1 %1744 }
 0x4fa   : > { %4507 = vpow2.f32 %v1503_v18 }
 0x4fc   : > { %1840 = vrot.lane.b32.xlu1 %v5589_v62, %s5123_s12  ;;  %v5697_v62 = vadd.f32 %v1465_v63, %v5644_v22 }
 0x4fe   : > { %v1492_v25 = vsel %vm1081_vm2, %v5697_v62, -inf }
 0x504   : > { %v5678_v19 = vpop.eup %4505 }
 0x505   : > { %v1544_v20 = vpack.c.bf16 %v5678_v19, %v5678_v19  ;;  %v1522_v10 = vsel %vm1081_vm2, %v5678_v19, 0.0 }
 0x507   : > { %v5682_v21 = vpop.eup %4507  ;;  %3995 = vmatmul.mubr.msk.bf16.vlgmr.msra.gmra.mxu0 %vm1081_vm2, %v1544_v20 }
 0x508   : > { %4005 = vmatpush3.bf16.msra.mxu0 %v1702_v23  ;;  %v1543_v24 = vpack.c.bf16 %v5682_v21, %v5682_v21  ;;  %4006 = vmatprep.mubr.msk.bf16.mxu0 %vm5118_vm1, %v5117_v15  ;;  %v1519_v63 = vsel %vm1081_vm2, %v5682_v21, 0.0 }
 0x509   : > { %4016 = vmatprep.subr.bf16.mxu0 %v5117_v15 }
 0x50a   : > { %3989 = vmatmul.mubr.msk.bf16.vlgmr.msra.gmra.mxu1 %vm1081_vm2, %v1543_v24 }
 0x50b   : > { %3999 = vmatpush3.bf16.msra.mxu1 %v1654_v55  ;;  %4000 = vmatprep.mubr.msk.bf16.mxu1 %vm5118_vm1, %v5117_v15 }
 0x50c   : > { %4010 = vmatprep.subr.bf16.mxu1 %v5117_v15 }
 0x518   : > { %1493 = vmax.xlane.f32.xlu0 %v1492_v25 }
 0x52e   : > { %1888 = vrot.lane.b32.xlu0 %v5587_v61, %s5123_s12 }
 0x564   : > { %v1479_v26 = vpop.xlane.xlu0 %1478 }
 0x565   : > { %v1497_v27 = vsub.f32 %v5653_v37, %v1479_v26 }
 0x567   : > { %v1507_v28 = vmul.f32 1.442695, %v1497_v27 }
 0x568   : > { %v1482_v30 = vpop.xlane.xlu0 %1481 }
 0x569   : > { %4509 = vpow2.f32 %v1507_v28  ;;  %v1498_v31 = vsub.f32 %v5656_v40, %v1482_v30  ;;  %v1750_v40 = vsel %vm1556_vm3, %v1745_v29, 0 }
 0x56b   : > { %v1509_v32 = vmul.f32 1.442695, %v1498_v31 }
 0x56c   : > { %v1488_v33 = vpop.xlane.xlu0 %1487  ;;  %v1485_v22 = vpop.xlane.xlu1 %1484 }
 0x56d   : > { %4511 = vpow2.f32 %v1509_v32  ;;  %v1500_v34 = vsub.f32 %v5663_v49, %v1488_v33  ;;  %v1499_v35 = vsub.f32 %v5666_v50, %v1485_v22  ;;  %v4487_v33 = vld [vmem:[%s6060_s10 + $0x8] sm:$0xff]  }
 0x56f   : > { %v1513_v36 = vmul.f32 1.442695, %v1500_v34  ;;  %v1511_v38 = vmul.f32 1.442695, %v1499_v35 }
 0x570   : > { %v1793_v45 = vpop.permute.xlu0 %1792 }
 0x571   : > { %4513 = vpow2.f32 %v1511_v38  ;;  %v1798_v48 = vsel %vm1556_vm3, %v1793_v45, 0 }
 0x572   : > { %4515 = vpow2.f32 %v1513_v36 }
 0x574   : > { %v1491_v61 = vpop.xlane.xlu1 %1490 }
 0x575   : > { %v1501_v37 = vsub.f32 %v1417_v2, %v1491_v61 }
 0x576   : > { %v4510_v39 = vpop.eup %4509 }
 0x577   : > { %v1515_v41 = vmul.f32 1.442695, %v1501_v37  ;;  %v1525_v42 = vsel %vm1081_vm2, %v4510_v39, 0.0  ;;  %v1545_v43 = vpack.c.bf16 %v4510_v39, %v4510_v39 }
 0x578   : > { %1526 = vadd.xlane.f32.xlu1 %v1525_v42  ;;  %v1841_v50 = vpop.permute.xlu1 %1840 }
 0x579   : > { %4517 = vpow2.f32 %v1515_v41  ;;  %4001 = vmatmul.mubr.msk.bf16.vlgmr.msra.gmra.mxu1 %vm1081_vm2, %v1545_v43  ;;  %v1846_v54 = vsel %vm1556_vm3, %v1841_v50, 0 }
 0x57a   : > { %v4512_v44 = vpop.eup %4511  ;;  %4011 = vmatpush3.bf16.msra.mxu1 %v1750_v40  ;;  %4012 = vmatprep.mubr.msk.bf16.mxu1 %vm5118_vm1, %v5117_v15 }
 0x57b   : > { %v1528_v46 = vsel %vm1081_vm2, %v4512_v44, 0.0  ;;  %v1546_v47 = vpack.c.bf16 %v4512_v44, %v4512_v44  ;;  %4022 = vmatprep.subr.bf16.mxu1 %v5117_v15 }
 0x57c   : > { %1529 = vadd.xlane.f32.xlu0 %v1528_v46 }
 0x57d   : > { %4007 = vmatmul.mubr.msk.bf16.vlgmr.msra.gmra.mxu0 %vm1081_vm2, %v1546_v47 }
 0x57e   : > { %4017 = vmatpush3.bf16.msra.mxu0 %v1798_v48  ;;  %4018 = vmatprep.mubr.msk.bf16.mxu0 %vm5118_vm1, %v5117_v15  ;;  %v4514_v49 = vpop.eup %4513 }
 0x57f   : > { %4028 = vmatprep.subr.bf16.mxu0 %v5117_v15  ;;  %v4516_v51 = vpop.eup %4515  ;;  %v1531_v52 = vsel %vm1081_vm2, %v4514_v49, 0.0  ;;  %v1547_v53 = vpack.c.bf16 %v4514_v49, %v4514_v49 }
 0x580   : > { %1532 = vadd.xlane.f32.xlu0 %v1531_v52  ;;  %v1548_v56 = vpack.c.bf16 %v4516_v51, %v4516_v51  ;;  %v1534_v57 = vsel %vm1081_vm2, %v4516_v51, 0.0 }
 0x581   : > { %4013 = vmatmul.mubr.msk.bf16.vlgmr.msra.gmra.mxu1 %vm1081_vm2, %v1547_v53 }
 0x582   : > { %4023 = vmatpush3.bf16.msra.mxu1 %v1846_v54  ;;  %4024 = vmatprep.mubr.msk.bf16.mxu1 %vm5118_vm1, %v5117_v15  ;;  %v4488_v54 = vld [vmem:[%s6060_s10] sm:$0xff]  }
 0x583   : > { %4034 = vmatprep.subr.bf16.mxu1 %v5117_v15 }
 0x584   : > { %1535 = vadd.xlane.f32.xlu0 %v1534_v57 }
 0x585   : > { %4019 = vmatmul.mubr.msk.bf16.vlgmr.msra.gmra.mxu0 %vm1081_vm2, %v1548_v56 }
 0x586   : > { %v4518_v58 = vpop.eup %4517  ;;  %4030 = vmatprep.mubr.msk.bf16.mxu0 %vm5118_vm1, %v5117_v15 }
 0x587   : > { %v1537_v59 = vsel %vm1081_vm2, %v4518_v58, 0.0  ;;  %v1549_v60 = vpack.c.bf16 %v4518_v58, %v4518_v58 }
 0x588   : > { %1538 = vadd.xlane.f32.xlu1 %v1537_v59 }
 0x589   : > { %4025 = vmatmul.mubr.msk.bf16.vlgmr.msra.gmra.mxu1 %vm1081_vm2, %v1549_v60 }
 0x58a   : > { %4038 = vmatprep.mubr.msk.bf16.mxu1 %vm5118_vm1, %v5117_v15  ;;  %4035 = vmatpush3.bf16.msra.mxu1 %v4487_v33 }
 0x58b   : > { %4036 = vmatprep.subr.bf16.mxu1 %v5117_v15 }
 0x58c   : > { %1520 = vadd.xlane.f32.xlu1 %v1519_v63 }
 0x58e   : > { %4037 = vmatpush3.bf16.msra.mxu1 %v4488_v54 }
 0x5a1   : > { %v1494_v2 = vpop.xlane.xlu0 %1493 }
 0x5a2   : > { %v1502_v3 = vsub.f32 %v5697_v62, %v1494_v2 }
 0x5a4   : > { %v1517_v4 = vmul.f32 1.442695, %v1502_v3 }
 0x5a5   : > { %v1889_v5 = vpop.permute.xlu0 %1888 }
 0x5a6   : > { %4519 = vpow2.f32 %v1517_v4  ;;  %v1894_v6 = vsel %vm1556_vm3, %v1889_v5, 0 }
 0x5a7   : > { %4029 = vmatpush3.bf16.msra.mxu0 %v1894_v6 }
 0x5a8   : > { %4042 = vmatprep.subr.bf16.mxu0 %v5117_v15 }
 0x5b3   : > { %v4520_v7 = vpop.eup %4519 }
 0x5b4   : > { %v1540_v8 = vsel %vm1081_vm2, %v4520_v7, 0.0  ;;  %v1550_v9 = vpack.c.bf16 %v4520_v7, %v4520_v7 }
 0x5b5   : > { %1541 = vadd.xlane.f32.xlu0 %v1540_v8 }
 0x5b6   : > { %4031 = vmatmul.mubr.msk.bf16.vlgmr.msra.gmra.mxu0 %vm1081_vm2, %v1550_v9 }
 0x5b7   : > { %4046 = vmatprep.mubr.msk.bf16.mxu0 %vm5118_vm1, %v5117_v15 }
 0x5b9   : > { %1523 = vadd.xlane.f32.xlu0 %v1522_v10 }
 0x5c7   : > { %v5744_v11 = vpop.f32.mrf.mxu0 }
 0x5c9   : > { %v3996_v12 = vpop.f32.mrf.mxu0 }
 0x5ca   : > { %v5746_v13 = vpop.f32.mrf.mxu1 }
 0x5cb   : > { %v1645_v14 = vpop.f32.mrf.mxu0 }
 0x5cc   : > { %v3990_v16 = vpop.f32.mrf.mxu1 }
 0x5cd   : > { %v3997_v17 = vpop.f32.mrf.mxu0 }
 0x5ce   : > { %v1597_v18 = vpop.f32.mrf.mxu1 }
 0x5d0   : > { %v3991_v20 = vpop.f32.mrf.mxu1 }
 0x601   : > { %v1527_v23 = vpop.xlane.xlu1 %1526 }
 0x602   : > { %4521 = vrcp.f32 %v1527_v23 }
 0x605   : > { %v1530_v21 = vpop.xlane.xlu0 %1529 }
 0x606   : > { %4523 = vrcp.f32 %v1530_v21 }
 0x609   : > { %v1533_v24 = vpop.xlane.xlu0 %1532 }
 0x60a   : > { %4525 = vrcp.f32 %v1533_v24 }
 0x60d   : > { %v1536_v55 = vpop.xlane.xlu0 %1535 }
 0x60e   : > { %4527 = vrcp.f32 %v1536_v55 }
 0x60f   : > { %v4522_v25 = vpop.eup %4521 }
 0x611   : > { %v1539_v52 = vpop.xlane.xlu1 %1538 }
 0x612   : > { %4529 = vrcp.f32 %v1539_v52  ;;  %v4491_v52 = vld [vmem:[#allocation17 + $0x8] sm:$0xff]  }
 0x613   : > { %v4524_v26 = vpop.eup %4523  ;;  %4043 = vmatpush3.bf16.msra.mxu0 %v4491_v52 }
 0x614   : > { %4044 = vmatprep.subr.bf16.mxu0 %v5117_v15 }
 0x615   : > { %v1521_v5 = vpop.xlane.xlu1 %1520 }
 0x617   : > { %v4526_v38 = vpop.eup %4525 }
 0x61b   : > { %v4528_v37 = vpop.eup %4527 }
 0x61f   : > { %v4530_v56 = vpop.eup %4529 }
 0x639   : > { %v1690_v19 = vpop.f32.mrf.mxu1 }
 0x63a   : > { %v1946_v29 = vmul.f32 %v4522_v25, %v1690_v19 }
 0x63b   : > { %v4002_v62 = vpop.f32.mrf.mxu1 }
 0x63d   : > { %v1693_v27 = vpop.f32.mrf.mxu1  ;;  %v1738_v28 = vpop.f32.mrf.mxu0 }
 0x63e   : > { %v1947_v30 = vmul.f32 %v4524_v26, %v1738_v28  ;;  %v1542_v53 = vpop.xlane.xlu0 %1541 }
 0x63f   : > { %v4003_v31 = vpop.f32.mrf.mxu1  ;;  %v4008_v32 = vpop.f32.mrf.mxu0  ;;  %4531 = vrcp.f32 %v1542_v53  ;;  %v4492_v53 = vld [vmem:[#allocation17] sm:$0xff]  }
 0x640   : > { %v4410_v22 = vpack.i.bf16 %v1947_v30, %v1946_v29  ;;  %4533 = vrcp.f32 %v1521_v5  ;;  %4045 = vmatpush3.bf16.msra.mxu0 %v4492_v53 }
 0x641   : > { %v1741_v34 = vpop.f32.mrf.mxu0  ;;  %v1786_v35 = vpop.f32.mrf.mxu1  ;;  %4058 = vmatprep.subr.bf16.mxu0 %v5117_v15 }
 0x642   : > { %4411 = vrot.lane.b32.xlu1 %v4410_v22, %s5125_s27  ;;  %v1948_v41 = vmul.f32 %v4526_v38, %v1786_v35  ;;  %v1524_v6 = vpop.xlane.xlu0 %1523  ;;  %v4489_v38 = vld [vmem:[#allocation20 + $0x8] sm:$0xff]  }
 0x643   : > { %v4009_v36 = vpop.f32.mrf.mxu0  ;;  %v4014_v61 = vpop.f32.mrf.mxu1  ;;  %4535 = vrcp.f32 %v1524_v6  ;;  %4050 = vmatprep.subr.bf16.mxu1 %v4489_v38 }
 0x645   : > { %v1834_v39 = vpop.f32.mrf.mxu0  ;;  %v1789_v42 = vpop.f32.mrf.mxu1 }
 0x646   : > { %v1949_v43 = vmul.f32 %v4528_v37, %v1834_v39 }
 0x647   : > { %v4020_v40 = vpop.f32.mrf.mxu0  ;;  %v4015_v45 = vpop.f32.mrf.mxu1 }
 0x648   : > { %v4415_v44 = vpack.i.bf16 %v1949_v43, %v1948_v41  ;;  %v4490_v45 = vld [vmem:[#allocation20] sm:$0xff]  }
 0x649   : > { %v1837_v46 = vpop.f32.mrf.mxu0  ;;  %v1882_v47 = vpop.f32.mrf.mxu1 }
 0x64a   : > { %4416 = vrot.lane.b32.xlu0 %v4415_v44, %s5126_s26  ;;  %v1950_v59 = vmul.f32 %v4530_v56, %v1882_v47  ;;  %v926_v46 = vld [vmem:[%s5498_s7] sm:$0xff]  ;;  %v927_v47 = vld [vmem:[%s5498_s7 + $0x8] sm:$0xff] }
 0x64b   : > { %v4021_v48 = vpop.f32.mrf.mxu0  ;;  %v4026_v49 = vpop.f32.mrf.mxu1 }
 0x64c   : > { %v4532_v57 = vpop.eup %4531  ;;  %v2166_v48 = vpack.c.bf16 %v927_v47, %v926_v46  ;;  %v928_v49 = vld [vmem:[%s5498_s7 + $0x10] sm:$0xff] }
 0x64d   : > { %v1885_v50 = vpop.f32.mrf.mxu1  ;;  %v4534_v8 = vpop.eup %4533 }
 0x64e   : > { %v1944_v18 = vmul.f32 %v4534_v8, %v5746_v13  ;;  %v929_v50 = vld [vmem:[%s5498_s7 + $0x18] sm:$0xff]  ;;  %s6141_s7 = sld [smem:[#allocation54_spill]] }
 0x64f   : > { %v4027_v51 = vpop.f32.mrf.mxu1 }
 0x650   : > { %v4536_v10 = vpop.eup %4535  ;;  %v2167_v51 = vpack.c.bf16 %v929_v50, %v928_v49 }
 0x651   : > { %v1945_v20 = vmul.f32 %v4536_v10, %v5744_v11  ;;  %v3787_v11 = vld [vmem:[#allocation16] ss:$0 sm:$0xff] }
 0x676   : > { %v1930_v58 = vpop.f32.mrf.mxu0 }
 0x677   : > { %v1951_v60 = vmul.f32 %v4532_v57, %v1930_v58 }
 0x678   : > { %v4032_v63 = vpop.f32.mrf.mxu0 }
 0x679   : > { %v4420_v2 = vpack.i.bf16 %v1951_v60, %v1950_v59 }
 0x67a   : > { %v1933_v3 = vpop.f32.mrf.mxu0 }
 0x67b   : > { %4421 = vrot.lane.b32.xlu1 %v4420_v2, %s5127_s25  ;;  %v3791_v3 = vld [vmem:[#allocation8] ss:$0 sm:$0xff] }
 0x67c   : > { %v4033_v4 = vpop.f32.mrf.mxu0 }
 0x6b4   : > { %v4412_v7 = vpop.permute.xlu1 %4411 }
 0x6b5   : > { %v4414_v12 = vunpack.i.h.bf16 %v4412_v7  ;;  %v4413_v14 = vunpack.i.l.bf16 %v4412_v7  ;;  %v3792_v7 = vld [vmem:[#allocation10] ss:$0 sm:$0xff] }
 0x6b7   : > { %v1977_v23 = vsel %vm1081_vm2, %v1945_v20, %v4414_v12  ;;  %v1976_v24 = vsel %vm1081_vm2, %v1944_v18, %v4413_v14 }
 0x6bc   : > { %v4417_v9 = vpop.permute.xlu0 %4416 }
 0x6bd   : > { %v4419_v16 = vunpack.i.h.bf16 %v4417_v9  ;;  %v4418_v17 = vunpack.i.l.bf16 %v4417_v9 }
 0x6bf   : > { %v1980_v62 = vsel %vm1978_vm5, %v1977_v23, %v4419_v16  ;;  %v1979_v25 = vsel %vm1978_vm5, %v1976_v24, %v4418_v17  ;;  %v3797_v16 = vld [vmem:[#allocation22] ss:$0 sm:$0xff] }
 0x6ed   : > { %v4422_v21 = vpop.permute.xlu1 %4421 }
 0x6ee   : > { %v4424_v55 = vunpack.i.h.bf16 %v4422_v21  ;;  %v4423_v19 = vunpack.i.l.bf16 %v4422_v21 }
 0x6f0   : > { %v1983_v26 = vsel %vm1981_vm6, %v1980_v62, %v4424_v55  ;;  %v1982_v27 = vsel %vm1981_vm6, %v1979_v25, %v4423_v19 }
 0x6f1   : > { %v1984_v13 = vpack.c.bf16 %v1983_v26, %v1982_v27 }
 0x6f3   : > { %4039 = vmatmul.mubr.msk.bf16.vlgmr.msra.gmra.mxu1 %vm936_vm0, %v1984_v13 }
 0x6f4   : > { %4051 = vmatpush3.bf16.msra.mxu1 %v4489_v38  ;;  %4054 = vmatprep.mubr.msk.bf16.mxu1 %vm936_vm0, %v2166_v48 }
 0x6f5   : > { %4052 = vmatprep.subr.bf16.mxu1 %v4490_v45 }
 0x6f8   : > { %4053 = vmatpush3.bf16.msra.mxu1 %v4490_v45 }
 0x6f9   : > { %4064 = vmatprep.subr.bf16.mxu1 %v5117_v15 }
 0x6fb   : > { %4055 = vmatmul.mubr.msk.bf16.vlgmr.msra.gmra.mxu1 %vm936_vm0, %v2167_v51 }
 0x6fc   : > { %4066 = vmatprep.mubr.msk.bf16.mxu1 %vm5118_vm1, %v5117_v15 }
 0x7b3   : > { %v2045_v28 = vpop.f32.mrf.mxu1 }
 0x7b4   : > { %v2046_v29 = vadd.f32 %v3787_v11, %v2045_v28 }
 0x7b5   : > { %v4040_v30 = vpop.f32.mrf.mxu1 }
 0x7b6   : > { %v5768_v31 = vadd.f32 %v2046_v29, %v5540_v0  ;;  %v3793_v30 = vld [vmem:[#allocation19] ss:$0 sm:$0xff] }
 0x7b7   : > { %v2048_v32 = vpop.f32.mrf.mxu1 }
 0x7b8   : > { %v2049_v33 = vadd.f32 %v3787_v11, %v2048_v32  ;;  %v2054_v22 = vsel %vm936_vm0, %v5768_v31, 0.0 }
 0x7b9   : > { %2055 = vadd.xlane.f32.xlu1 %v2054_v22  ;;  %v4041_v34 = vpop.f32.mrf.mxu1 }
 0x7ba   : > { %v5773_v35 = vadd.f32 %v2049_v33, %v5542_v1 }
 0x7bb   : > { %v4056_v14 = vpop.f32.mrf.mxu1 }
 0x7bc   : > { %v2057_v36 = vsel %vm936_vm0, %v5773_v35, 0.0  ;;  %v2240_v18 = vadd.f32 %v4056_v14, %v3797_v16 }
 0x7bd   : > { %2058 = vadd.xlane.f32.xlu0 %v2057_v36  ;;  %v2231_v17 = vpop.f32.mrf.mxu1 }
 0x7be   : > { %v2232_v21 = vadd.f32 %v3797_v16, %v2231_v17 }
 0x7bf   : > { %v4057_v20 = vpop.f32.mrf.mxu1 }
 0x7c0   : > { %v2243_v23 = vadd.f32 %v4057_v20, %v3797_v16 }
 0x7c1   : > { %v2234_v24 = vpop.f32.mrf.mxu1 }
 0x7c2   : > { %v2235_v55 = vadd.f32 %v3797_v16, %v2234_v24  ;;  %v4430_v19 = vpack.i.bf16 %v2243_v23, %v2240_v18  ;;  %v2315_v62 = vpack.c.bf16 %v2243_v23, %v2240_v18 }
 0x7c4   : > { %v4425_v25 = vpack.i.bf16 %v2235_v55, %v2232_v21  ;;  %v2314_v26 = vpack.c.bf16 %v2235_v55, %v2232_v21  ;;  %v2372_v27 = vsel %vm1081_vm2, %v2315_v62, 0 }
 0x7c5   : > { %4065 = vmatpush3.bf16.xpose.msra.mxu1 %v2372_v27 }
 0x7c6   : > { %v2326_v13 = vsel %vm1081_vm2, %v2314_v26, 0  ;;  %4076 = vmatprep.subr.bf16.mxu1 %v5117_v15 }
 0x842   : > { %v2056_v0 = vpop.xlane.xlu1 %2055 }
 0x843   : > { %v2060_v61 = vmul.f32 0.03125, %v2056_v0 }
 0x845   : > { %v2062_v37 = vsub.f32 %v5768_v31, %v2060_v61 }
 0x846   : > { %v2059_v39 = vpop.xlane.xlu0 %2058 }
 0x847   : > { %v2061_v41 = vmul.f32 0.03125, %v2059_v39  ;;  %v2064_v42 = vmul.f32 %v2062_v37, %v2062_v37 }
 0x849   : > { %v2063_v1 = vsub.f32 %v5773_v35, %v2061_v41  ;;  %v2066_v43 = vsel %vm936_vm0, %v2064_v42, 0.0 }
 0x84a   : > { %2067 = vadd.xlane.f32.xlu0 %v2066_v43 }
 0x84b   : > { %v2065_v40 = vmul.f32 %v2063_v1, %v2063_v1 }
 0x84d   : > { %v2069_v44 = vsel %vm936_vm0, %v2065_v40, 0.0 }
 0x84e   : > { %2070 = vadd.xlane.f32.xlu1 %v2069_v44 }
 0x85f   : > { %4431 = vrot.lane.b32.xlu1 %v4430_v19, %s5120_s15 }
 0x860   : > { %4426 = vrot.lane.b32.xlu0 %v4425_v25, %s5120_s15 }
 0x863   : > { %4436 = vrot.lane.b32.xlu1 %v4425_v25, %s5119_s2 }
 0x864   : > { %4441 = vrot.lane.b32.xlu0 %v4430_v19, %s5119_s2 }
 0x868   : > { %4446 = vrot.lane.b32.xlu0 %v4425_v25, %s5121_s24 }
 0x8d3   : > { %v2068_v54 = vpop.xlane.xlu0 %2067 }
 0x8d4   : > { %v2072_v56 = vmul.f32 0.03125, %v2068_v54 }
 0x8d6   : > { %v2075_v57 = vadd.f32 1e-12, %v2072_v56 }
 0x8d7   : > { %v2071_v58 = vpop.xlane.xlu1 %2070  ;;  %v4427_v11 = vpop.permute.xlu0 %4426 }
 0x8d8   : > { %4537 = vrsqrt.f32 %v2075_v57  ;;  %v2073_v59 = vmul.f32 0.03125, %v2071_v58  ;;  %v4429_v28 = vunpack.i.h.bf16 %v4427_v11  ;;  %v4428_v29 = vunpack.i.l.bf16 %v4427_v11 }
 0x8da   : > { %v2076_v60 = vadd.f32 1e-12, %v2073_v59  ;;  %v2316_v38 = vpack.c.bf16 %v4429_v28, %v4428_v29 }
 0x8db   : > { %v4432_v32 = vpop.permute.xlu1 %4431  ;;  %v4442_v46 = vpop.permute.xlu0 %4441 }
 0x8dc   : > { %4539 = vrsqrt.f32 %v2076_v60  ;;  %v4434_v33 = vunpack.i.h.bf16 %v4432_v32  ;;  %v4433_v22 = vunpack.i.l.bf16 %v4432_v32  ;;  %v2418_v39 = vsel %vm1081_vm2, %v2316_v38, 0 }
 0x8dd   : > { %v4444_v47 = vunpack.i.h.bf16 %v4442_v46  ;;  %v4443_v48 = vunpack.i.l.bf16 %v4442_v46 }
 0x8df   : > { %v4437_v45 = vpop.permute.xlu1 %4436  ;;  %v5822_v52 = vpack.c.bf16 %v4444_v47, %v4443_v48  ;;  %v4447_v57 = vpop.permute.xlu0 %4446 }
 0x8e0   : > { %v4439_v49 = vunpack.i.h.bf16 %v4437_v45  ;;  %v4438_v50 = vunpack.i.l.bf16 %v4437_v45 }
 0x8e2   : > { %v5824_v53 = vpack.c.bf16 %v4439_v49, %v4438_v50 }
 0x8e5   : > { %v4538_v63 = vpop.eup %4537 }
 0x8e6   : > { %v2079_v2 = vmul.f32 %v4538_v63, %v2062_v37  ;;  %v2317_v37 = vpack.c.bf16 %v4434_v33, %v4433_v22  ;;  %v4449_v63 = vunpack.i.h.bf16 %v4447_v57 }
 0x8e8   : > { %v2087_v6 = vmul.f32 %v3791_v3, %v2079_v2  ;;  %v2464_v44 = vsel %vm1081_vm2, %v2317_v37, 0  ;;  %v4448_v2 = vunpack.i.l.bf16 %v4447_v57 }
 0x8e9   : > { %v4540_v4 = vpop.eup %4539 }
 0x8ea   : > { %v2080_v5 = vmul.f32 %v4540_v4, %v2063_v1  ;;  %v2096_v9 = vadd.f32 %v3792_v7, %v2087_v6  ;;  %v2556_v4 = vsel %vm1081_vm2, %v5822_v52, 0 }
 0x8ec   : > { %v2088_v8 = vmul.f32 %v3791_v3, %v2080_v5  ;;  %v2510_v3 = vsel %vm1081_vm2, %v5824_v53, 0 }
 0x8ee   : > { %v2097_v10 = vadd.f32 %v3792_v7, %v2088_v8  ;;  %v5838_v8 = vpack.c.bf16 %v4449_v63, %v4448_v2 }
 0x8f0   : > { %v2098_v12 = vpack.c.bf16 %v2097_v10, %v2096_v9  ;;  %v2602_v18 = vsel %vm1081_vm2, %v5838_v8, 0 }
 0x8f2   : > { %4047 = vmatmul.mubr.msk.bf16.vlgmr.msra.gmra.mxu0 %vm936_vm0, %v2098_v12 }
 0x8f3   : > { %4060 = vmatprep.mubr.msk.bf16.mxu0 %vm5118_vm1, %v5117_v15  ;;  %4059 = vmatpush3.bf16.xpose.msra.mxu0 %v2326_v13 }
 0x8f4   : > { %4070 = vmatprep.subr.bf16.mxu0 %v5117_v15 }
 0x9b2   : > { %v2159_v34 = vpop.f32.mrf.mxu0 }
 0x9b3   : > { %v2160_v36 = vadd.f32 %v3793_v30, %v2159_v34 }
 0x9b4   : > { %v4048_v0 = vpop.f32.mrf.mxu0 }
 0x9b5   : > { %v2266_v61 = vpack.c.bf16 %v2160_v36, %v2160_v36 }
 0x9b6   : > { %v2162_v41 = vpop.f32.mrf.mxu0 }
 0x9b7   : > { %v2163_v42 = vadd.f32 %v3793_v30, %v2162_v41  ;;  %4061 = vmatmul.mubr.msk.bf16.vlgmr.msra.gmra.mxu0 %vm1081_vm2, %v2266_v61 }
 0x9b8   : > { %v4049_v1 = vpop.f32.mrf.mxu0  ;;  %4071 = vmatpush3.bf16.xpose.msra.mxu0 %v2418_v39  ;;  %4072 = vmatprep.mubr.msk.bf16.mxu0 %vm5118_vm1, %v5117_v15 }
 0x9b9   : > { %v2267_v43 = vpack.c.bf16 %v2163_v42, %v2163_v42  ;;  %v4450_v40 = vpack.i.bf16 %v2163_v42, %v2160_v36  ;;  %4082 = vmatprep.subr.bf16.mxu0 %v5117_v15 }
 0x9bb   : > { %4067 = vmatmul.mubr.msk.bf16.vlgmr.msra.gmra.mxu1 %vm1081_vm2, %v2267_v43  ;;  %4451 = vrot.lane.b32.xlu1 %v4450_v40, %s5120_s15  ;;  %s914_s15 = scalar_lea.vmem [#allocation28], %s3762_s13 }
 0x9bc   : > { %4466 = vrot.lane.b32.xlu0 %v4450_v40, %s5121_s24  ;;  %4077 = vmatpush3.bf16.xpose.msra.mxu1 %v2464_v44 }
 0x9bd   : > { %4078 = vmatprep.mubr.msk.bf16.mxu1 %vm5118_vm1, %v5117_v15  ;;  %4088 = vmatprep.subr.bf16.mxu1 %v5117_v15 }
 0x9bf   : > { %4456 = vrot.lane.b32.xlu1 %v4450_v40, %s5119_s2  ;;  %s3841_s2 = sshll.u32 %s5266_s23, 8  ;;  %s3482_s23 = scalar_lea.sflag [#allocation4], %s5494_s14 }
 0x9c0   : > { %2818 = vrot.lane.b32.xlu0 %v2315_v62, %s5122_s11  ;;  %s6002_s9 = scalar_lea.hbm %s6142_s1, %s3841_s2 }
 0x9c3   : > { %4461 = vrot.lane.b32.xlu1 %v4430_v19, %s5121_s24  ;;  %s3495_s24 = sshll.u32 %s914_s15, 4  ;;  %s6005_s24 = int_to_ptr.vmem [resolvable:$true] %s3495_s24 }
 0x9c7   : > { %2771 = vrot.lane.b32.xlu1 %v2314_v26, %s5122_s11 }
 0x9cb   : > { %2865 = vrot.lane.b32.xlu1 %v2316_v38, %s5122_s11 }
 0x9cf   : > { %2912 = vrot.lane.b32.xlu1 %v2317_v37, %s5122_s11 }
 0xa2d   : > { %v4452_v51 = vpop.permute.xlu1 %4451 }
 0xa2e   : > { %v4454_v54 = vunpack.i.h.bf16 %v4452_v51  ;;  %v4453_v56 = vunpack.i.l.bf16 %v4452_v51  ;;  %v4467_v17 = vpop.permute.xlu0 %4466 }
 0xa2f   : > { %v4469_v21 = vunpack.i.h.bf16 %v4467_v17  ;;  %v4468_v23 = vunpack.i.l.bf16 %v4467_v17 }
 0xa30   : > { %v2269_v58 = vpack.c.bf16 %v4454_v54, %v4454_v54  ;;  %v2268_v59 = vpack.c.bf16 %v4453_v56, %v4453_v56 }
 0xa31   : > { %v4457_v60 = vpop.permute.xlu1 %4456  ;;  %v2273_v24 = vpack.c.bf16 %v4469_v21, %v4469_v21  ;;  %v2272_v55 = vpack.c.bf16 %v4468_v23, %v4468_v23 }
 0xa32   : > { %4073 = vmatmul.mubr.msk.bf16.vlgmr.msra.gmra.mxu0 %vm1081_vm2, %v2268_v59  ;;  %4079 = vmatmul.mubr.msk.bf16.vlgmr.msra.gmra.mxu1 %vm1081_vm2, %v2269_v58  ;;  %v4459_v5 = vunpack.i.h.bf16 %v4457_v60  ;;  %v4458_v6 = vunpack.i.l.bf16 %v4457_v60  ;;  %v2819_v19 = vpop.permute.xlu0 %2818 }
 0xa33   : > { %4083 = vmatpush3.bf16.xpose.msra.mxu0 %v2510_v3  ;;  %4089 = vmatpush3.bf16.xpose.msra.mxu1 %v2556_v4 }
 0xa34   : > { %4090 = vmatprep.mubr.msk.bf16.mxu1 %vm5118_vm1, %v5117_v15  ;;  %4084 = vmatprep.mubr.msk.bf16.mxu0 %vm5118_vm1, %v5117_v15  ;;  %v2271_v12 = vpack.c.bf16 %v4459_v5, %v4459_v5  ;;  %v2270_v14 = vpack.c.bf16 %v4458_v6, %v4458_v6 }
 0xa35   : > { %v4462_v7 = vpop.permute.xlu1 %4461  ;;  %4094 = vmatprep.subr.bf16.mxu0 %v5117_v15  ;;  %4100 = vmatprep.subr.bf16.mxu1 %v5117_v15 }
 0xa36   : > { %v4464_v9 = vunpack.i.h.bf16 %v4462_v7  ;;  %v4463_v10 = vunpack.i.l.bf16 %v4462_v7 }
 0xa38   : > { %v5840_v16 = vpack.c.bf16 %v4464_v9, %v4463_v10 }
 0xa39   : > { %v2772_v62 = vpop.permute.xlu1 %2771 }
 0xa3a   : > { %4085 = vmatmul.mubr.msk.bf16.vlgmr.msra.gmra.mxu0 %vm1081_vm2, %v2270_v14  ;;  %4091 = vmatmul.mubr.msk.bf16.vlgmr.msra.gmra.mxu1 %vm1081_vm2, %v2271_v12  ;;  %v2648_v20 = vsel %vm1081_vm2, %v5840_v16, 0 }
 0xa3b   : > { %4095 = vmatpush3.bf16.xpose.msra.mxu0 %v2602_v18  ;;  %4101 = vmatpush3.bf16.xpose.msra.mxu1 %v2648_v20 }
 0xa3c   : > { %4096 = vmatprep.mubr.msk.bf16.mxu0 %vm5118_vm1, %v5117_v15  ;;  %4102 = vmatprep.mubr.msk.bf16.mxu1 %vm5118_vm1, %v5117_v15 }
 0xa3d   : > { %4106 = vmatprep.subr.bf16.mxu0 %v5117_v15  ;;  %4112 = vmatprep.subr.bf16.mxu1 %v5117_v15  ;;  %v2866_v39 = vpop.permute.xlu1 %2865 }
 0xa41   : > { %v2913_v48 = vpop.permute.xlu1 %2912 }
 0xa42   : > { %4097 = vmatmul.mubr.msk.bf16.vlgmr.msra.gmra.mxu0 %vm1081_vm2, %v2272_v55  ;;  %4103 = vmatmul.mubr.msk.bf16.vlgmr.msra.gmra.mxu1 %vm1081_vm2, %v2273_v24 }
 0xa43   : > { %4107 = vmatpush3.bf16.msra.mxu0 %v2772_v62  ;;  %4113 = vmatpush3.bf16.msra.mxu1 %v2819_v19 }
 0xa44   : > { %4108 = vmatprep.mubr.msk.bf16.mxu0 %vm5118_vm1, %v5117_v15  ;;  %4118 = vmatprep.subr.bf16.mxu0 %v5117_v15 }
 0xa45   : > { %4114 = vmatprep.mubr.msk.bf16.mxu1 %vm5118_vm1, %v5117_v15  ;;  %4124 = vmatprep.subr.bf16.mxu1 %v5117_v15 }
 0xa77   : > { %v2362_v25 = vpop.f32.mrf.mxu0 }
 0xa78   : > { %v2690_v26 = vsel %vm1978_vm5, %v2362_v25, -inf }
 0xa79   : > { %2691 = vmax.xlane.f32.xlu1 %v2690_v26  ;;  %v4062_v27 = vpop.f32.mrf.mxu0 }
 0xa7b   : > { %v2365_v13 = vpop.f32.mrf.mxu0  ;;  %v2408_v11 = vpop.f32.mrf.mxu1 }
 0xa7c   : > { %v2693_v28 = vsel %vm1978_vm5, %v2408_v11, -inf }
 0xa7d   : > { %v4068_v29 = vpop.f32.mrf.mxu1  ;;  %2694 = vmax.xlane.f32.xlu0 %v2693_v28  ;;  %v4063_v30 = vpop.f32.mrf.mxu0 }
 0xa7f   : > { %v2411_v32 = vpop.f32.mrf.mxu1 }
 0xa81   : > { %v4069_v33 = vpop.f32.mrf.mxu1 }
 0xa8a   : > { %2959 = vrot.lane.b32.xlu1 %v5824_v53, %s5122_s11 }
 0xaf2   : > { %v5866_v22 = vpop.f32.mrf.mxu0  ;;  %v5868_v34 = vpop.f32.mrf.mxu1 }
 0xaf3   : > { %v2696_v36 = vsel %vm1978_vm5, %v5866_v22, -inf  ;;  %v2699_v41 = vsel %vm1978_vm5, %v5868_v34, -inf }
 0xaf4   : > { %v4080_v38 = vpop.f32.mrf.mxu1  ;;  %2697 = vmax.xlane.f32.xlu0 %v2696_v36  ;;  %v4074_v0 = vpop.f32.mrf.mxu0 }
 0xaf6   : > { %v2457_v61 = vpop.f32.mrf.mxu0  ;;  %v2503_v37 = vpop.f32.mrf.mxu1 }
 0xaf8   : > { %v4081_v42 = vpop.f32.mrf.mxu1  ;;  %2700 = vmax.xlane.f32.xlu0 %v2699_v41  ;;  %v4075_v1 = vpop.f32.mrf.mxu0 }
 0xafa   : > { %v2546_v43 = vpop.f32.mrf.mxu0  ;;  %v2592_v40 = vpop.f32.mrf.mxu1 }
 0xafb   : > { %v2705_v44 = vsel %vm1978_vm5, %v2592_v40, -inf  ;;  %v2702_v45 = vsel %vm1978_vm5, %v2546_v43, -inf }
 0xafc   : > { %v4092_v46 = vpop.f32.mrf.mxu1  ;;  %2706 = vmax.xlane.f32.xlu0 %v2705_v44  ;;  %2703 = vmax.xlane.f32.xlu1 %v2702_v45  ;;  %v4086_v47 = vpop.f32.mrf.mxu0 }
 0xafe   : > { %v2549_v49 = vpop.f32.mrf.mxu0  ;;  %v2595_v50 = vpop.f32.mrf.mxu1 }
 0xb00   : > { %v4087_v51 = vpop.f32.mrf.mxu0  ;;  %v4093_v53 = vpop.f32.mrf.mxu1 }
 0xb02   : > { %v5876_v54 = vpop.f32.mrf.mxu1  ;;  %v2692_v56 = vpop.xlane.xlu1 %2691 }
 0xb03   : > { %v2714_v57 = vsub.f32 %v2362_v25, %v2692_v56  ;;  %v2638_v58 = vpop.f32.mrf.mxu0 }
 0xb04   : > { %v4104_v59 = vpop.f32.mrf.mxu1  ;;  %v2708_v60 = vsel %vm1978_vm5, %v2638_v58, -inf }
 0xb05   : > { %v2722_v63 = vmul.f32 1.442695, %v2714_v57  ;;  %2709 = vmax.xlane.f32.xlu1 %v2708_v60  ;;  %v4098_v2 = vpop.f32.mrf.mxu0 }
 0xb06   : > { %v2695_v3 = vpop.xlane.xlu0 %2694  ;;  %v2687_v4 = vpop.f32.mrf.mxu1 }
 0xb07   : > { %4541 = vpow2.f32 %v2722_v63  ;;  %v2715_v5 = vsub.f32 %v2408_v11, %v2695_v3  ;;  %v2641_v6 = vpop.f32.mrf.mxu0  ;;  %v2960_v23 = vpop.permute.xlu1 %2959 }
 0xb08   : > { %v4105_v7 = vpop.f32.mrf.mxu1 }
 0xb09   : > { %v2724_v9 = vmul.f32 1.442695, %v2715_v5  ;;  %v4099_v10 = vpop.f32.mrf.mxu0 }
 0xb0b   : > { %4543 = vpow2.f32 %v2724_v9 }
 0xb12   : > { %3006 = vrot.lane.b32.xlu0 %v5822_v52, %s5122_s11  ;;  %v2711_v52 = vsel %vm1978_vm5, %v5876_v54, -inf }
 0xb14   : > { %v5881_v12 = vpop.eup %4541 }
 0xb15   : > { %v2762_v14 = vpack.c.bf16 %v5881_v12, %v5881_v12  ;;  %v2738_v45 = vsel %vm1978_vm5, %v5881_v12, 0.0 }
 0xb16   : > { %3053 = vrot.lane.b32.xlu1 %v5838_v8, %s5122_s11 }
 0xb17   : > { %4109 = vmatmul.mubr.msk.bf16.vlgmr.msra.gmra.mxu0 %vm1978_vm5, %v2762_v14 }
 0xb18   : > { %v5888_v17 = vpop.eup %4543  ;;  %4119 = vmatpush3.bf16.msra.mxu0 %v2866_v39  ;;  %4120 = vmatprep.mubr.msk.bf16.mxu0 %vm5118_vm1, %v5117_v15 }
 0xb19   : > { %v2763_v18 = vpack.c.bf16 %v5888_v17, %v5888_v17  ;;  %4130 = vmatprep.subr.bf16.mxu0 %v5117_v15  ;;  %v2741_v56 = vsel %vm1978_vm5, %v5888_v17, 0.0 }
 0xb1b   : > { %4115 = vmatmul.mubr.msk.bf16.vlgmr.msra.gmra.mxu1 %vm1978_vm5, %v2763_v18 }
 0xb1c   : > { %4125 = vmatpush3.bf16.msra.mxu1 %v2913_v48  ;;  %4126 = vmatprep.mubr.msk.bf16.mxu1 %vm5118_vm1, %v5117_v15 }
 0xb1d   : > { %4136 = vmatprep.subr.bf16.mxu1 %v5117_v15 }
 0xb31   : > { %2712 = vmax.xlane.f32.xlu0 %v2711_v52 }
 0xb47   : > { %3100 = vrot.lane.b32.xlu0 %v5840_v16, %s5122_s11 }
 0xb7d   : > { %v2698_v8 = vpop.xlane.xlu0 %2697 }
 0xb7e   : > { %v2716_v20 = vsub.f32 %v5866_v22, %v2698_v8 }
 0xb80   : > { %v2726_v21 = vmul.f32 1.442695, %v2716_v20 }
 0xb81   : > { %v2701_v24 = vpop.xlane.xlu0 %2700 }
 0xb82   : > { %4545 = vpow2.f32 %v2726_v21  ;;  %v2717_v55 = vsub.f32 %v5868_v34, %v2701_v24 }
 0xb84   : > { %v2728_v19 = vmul.f32 1.442695, %v2717_v55 }
 0xb85   : > { %v2707_v62 = vpop.xlane.xlu0 %2706  ;;  %v2704_v25 = vpop.xlane.xlu1 %2703 }
 0xb86   : > { %4547 = vpow2.f32 %v2728_v19  ;;  %v2719_v26 = vsub.f32 %v2592_v40, %v2707_v62  ;;  %v2718_v27 = vsub.f32 %v2546_v43, %v2704_v25 }
 0xb88   : > { %v2732_v13 = vmul.f32 1.442695, %v2719_v26  ;;  %v2730_v11 = vmul.f32 1.442695, %v2718_v27 }
 0xb89   : > { %v3007_v38 = vpop.permute.xlu0 %3006 }
 0xb8a   : > { %4549 = vpow2.f32 %v2730_v11 }
 0xb8b   : > { %4551 = vpow2.f32 %v2732_v13 }
 0xb8e   : > { %v2710_v16 = vpop.xlane.xlu1 %2709 }
 0xb8f   : > { %v4546_v28 = vpop.eup %4545  ;;  %v2720_v29 = vsub.f32 %v2638_v58, %v2710_v16 }
 0xb90   : > { %v2744_v30 = vsel %vm1978_vm5, %v4546_v28, 0.0  ;;  %v2764_v32 = vpack.c.bf16 %v4546_v28, %v4546_v28 }
 0xb91   : > { %v2734_v33 = vmul.f32 1.442695, %v2720_v29  ;;  %2745 = vadd.xlane.f32.xlu1 %v2744_v30 }
 0xb92   : > { %4121 = vmatmul.mubr.msk.bf16.vlgmr.msra.gmra.mxu0 %vm1978_vm5, %v2764_v32  ;;  %v3054_v41 = vpop.permute.xlu1 %3053 }
 0xb93   : > { %v4548_v22 = vpop.eup %4547  ;;  %4553 = vpow2.f32 %v2734_v33  ;;  %4131 = vmatpush3.bf16.msra.mxu0 %v2960_v23  ;;  %4132 = vmatprep.mubr.msk.bf16.mxu0 %vm5118_vm1, %v5117_v15  ;;  %v4493_v23 = vld [vmem:[#allocation23 + $0x8] sm:$0xff]  }
 0xb94   : > { %v2747_v34 = vsel %vm1978_vm5, %v4548_v22, 0.0  ;;  %v2765_v36 = vpack.c.bf16 %v4548_v22, %v4548_v22  ;;  %4142 = vmatprep.subr.bf16.mxu0 %v5117_v15 }
 0xb95   : > { %2748 = vadd.xlane.f32.xlu0 %v2747_v34 }
 0xb96   : > { %4127 = vmatmul.mubr.msk.bf16.vlgmr.msra.gmra.mxu1 %vm1978_vm5, %v2765_v36 }
 0xb97   : > { %4137 = vmatpush3.bf16.msra.mxu1 %v3007_v38  ;;  %4138 = vmatprep.mubr.msk.bf16.mxu1 %vm5118_vm1, %v5117_v15  ;;  %v4550_v0 = vpop.eup %4549 }
 0xb98   : > { %4148 = vmatprep.subr.bf16.mxu1 %v5117_v15  ;;  %v4552_v61 = vpop.eup %4551  ;;  %v2750_v37 = vsel %vm1978_vm5, %v4550_v0, 0.0  ;;  %v2766_v39 = vpack.c.bf16 %v4550_v0, %v4550_v0 }
 0xb99   : > { %2751 = vadd.xlane.f32.xlu0 %v2750_v37  ;;  %v2767_v42 = vpack.c.bf16 %v4552_v61, %v4552_v61  ;;  %v2753_v1 = vsel %vm1978_vm5, %v4552_v61, 0.0 }
 0xb9a   : > { %4133 = vmatmul.mubr.msk.bf16.vlgmr.msra.gmra.mxu0 %vm1978_vm5, %v2766_v39  ;;  %v4494_v39 = vld [vmem:[#allocation23] sm:$0xff]  }
 0xb9b   : > { %4143 = vmatpush3.bf16.msra.mxu0 %v3054_v41  ;;  %4144 = vmatprep.mubr.msk.bf16.mxu0 %vm5118_vm1, %v5117_v15 }
 0xb9c   : > { %4154 = vmatprep.subr.bf16.mxu0 %v5117_v15 }
 0xb9d   : > { %2754 = vadd.xlane.f32.xlu0 %v2753_v1 }
 0xb9e   : > { %4139 = vmatmul.mubr.msk.bf16.vlgmr.msra.gmra.mxu1 %vm1978_vm5, %v2767_v42 }
 0xb9f   : > { %4150 = vmatprep.mubr.msk.bf16.mxu1 %vm5118_vm1, %v5117_v15 }
 0xba0   : > { %v4554_v43 = vpop.eup %4553 }
 0xba1   : > { %v2756_v40 = vsel %vm1978_vm5, %v4554_v43, 0.0  ;;  %v2768_v44 = vpack.c.bf16 %v4554_v43, %v4554_v43 }
 0xba2   : > { %2757 = vadd.xlane.f32.xlu1 %v2756_v40 }
 0xba3   : > { %4145 = vmatmul.mubr.msk.bf16.vlgmr.msra.gmra.mxu0 %vm1978_vm5, %v2768_v44 }
 0xba4   : > { %4158 = vmatprep.mubr.msk.bf16.mxu0 %vm5118_vm1, %v5117_v15  ;;  %4155 = vmatpush3.bf16.msra.mxu0 %v4493_v23 }
 0xba5   : > { %4156 = vmatprep.subr.bf16.mxu0 %v5117_v15 }
 0xba6   : > { %2739 = vadd.xlane.f32.xlu1 %v2738_v45 }
 0xba8   : > { %4157 = vmatpush3.bf16.msra.mxu0 %v4494_v39  ;;  %v3822_v39 = vld [vmem:[#allocation11] ss:$0 sm:$0xff] }
 0xba9   : > { %4170 = vmatprep.subr.bf16.mxu0 %v5117_v15 }
 0xbba   : > { %v2713_v46 = vpop.xlane.xlu0 %2712 }
 0xbbb   : > { %v2721_v47 = vsub.f32 %v5876_v54, %v2713_v46 }
 0xbbd   : > { %v2736_v48 = vmul.f32 1.442695, %v2721_v47 }
 0xbbe   : > { %v3101_v49 = vpop.permute.xlu0 %3100 }
 0xbbf   : > { %4555 = vpow2.f32 %v2736_v48  ;;  %4149 = vmatpush3.bf16.msra.mxu1 %v3101_v49 }
 0xbc0   : > { %4162 = vmatprep.subr.bf16.mxu1 %v5117_v15 }
 0xbcc   : > { %v4556_v50 = vpop.eup %4555 }
 0xbcd   : > { %v2759_v51 = vsel %vm1978_vm5, %v4556_v50, 0.0  ;;  %v2769_v53 = vpack.c.bf16 %v4556_v50, %v4556_v50 }
 0xbce   : > { %2760 = vadd.xlane.f32.xlu0 %v2759_v51 }
 0xbcf   : > { %4151 = vmatmul.mubr.msk.bf16.vlgmr.msra.gmra.mxu1 %vm1978_vm5, %v2769_v53 }
 0xbd0   : > { %4166 = vmatprep.mubr.msk.bf16.mxu1 %vm5118_vm1, %v5117_v15 }
 0xbd2   : > { %2742 = vadd.xlane.f32.xlu0 %v2741_v56 }
 0xbd7   : > { %v5938_v54 = vpop.f32.mrf.mxu0 }
 0xbd9   : > { %v4110_v57 = vpop.f32.mrf.mxu0 }
 0xbdb   : > { %v2814_v58 = vpop.f32.mrf.mxu0  ;;  %v5940_v59 = vpop.f32.mrf.mxu1 }
 0xbdd   : > { %v4111_v60 = vpop.f32.mrf.mxu0  ;;  %v4116_v63 = vpop.f32.mrf.mxu1 }
 0xbdf   : > { %v2861_v2 = vpop.f32.mrf.mxu1 }
 0xbe1   : > { %v4117_v3 = vpop.f32.mrf.mxu1 }
 0xc1a   : > { %v2746_v5 = vpop.xlane.xlu1 %2745 }
 0xc1b   : > { %4557 = vrcp.f32 %v2746_v5 }
 0xc1e   : > { %v2749_v4 = vpop.xlane.xlu0 %2748 }
 0xc1f   : > { %4559 = vrcp.f32 %v2749_v4 }
 0xc22   : > { %v2752_v6 = vpop.xlane.xlu0 %2751 }
 0xc23   : > { %4561 = vrcp.f32 %v2752_v6 }
 0xc26   : > { %v2755_v7 = vpop.xlane.xlu0 %2754 }
 0xc27   : > { %4563 = vrcp.f32 %v2755_v7 }
 0xc28   : > { %v4558_v12 = vpop.eup %4557 }
 0xc2b   : > { %v2758_v61 = vpop.xlane.xlu1 %2757 }
 0xc2c   : > { %v4560_v14 = vpop.eup %4559  ;;  %4565 = vrcp.f32 %v2758_v61 }
 0xc2f   : > { %v2740_v48 = vpop.xlane.xlu1 %2739 }
 0xc30   : > { %v4562_v25 = vpop.eup %4561 }
 0xc34   : > { %v4564_v27 = vpop.eup %4563 }
 0xc39   : > { %v4566_v41 = vpop.eup %4565 }
 0xc52   : > { %v2905_v9 = vpop.f32.mrf.mxu0 }
 0xc53   : > { %v3156_v52 = vmul.f32 %v4558_v12, %v2905_v9 }
 0xc54   : > { %v4122_v10 = vpop.f32.mrf.mxu0 }
 0xc56   : > { %v2908_v17 = vpop.f32.mrf.mxu0  ;;  %v2952_v18 = vpop.f32.mrf.mxu1 }
 0xc57   : > { %v3157_v8 = vmul.f32 %v4560_v14, %v2952_v18  ;;  %v2761_v37 = vpop.xlane.xlu0 %2760 }
 0xc58   : > { %v4123_v20 = vpop.f32.mrf.mxu0  ;;  %v4128_v21 = vpop.f32.mrf.mxu1  ;;  %4567 = vrcp.f32 %v2761_v37 }
 0xc59   : > { %v4470_v24 = vpack.i.bf16 %v3157_v8, %v3156_v52  ;;  %4569 = vrcp.f32 %v2740_v48  ;;  %v4498_v48 = vld [vmem:[%s6070_s20 + $0x10] sm:$0xff]  }
 0xc5a   : > { %v2955_v55 = vpop.f32.mrf.mxu1  ;;  %v2999_v19 = vpop.f32.mrf.mxu0 }
 0xc5b   : > { %4471 = vrot.lane.b32.xlu1 %v4470_v24, %s5125_s27  ;;  %v3158_v11 = vmul.f32 %v4562_v25, %v2999_v19  ;;  %v2743_v49 = vpop.xlane.xlu0 %2742 }
 0xc5c   : > { %v4129_v62 = vpop.f32.mrf.mxu1  ;;  %v4134_v26 = vpop.f32.mrf.mxu0  ;;  %4571 = vrcp.f32 %v2743_v49  ;;  %v4499_v49 = vld [vmem:[%s6070_s20 + $0x8] sm:$0xff]  }
 0xc5e   : > { %v3046_v13 = vpop.f32.mrf.mxu1  ;;  %v3002_v16 = vpop.f32.mrf.mxu0 }
 0xc5f   : > { %v3159_v28 = vmul.f32 %v4564_v27, %v3046_v13 }
 0xc60   : > { %v4140_v29 = vpop.f32.mrf.mxu1  ;;  %v4135_v32 = vpop.f32.mrf.mxu0 }
 0xc61   : > { %v4475_v30 = vpack.i.bf16 %v3159_v28, %v3158_v11  ;;  %v4496_v32 = vld [vmem:[#allocation26] sm:$0xff]  }
 0xc62   : > { %v3049_v33 = vpop.f32.mrf.mxu1 }
 0xc63   : > { %v3093_v22 = vpop.f32.mrf.mxu0  ;;  %4476 = vrot.lane.b32.xlu0 %v4475_v30, %s5126_s26  ;;  %v4495_v30 = vld [vmem:[#allocation26 + $0x8] sm:$0xff]   ;;  %s4999_s26 = scalar_lea.vmem %s6005_s24, 256 }
 0xc64   : > { %v4141_v34 = vpop.f32.mrf.mxu1  ;;  %v3160_v43 = vmul.f32 %v4566_v41, %v3093_v22  ;;  %4163 = vmatpush3.bf16.msra.mxu1 %v4495_v30  ;;  %p5000_p12 = scmp.ne.s32.totalorder %s6005_s24, %s4999_s26 }
 0xc65   : > { %v4146_v36 = vpop.f32.mrf.mxu0  ;;  %v4568_v42 = vpop.eup %4567  ;;  %4164 = vmatprep.subr.bf16.mxu1 %v5117_v15 }
 0xc66   : > { %v4570_v51 = vpop.eup %4569  ;;  %p5001_p3 = pnand %p5000_p12, %p6143_p1 }
 0xc67   : > { %v3096_v38 = vpop.f32.mrf.mxu0  ;;  %v3154_v2 = vmul.f32 %v4570_v51, %v5938_v54  ;;  %v3818_v54 = vld [vmem:[#allocation25] ss:$0 sm:$0xff]  ;;  %v3824_v51 = vld [vmem:[%s6140_s6] ss:$0 sm:$0xff]  ;;  %s5128_s6 = smov [#allocation28]  }
 0xc68   : > { %4165 = vmatpush3.bf16.msra.mxu1 %v4496_v32  ;;  %p5002_p4 = pneg %p5001_p3  ;;  %s5003_s21 = sshll.u32 %s5128_s6, 4  ;;  %s5004_s21 = int_to_ptr.vmem [resolvable:$false] %s5003_s21 }
 0xc69   : > { %v4147_v0 = vpop.f32.mrf.mxu0  ;;  %v4572_v56 = vpop.eup %4571  ;;  %p5006_p13 = scmp.lt.s32.totalorder %s6005_s24, %s5004_s21 }
 0xc6a   : > { %v3155_v3 = vmul.f32 %v4572_v56, %v5940_v59 }
 0xc8f   : > { %v3140_v1 = vpop.f32.mrf.mxu1 }
 0xc90   : > { %v3161_v40 = vmul.f32 %v4568_v42, %v3140_v1 }
 0xc91   : > { %v4152_v44 = vpop.f32.mrf.mxu1 }
 0xc92   : > { %v4480_v45 = vpack.i.bf16 %v3161_v40, %v3160_v43  ;;  %v3823_v43 = vld [vmem:[#allocation13] ss:$0 sm:$0xff] }
 0xc93   : > { %v3143_v46 = vpop.f32.mrf.mxu1 }
 0xc94   : > { %4481 = vrot.lane.b32.xlu1 %v4480_v45, %s5127_s25  ;;  %s5005_s25 = scalar_lea.vmem %s5004_s21, 512 }
 0xc95   : > { %v4153_v47 = vpop.f32.mrf.mxu1  ;;  %p5007_p2 = scmp.lt.s32.totalorder %s5005_s25, %s4999_s26 }
 0xc96   : > { %v4497_v47 = vld [vmem:[%s6070_s20 + $0x18] sm:$0xff]  }
 0xc97   : > { %p5008_p5 = por %p5007_p2, %p5006_p13 }
 0xc99   : > { %p5009_p10 = pnand %p5008_p5, %p5002_p4 }
 0xccd   : > { %v4472_v50 = vpop.permute.xlu1 %4471 }
 0xcce   : > { %v4474_v57 = vunpack.i.h.bf16 %v4472_v50  ;;  %v4473_v58 = vunpack.i.l.bf16 %v4472_v50  ;;  %v4500_v50 = vld [vmem:[%s6070_s20] sm:$0xff]  }
 0xcd0   : > { %v3187_v5 = vsel %vm1081_vm2, %v3155_v3, %v4474_v57  ;;  %v3186_v6 = vsel %vm1081_vm2, %v3154_v2, %v4473_v58 }
 0xcd5   : > { %v4477_v53 = vpop.permute.xlu0 %4476 }
 0xcd6   : > { %v4479_v60 = vunpack.i.h.bf16 %v4477_v53  ;;  %v4478_v63 = vunpack.i.l.bf16 %v4477_v53 }
 0xcd8   : > { %v3189_v10 = vsel %vm1978_vm5, %v3187_v5, %v4479_v60  ;;  %v3188_v12 = vsel %vm1978_vm5, %v3186_v6, %v4478_v63 }
 0xd06   : > { %v4482_v4 = vpop.permute.xlu1 %4481 }
 0xd07   : > { %v4484_v7 = vunpack.i.h.bf16 %v4482_v4  ;;  %v4483_v9 = vunpack.i.l.bf16 %v4482_v4 }
 0xd09   : > { %v3191_v14 = vsel %vm1981_vm6, %v3189_v10, %v4484_v7  ;;  %v3190_v17 = vsel %vm1981_vm6, %v3188_v12, %v4483_v9 }
 0xd0a   : > { %v3192_v18 = vpack.c.bf16 %v3191_v14, %v3190_v17 }
 0xd0c   : > { %4159 = vmatmul.mubr.msk.bf16.vlgmr.msra.gmra.mxu0 %vm936_vm0, %v3192_v18 }
 0xd0d   : > { %4178 = vmatprep.mubr.msk.bf16.mxu0 %vm5118_vm1, %v5117_v15  ;;  %4171 = vmatpush3.bf16.msra.mxu0 %v4497_v47 }
 0xd0e   : > { %4172 = vmatprep.subr.bf16.mxu0 %v5117_v15 }
 0xd11   : > { %4173 = vmatpush3.bf16.msra.mxu0 %v4498_v48 }
 0xd12   : > { %4174 = vmatprep.subr.bf16.mxu0 %v5117_v15 }
 0xd15   : > { %4175 = vmatpush3.bf16.msra.mxu0 %v4499_v49 }
 0xd16   : > { %4176 = vmatprep.subr.bf16.mxu0 %v5117_v15 }
 0xd19   : > { %4177 = vmatpush3.bf16.msra.mxu0 %v4500_v50 }
 0xdcc   : > { %v3253_v59 = vpop.f32.mrf.mxu0 }
 0xdcd   : > { %v3254_v52 = vadd.f32 %v3818_v54, %v3253_v59 }
 0xdce   : > { %v4160_v8 = vpop.f32.mrf.mxu0 }
 0xdcf   : > { %v5959_v20 = vadd.f32 %v3254_v52, %v5768_v31 }
 0xdd0   : > { %v3256_v21 = vpop.f32.mrf.mxu0 }
 0xdd1   : > { %v3257_v23 = vadd.f32 %v3818_v54, %v3256_v21  ;;  %v3262_v24 = vsel %vm936_vm0, %v5959_v20, 0.0 }
 0xdd2   : > { %3263 = vadd.xlane.f32.xlu1 %v3262_v24  ;;  %v4161_v55 = vpop.f32.mrf.mxu0  ;;  %v3828_v24 = vld [vmem:[%s6141_s7] ss:$0 sm:$0xff] }
 0xdd3   : > { %v5964_v19 = vadd.f32 %v3257_v23, %v5773_v35 }
 0xdd5   : > { %v3265_v62 = vsel %vm936_vm0, %v5964_v19, 0.0 }
 0xdd6   : > { %3266 = vadd.xlane.f32.xlu0 %v3265_v62 }
 0xe5b   : > { %v3264_v25 = vpop.xlane.xlu1 %3263 }
 0xe5c   : > { %v3268_v26 = vmul.f32 0.03125, %v3264_v25 }
 0xe5e   : > { %v3270_v27 = vsub.f32 %v5959_v20, %v3268_v26 }
 0xe5f   : > { %v3267_v31 = vpop.xlane.xlu0 %3266 }
 0xe60   : > { %v3269_v13 = vmul.f32 0.03125, %v3267_v31  ;;  %v3272_v11 = vmul.f32 %v3270_v27, %v3270_v27 }
 0xe62   : > { %v3271_v16 = vsub.f32 %v5964_v19, %v3269_v13  ;;  %v3274_v28 = vsel %vm936_vm0, %v3272_v11, 0.0 }
 0xe63   : > { %3275 = vadd.xlane.f32.xlu0 %v3274_v28 }
 0xe64   : > { %v3273_v29 = vmul.f32 %v3271_v16, %v3271_v16 }
 0xe66   : > { %v3277_v35 = vsel %vm936_vm0, %v3273_v29, 0.0 }
 0xe67   : > { %3278 = vadd.xlane.f32.xlu1 %v3277_v35 }
 0xeec   : > { %v3276_v33 = vpop.xlane.xlu0 %3275 }
 0xeed   : > { %v3280_v22 = vmul.f32 0.03125, %v3276_v33 }
 0xeef   : > { %v3283_v34 = vadd.f32 1e-12, %v3280_v22 }
 0xef0   : > { %v3279_v36 = vpop.xlane.xlu1 %3278 }
 0xef1   : > { %4573 = vrsqrt.f32 %v3283_v34  ;;  %v3281_v38 = vmul.f32 0.03125, %v3279_v36 }
 0xef3   : > { %v3284_v0 = vadd.f32 1e-12, %v3281_v38 }
 0xef5   : > { %4575 = vrsqrt.f32 %v3284_v0 }
 0xefe   : > { %v4574_v61 = vpop.eup %4573 }
 0xeff   : > { %v3287_v37 = vmul.f32 %v4574_v61, %v3270_v27 }
 0xf01   : > { %v3295_v1 = vmul.f32 %v3822_v39, %v3287_v37 }
 0xf02   : > { %v4576_v41 = vpop.eup %4575 }
 0xf03   : > { %v3288_v42 = vmul.f32 %v4576_v41, %v3271_v16  ;;  %v3304_v44 = vadd.f32 %v3823_v43, %v3295_v1 }
 0xf05   : > { %v3296_v40 = vmul.f32 %v3822_v39, %v3288_v42 }
 0xf07   : > { %v3305_v45 = vadd.f32 %v3823_v43, %v3296_v40 }
 0xf09   : > { %v3306_v46 = vpack.c.bf16 %v3305_v45, %v3304_v44 }
 0xf0b   : > { %4167 = vmatmul.mubr.msk.bf16.vlgmr.msra.gmra.mxu1 %vm936_vm0, %v3306_v46 }
 0xfcb   : > { %v3367_v53 = vpop.f32.mrf.mxu1 }
 0xfcc   : > { %v3368_v56 = vadd.f32 %v3824_v51, %v3367_v53 }
 0xfcd   : > { %v4168_v57 = vpop.f32.mrf.mxu1 }
 0xfce   : > { %v3376_v58 = vmul.f32 0.044715, %v3368_v56  ;;  %v3374_v54 = vmul.f32 0.5, %v3368_v56 }
 0xfcf   : > { %v3370_v60 = vpop.f32.mrf.mxu1 }
 0xfd0   : > { %v3378_v63 = vmul.f32 %v3376_v58, %v3368_v56  ;;  %v3371_v2 = vadd.f32 %v3824_v51, %v3370_v60 }
 0xfd1   : > { %v4169_v3 = vpop.f32.mrf.mxu1 }
 0xfd2   : > { %v3380_v4 = vmul.f32 %v3378_v63, %v3368_v56  ;;  %v3377_v5 = vmul.f32 0.044715, %v3371_v2  ;;  %v3375_v59 = vmul.f32 0.5, %v3371_v2 }
 0xfd4   : > { %v3382_v6 = vadd.f32 %v3380_v4, %v3368_v56  ;;  %v3379_v7 = vmul.f32 %v3377_v5, %v3371_v2 }
 0xfd6   : > { %v3384_v9 = vmul.f32 0.7978846, %v3382_v6  ;;  %v3381_v10 = vmul.f32 %v3379_v7, %v3371_v2 }
 0xfd8   : > { %4577 = vtanh.f32 %v3384_v9  ;;  %v3383_v15 = vadd.f32 %v3381_v10, %v3371_v2 }
 0xfda   : > { %v3385_v12 = vmul.f32 0.7978846, %v3383_v15 }
 0xfdc   : > { %4579 = vtanh.f32 %v3385_v12 }
 0xfe5   : > { %v4578_v14 = vpop.eup %4577 }
 0xfe6   : > { %v3388_v17 = vadd.f32 1.0, %v4578_v14 }
 0xfe8   : > { %v3390_v8 = vmul.f32 %v3388_v17, %v3374_v54 }
 0xfe9   : > { %v4580_v18 = vpop.eup %4579 }
 0xfea   : > { %v3389_v52 = vadd.f32 1.0, %v4580_v18 }
 0xfec   : > { %v3391_v21 = vmul.f32 %v3389_v52, %v3375_v59 }
 0xfee   : > { %v3392_v23 = vpack.c.bf16 %v3391_v21, %v3390_v8 }
 0xff0   : > { %4179 = vmatmul.mubr.msk.bf16.vlgmr.msra.gmra.mxu0 %vm3432_vm7, %v3392_v23 }
0x10b0   : > { %v3470_v55 = vpop.f32.mrf.mxu0 }
0x10b1   : > { %v3471_v62 = vadd.f32 %v3828_v24, %v3470_v55 }
0x10b2   : > { %v4180_v25 = vpop.f32.mrf.mxu0 }
0x10b3   : > { %v3477_v26 = vadd.f32 %v3471_v62, %v5959_v20 }
0x10b4   : > { %v3473_v27 = vpop.f32.mrf.mxu0 }
0x10b5   : > { %3479 = vst.msk [vmem:[%s914_s15] sm:$0xff] %vm936_vm0, %v3477_v26  ;;  %v3474_v31 = vadd.f32 %v3828_v24, %v3473_v27 }
0x10b6   : > { %v4181_v13 = vpop.f32.mrf.mxu0 }
0x10b7   : > { %v3478_v11 = vadd.f32 %v3474_v31, %v5964_v19 }
0x10b9   : > { %3480 = vst.msk [vmem:[%s914_s15 + $0x8] sm:$0xff] %vm936_vm0, %v3478_v11 }
0x10ba   : > { %5012 = shalt.err (!%p5009_p10)
}
0x10bb   : > { %s5013_s7 = scalar_lea.hbm %s6002_s9, 256  ;;  %s5017_s15 = scalar_lea.hbm %s6142_s1, 512 }
0x10bc   : > { %p5014_p11 = scmp.ne.s32.totalorder %s6002_s9, %s5013_s7  ;;  %p5018_p6 = scmp.lt.s32.totalorder %s6002_s9, %s6142_s1 }
0x10bd   : > { %p5019_p8 = scmp.lt.s32.totalorder %s5017_s15, %s5013_s7 }
0x10be   : > { %p5015_p7 = pnand %p5014_p11, %p6143_p1 }
0x10bf   : > { %p5020_p9 = por %p5019_p8, %p5018_p6 }
0x10c0   : > { %p5016_p0 = pneg %p5015_p7 }
0x10c2   : > { %p5021_p12 = pnand %p5020_p9, %p5016_p0 }
0x10c4   : > { %5024 = shalt.err (!%p5021_p12)
}
0x10c5   : > { %s5129_s26 = smov 128  }
0x10c6   : > { %4244 = dma.vmem_to_hbm [thread:$0]  (%p6143_p1), %s6005_s24, 256, %s6002_s9, %s3482_s23, %s5129_s26, %s5129_s26, %s5125_s27  }
0x10c7 PF: > { %s3510_s6 = sand.u32 1, %s5083_s3   ;;  %p6144_p3 = scmp.ne.s32.totalorder %s6118_s22, 0 }
0x10c8   : > { %p6145_p4 = scmp.ge.s32.totalorder %s5095_s30, 2  ;;  %s3511_s21 = scalar_lea.sflag [#allocation4], %s3510_s6 }
0x10ca   : > { %p4297_p13 = pnand %p6145_p4, %p6144_p3 }
0x10cc   : > { %p4298_p2 = pneg %p4297_p13 }
0x10ce   : > { %5078 = dma.done.wait (%p4298_p2), %s3511_s21, 256  }
0x10cf   : > { %5080 = vsyncadd (%p4298_p2), %s3511_s21, 4294967040  ;;  %p43_p5 = scmp.ge.s32.totalorder %s5428_s4, 4   ;;  %s6146_s3 = smov %s5087_s28 }
0x10d0   : > { %s6147_s28 = smov %s5091_s29  ;;  %s6148_s29 = smov %s5440_s19 }
0x10d1   : > { %s6149_s30 = smov %s5428_s4  ;;  %45 = sbr.rel (!%p43_p5) target bundleno = 31 (0x1f), region = 216 }
0x10d6   :  { %3516 = vsyncpa [#allocation3], 1 }
0x10d7   :  { %3518 = vsyncpa [#allocation3 + $0x1], 1 }
0x10d8   :  { %3519 = vsyncpa [#allocation6], 1 }
0x10d9   :  { %3520 = vsyncpa [#allocation9], 1 }
0x10da   :  { %3521 = vsyncpa [#allocation12], 1 }
0x10db   :  { %3522 = vsyncpa [#allocation15], 1 }
0x10dc   :  { %3523 = vsyncpa [#allocation18], 1 }
0x10dd   :  { %3524 = vsyncpa [#allocation21], 1 }
0x10de   :  { %3525 = vsyncpa [#allocation24], 1 }
0x10df   :  { %3526 = vsyncpa [#allocation27], 1 }
0x10e0   :  { %3527 = vsyncpa [#allocation4], 1 }
0x10e1   :  { %3529 = vsyncpa [#allocation4 + $0x1], 1 }

// kernel: tpu_custom_call.1
= control target key start
LH: loop header
LB: loop body
LE: loop exit
PB: predicated region body
PF: predicated region fallthrough
CT: control target
= control target key end

     0   :  { %s6050_s0 = inlined_call_operand.vmem [shape: f32[4,8,32], index: 0, kind: input, shape index: {}]   ;;  %s6051_s1 = inlined_call_operand.hbm [shape: f32[4,16,32], index: 1, kind: input, shape index: {}]   ;;  %s6052_s2 = inlined_call_operand.hbm [shape: f32[1,32], index: 2, kind: input, shape index: {}]   ;;  %s6053_s3 = inlined_call_operand.hbm [shape: f32[1,32], index: 3, kind: input, shape index: {}]   ;;  %s6054_s4 = inlined_call_operand.hbm [shape: f32[1,32], index: 4, kind: input, shape index: {}]   ;;  %s6055_s5 = inlined_call_operand.hbm [shape: f32[1,32], index: 5, kind: input, shape index: {}]   ;;  %s6056_s6 = inlined_call_operand.hbm [shape: f32[1,32], index: 6, kind: input, shape index: {}]   ;;  %s6057_s7 = inlined_call_operand.hbm [shape: f32[1,32], index: 7, kind: input, shape index: {}]   ;;  %s6058_s8 = inlined_call_operand.vmem [shape: bf16[32,96], index: 8, kind: input, shape index: {}]   ;;  %s6059_s9 = inlined_call_operand.hbm [shape: f32[1,96], index: 9, kind: input, shape index: {}]   ;;  %s6060_s10 = inlined_call_operand.vmem [shape: bf16[32,32], index: 10, kind: input, shape index: {}]   ;;  %s6061_s11 = inlined_call_operand.hbm [shape: f32[1,32], index: 11, kind: input, shape index: {}]   ;;  %s6062_s12 = inlined_call_operand.hbm [shape: bf16[32,32], index: 12, kind: input, shape index: {}]   ;;  %s6063_s13 = inlined_call_operand.hbm [shape: f32[1,32], index: 13, kind: input, shape index: {}]   ;;  %s6064_s14 = inlined_call_operand.hbm [shape: bf16[32,64], index: 14, kind: input, shape index: {}]   ;;  %s6065_s15 = inlined_call_operand.hbm [shape: f32[1,64], index: 15, kind: input, shape index: {}]   ;;  %s6066_s16 = inlined_call_operand.hbm [shape: bf16[32,32], index: 16, kind: input, shape index: {}]   ;;  %s6067_s17 = inlined_call_operand.hbm [shape: f32[1,32], index: 17, kind: input, shape index: {}]   ;;  %s6068_s18 = inlined_call_operand.hbm [shape: bf16[32,64], index: 18, kind: input, shape index: {}]   ;;  %s6069_s19 = inlined_call_operand.vmem [shape: f32[1,64], index: 19, kind: input, shape index: {}]   ;;  %s6070_s20 = inlined_call_operand.vmem [shape: bf16[64,32], index: 20, kind: input, shape index: {}]   ;;  %s6071_s21 = inlined_call_operand.vmem [shape: f32[1,32], index: 21, kind: input, shape index: {}]   ;;  %s6072_s22 = inlined_call_operand.hbm [shape: f32[4,8,32], index: 22, kind: output, shape index: {}]  }
   0x1   :  { %6081 = sst [smem:[#allocation39_spill]] %s6050_s0 }
   0x2   :  { %6082 = sst [smem:[#allocation40_spill]] %s6051_s1 }
   0x3   :  { %6083 = sst [smem:[#allocation41_spill]] %s6052_s2 }
   0x4   :  { %6084 = sst [smem:[#allocation42_spill]] %s6053_s3 }
   0x5   :  { %6085 = sst [smem:[#allocation43_spill]] %s6054_s4 }
   0x6   :  { %6086 = sst [smem:[#allocation44_spill]] %s6055_s5 }
   0x7   :  { %6087 = sst [smem:[#allocation45_spill]] %s6056_s6 }
   0x8   :  { %6088 = sst [smem:[#allocation46_spill]] %s6057_s7 }
   0x9   :  { %6089 = sst [smem:[#allocation47_spill]] %s6059_s9 }
   0xa   :  { %6090 = sst [smem:[#allocation48_spill]] %s6061_s11 }
   0xb   :  { %6091 = sst [smem:[#allocation49_spill]] %s6062_s12 }
   0xc   :  { %6092 = sst [smem:[#allocation50_spill]] %s6063_s13 }
   0xd   :  { %6093 = sst [smem:[#allocation51_spill]] %s6064_s14 }
   0xe   :  { %6094 = sst [smem:[#allocation52_spill]] %s6065_s15 }
   0xf   :  { %6095 = sst [smem:[#allocation53_spill]] %s6069_s19 }
  0x10   :  { %6096 = sst [smem:[#allocation54_spill]] %s6071_s21 }
  0x11   :  { %6097 = sst [smem:[#allocation55_spill]] %s6072_s22 }
  0x12   :  { %27 = vsyncpa [#allocation3], 0 }
  0x13   :  { %29 = vsyncpa [#allocation3 + $0x1], 0 }
  0x14   :  { %30 = vsyncpa [#allocation6], 0 }
  0x15   :  { %31 = vsyncpa [#allocation9], 0 }
  0x16   :  { %32 = vsyncpa [#allocation12], 0 }
  0x17   :  { %33 = vsyncpa [#allocation15], 0 }
  0x18   :  { %34 = vsyncpa [#allocation18], 0 }
  0x19   :  { %35 = vsyncpa [#allocation21], 0 }
  0x1a   :  { %36 = vsyncpa [#allocation24], 0 }
  0x1b   :  { %37 = vsyncpa [#allocation27], 0 }
  0x1c   :  { %38 = vsyncpa [#allocation4], 0 }
  0x1d   :  { %40 = vsyncpa [#allocation4 + $0x1], 0  ;;  %s5245_s3 = smov 0   ;;  %s5247_s28 = smov 0  }
  0x1e   :  { %s5249_s29 = smov 0   ;;  %s5251_s30 = smov 0  }
  0x1f LB: > { %s5097_s4 = smov [#allocation5]   ;;  %s5266_s23 = sadd.s32 4294967295, %s5095_s30   ;;  %s5095_s30 = sphi %s5251_s30, %s6149_s30   ;;  %s5091_s29 = sphi %s5249_s29, %s6148_s29   ;;  %s5087_s28 = sphi %s5247_s28, %s6147_s28   ;;  %s5083_s3 = sphi %s5245_s3, %s6146_s3  }
  0x20   : > { %s562_s0 = sshll.u32 %s5097_s4, 4  ;;  %p3724_p0 = scmp.ge.s32.totalorder %s5095_s30, 1  ;;  %s563_s0 = int_to_ptr.vmem [resolvable:$true] %s562_s0 }
  0x21   : > { %p6075_p1 = scmp.eq.s32.totalorder %s5266_s23, 0  ;;  %p549_p2 = scmp.lt.s32.totalorder %s5095_s30, 3 }
  0x22   : > { %s5098_s5 = smov [#allocation8]   ;;  %s5099_s6 = smov [#allocation11]  }
  0x23   : > { %p5271_p3 = pnand %p3724_p0, %p549_p2  ;;  %s584_s24 = sshll.u32 %s5098_s5, 4  ;;  %s5278_s24 = int_to_ptr.vmem [resolvable:$true] %s584_s24 }
  0x24   : > { %s606_s25 = sshll.u32 %s5099_s6, 4  ;;  %s5100_s2 = smov [#allocation14]   ;;  %s5286_s25 = int_to_ptr.vmem [resolvable:$true] %s606_s25 }
  0x25   : > { %s6098_s1 = scalar_select %p5271_p3, 1, 0 }
  0x26   : > { %p4246_p5 = pneg %p5271_p3  ;;  %s5288_s27 = sshll.u32 %s5100_s2, 4  ;;  %s632_s27 = int_to_ptr.vmem [resolvable:$true] %s5288_s27 }
  0x27   : > { %s4592_s5 = scalar_lea.vmem %s563_s0, 16  ;;  %s4599_s6 = scalar_lea.vmem %s563_s0, 32 }
  0x28   : > { %p5282_p6 = pnand %p4246_p5, %p6075_p1  ;;  %p4593_p8 = scmp.ne.s32.totalorder %s563_s0, %s4592_s5 }
  0x29   : > { %p4600_p11 = scmp.lt.s32.totalorder %s563_s0, %s563_s0  ;;  %p4601_p12 = scmp.lt.s32.totalorder %s4599_s6, %s4592_s5 }
  0x2a   : > { %p5292_p7 = pneg %p5282_p6 }
  0x2b   : > { %p4602_p13 = por %p4601_p12, %p4600_p11 }
  0x2c   : > { %p4595_p9 = pnand %p4593_p8, %p5292_p7 }
  0x2e   : > { %p4596_p10 = pneg %p4595_p9 }
  0x30   : > { %p4603_p0 = pnand %p4602_p13, %p4596_p10 }
  0x32   : > { %4606 = shalt.err (!%p4603_p0)
}
  0x33   : > { %s6101_s21 = sld [smem:[#allocation41_spill]]  ;;  %s4618_s19 = scalar_lea.vmem %s5278_s24, 16 }
  0x34   : > { %p4619_p2 = scmp.ne.s32.totalorder %s5278_s24, %s4618_s19  ;;  %s4625_s5 = scalar_lea.vmem %s5278_s24, 32 }
  0x35   : > { %p4626_p9 = scmp.lt.s32.totalorder %s5278_s24, %s5278_s24  ;;  %p4627_p10 = scmp.lt.s32.totalorder %s4625_s5, %s4618_s19 }
  0x36   : > { %p4621_p5 = pnand %p4619_p2, %p5292_p7 }
  0x37   : > { %p4628_p11 = por %p4627_p10, %p4626_p9 }
  0x38   : > { %p4622_p8 = pneg %p4621_p5 }
  0x39   : > { %4249 = dma.hbm_to_vmem [thread:$0]  (!%p5282_p6), %s6101_s21, 16, %s563_s0, [#allocation6]  }
  0x3a   : > { %p4629_p12 = pnand %p4628_p11, %p4622_p8 }
  0x3c   : > { %4632 = shalt.err (!%p4629_p12)
}
  0x3d   : > { %s6102_s2 = sld [smem:[#allocation43_spill]]  ;;  %s4644_s21 = scalar_lea.vmem %s5286_s25, 16 }
  0x3e   : > { %p4645_p13 = scmp.ne.s32.totalorder %s5286_s25, %s4644_s21  ;;  %s4651_s19 = scalar_lea.vmem %s5286_s25, 32 }
  0x3f   : > { %p4652_p5 = scmp.lt.s32.totalorder %s5286_s25, %s5286_s25  ;;  %p4653_p8 = scmp.lt.s32.totalorder %s4651_s19, %s4644_s21 }
  0x40   : > { %p4647_p0 = pnand %p4645_p13, %p5292_p7 }
  0x41   : > { %p4654_p9 = por %p4653_p8, %p4652_p5 }
  0x42   : > { %p4648_p2 = pneg %p4647_p0 }
  0x43   : > { %4255 = dma.hbm_to_vmem [thread:$0]  (!%p5282_p6), %s6102_s2, 16, %s5278_s24, [#allocation9]  }
  0x44   : > { %p4655_p10 = pnand %p4654_p9, %p4648_p2 }
  0x46   : > { %4658 = shalt.err (!%p4655_p10)
}
  0x47   : > { %s6103_s22 = sld [smem:[#allocation45_spill]]  ;;  %s5101_s24 = smov [#allocation17]  }
  0x48   : > { %s655_s6 = sshll.u32 %s5101_s24, 4  ;;  %s4670_s2 = scalar_lea.vmem %s632_s27, 16  ;;  %s656_s6 = int_to_ptr.vmem [resolvable:$true] %s655_s6 }
  0x49   : > { %p4671_p11 = scmp.ne.s32.totalorder %s632_s27, %s4670_s2  ;;  %s4677_s21 = scalar_lea.vmem %s632_s27, 32 }
  0x4a   : > { %p4678_p0 = scmp.lt.s32.totalorder %s632_s27, %s632_s27  ;;  %p4679_p2 = scmp.lt.s32.totalorder %s4677_s21, %s4670_s2 }
  0x4b   : > { %p4673_p12 = pnand %p4671_p11, %p5292_p7 }
  0x4c   : > { %p4680_p5 = por %p4679_p2, %p4678_p0 }
  0x4d   : > { %4261 = dma.hbm_to_vmem [thread:$0]  (!%p5282_p6), %s6103_s22, 16, %s5286_s25, [#allocation12]  }
  0x4e   : > { %p4674_p13 = pneg %p4673_p12 }
  0x50   : > { %p4681_p8 = pnand %p4680_p5, %p4674_p13 }
  0x52   : > { %4684 = shalt.err (!%p4681_p8)
}
  0x53   : > { %s6104_s9 = sld [smem:[#allocation47_spill]]  ;;  %s4696_s25 = scalar_lea.vmem %s656_s6, 256 }
  0x54   : > { %p4697_p9 = scmp.ne.s32.totalorder %s656_s6, %s4696_s25  ;;  %p4704_p12 = scmp.lt.s32.totalorder %s656_s6, %s656_s6 }
  0x55   : > { %p4705_p4 = scmp.lt.s32.totalorder %s4696_s25, %s4696_s25 }
  0x56   : > { %p4699_p10 = pnand %p4697_p9, %p5292_p7 }
  0x57   : > { %p4706_p1 = por %p4705_p4, %p4704_p12 }
  0x58   : > { %p4700_p11 = pneg %p4699_p10 }
  0x59   : > { %4267 = dma.hbm_to_vmem [thread:$0]  (!%p5282_p6), %s6104_s9, 16, %s632_s27, [#allocation15]  }
  0x5a   : > { %p4707_p3 = pnand %p4706_p1, %p4700_p11 }
  0x5c   : > { %4710 = shalt.err (!%p4707_p3)
}
  0x5d   : > { %s6077_s5 = smov 64   ;;  %s6078_s22 = smov 4  }
  0x5e   : > { %s6105_s12 = sld [smem:[#allocation49_spill]]  ;;  %s5104_s2 = smov [#allocation20]  }
  0x5f   : > { %s679_s21 = sshll.u32 %s5104_s2, 4  ;;  %s5105_s19 = smov [#allocation23]   ;;  %s680_s21 = int_to_ptr.vmem [resolvable:$true] %s679_s21 }
  0x60   : > { %s703_s0 = sshll.u32 %s5105_s19, 4  ;;  %s4722_s25 = scalar_lea.vmem %s680_s21, 256  ;;  %s704_s0 = int_to_ptr.vmem [resolvable:$true] %s703_s0 }
  0x61   : > { %p4723_p1 = scmp.ne.s32.totalorder %s680_s21, %s4722_s25  ;;  %p4730_p13 = scmp.lt.s32.totalorder %s680_s21, %s680_s21 }
  0x62   : > { %p4731_p0 = scmp.lt.s32.totalorder %s4722_s25, %s4722_s25 }
  0x63   : > { %p4725_p3 = pnand %p4723_p1, %p5292_p7 }
  0x64   : > { %4273 = dma.hbm_to_vmem [thread:$0]  (!%p5282_p6), %s6105_s12, 256, %s656_s6, [#allocation18], %s6077_s5, %s6077_s5, %s6078_s22  }
  0x65   : > { %p4726_p4 = pneg %p4725_p3  ;;  %p4732_p2 = por %p4731_p0, %p4730_p13 }
  0x67   : > { %p4733_p5 = pnand %p4732_p2, %p4726_p4 }
  0x69   : > { %4736 = shalt.err (!%p4733_p5)
}
  0x6a   : > { %s6106_s14 = sld [smem:[#allocation51_spill]]  ;;  %s4748_s24 = scalar_lea.vmem %s704_s0, 256 }
  0x6b   : > { %p4749_p8 = scmp.ne.s32.totalorder %s704_s0, %s4748_s24  ;;  %p4756_p11 = scmp.lt.s32.totalorder %s704_s0, %s704_s0 }
  0x6c   : > { %p4757_p12 = scmp.lt.s32.totalorder %s4748_s24, %s4748_s24 }
  0x6d   : > { %p4751_p9 = pnand %p4749_p8, %p5292_p7 }
  0x6e   : > { %p4758_p1 = por %p4757_p12, %p4756_p11 }
  0x6f   : > { %p4752_p10 = pneg %p4751_p9 }
  0x70   : > { %4279 = dma.hbm_to_vmem [thread:$0]  (!%p5282_p6), %s6106_s14, 256, %s680_s21, [#allocation21], %s6077_s5, %s6077_s5, %s6078_s22  }
  0x71   : > { %p4759_p3 = pnand %p4758_p1, %p4752_p10 }
  0x73   : > { %4762 = shalt.err (!%p4759_p3)
}
  0x74   : > { %4285 = dma.hbm_to_vmem [thread:$0]  (!%p5282_p6), %s6066_s16, 256, %s704_s0, [#allocation24], %s6077_s5, %s6077_s5, %s6078_s22  }
  0x75   : > { %s5106_s21 = smov [#allocation7]   ;;  %s5107_s6 = smov [#allocation10]  }
  0x76   : > { %s573_s25 = sshll.u32 %s5106_s21, 4  ;;  %s595_s27 = sshll.u32 %s5107_s6, 4  ;;  %s574_s25 = int_to_ptr.vmem [resolvable:$true] %s573_s25  ;;  %s596_s27 = int_to_ptr.vmem [resolvable:$true] %s595_s27 }
  0x77   : > { %s4774_s9 = scalar_lea.vmem %s574_s25, 16  ;;  %s4781_s24 = scalar_lea.vmem %s574_s25, 32 }
  0x78   : > { %p4775_p4 = scmp.ne.s32.totalorder %s574_s25, %s4774_s9  ;;  %p4782_p2 = scmp.lt.s32.totalorder %s574_s25, %s574_s25 }
  0x79   : > { %p4783_p5 = scmp.lt.s32.totalorder %s4781_s24, %s4774_s9 }
  0x7a   : > { %p4777_p13 = pnand %p4775_p4, %p5292_p7 }
  0x7b   : > { %p4784_p8 = por %p4783_p5, %p4782_p2 }
  0x7c   : > { %p4778_p0 = pneg %p4777_p13 }
  0x7e   : > { %p4785_p9 = pnand %p4784_p8, %p4778_p0 }
  0x80   : > { %4788 = shalt.err (!%p4785_p9)
}
  0x81   : > { %s6107_s19 = sld [smem:[#allocation42_spill]]  ;;  %s4800_s21 = scalar_lea.vmem %s596_s27, 16 }
  0x82   : > { %p4801_p10 = scmp.ne.s32.totalorder %s596_s27, %s4800_s21  ;;  %s4807_s6 = scalar_lea.vmem %s596_s27, 32 }
  0x83   : > { %p4808_p1 = scmp.lt.s32.totalorder %s596_s27, %s596_s27  ;;  %p4809_p3 = scmp.lt.s32.totalorder %s4807_s6, %s4800_s21 }
  0x84   : > { %p4803_p11 = pnand %p4801_p10, %p5292_p7 }
  0x85   : > { %p4810_p4 = por %p4809_p3, %p4808_p1 }
  0x86   : > { %p4804_p12 = pneg %p4803_p11 }
  0x87   : > { %4252 = dma.hbm_to_vmem [thread:$0]  (!%p5282_p6), %s6107_s19, 16, %s574_s25, [#allocation6]  }
  0x88   : > { %p4811_p13 = pnand %p4810_p4, %p4804_p12 }
  0x8a   : > { %4814 = shalt.err (!%p4811_p13)
}
  0x8b   : > { %s6108_s5 = sld [smem:[#allocation44_spill]]  ;;  %s5108_s25 = smov [#allocation13]  }
  0x8c   : > { %s617_s2 = sshll.u32 %s5108_s25, 4  ;;  %s5109_s0 = smov [#allocation16]   ;;  %s618_s2 = int_to_ptr.vmem [resolvable:$true] %s617_s2 }
  0x8d   : > { %s645_s19 = sshll.u32 %s5109_s0, 4  ;;  %s4826_s22 = scalar_lea.vmem %s618_s2, 16  ;;  %s646_s19 = int_to_ptr.vmem [resolvable:$true] %s645_s19 }
  0x8e   : > { %p4827_p0 = scmp.ne.s32.totalorder %s618_s2, %s4826_s22  ;;  %s4833_s21 = scalar_lea.vmem %s618_s2, 32 }
  0x8f   : > { %p4834_p8 = scmp.lt.s32.totalorder %s618_s2, %s618_s2  ;;  %p4835_p9 = scmp.lt.s32.totalorder %s4833_s21, %s4826_s22 }
  0x90   : > { %p4829_p2 = pnand %p4827_p0, %p5292_p7 }
  0x91   : > { %4258 = dma.hbm_to_vmem [thread:$0]  (!%p5282_p6), %s6108_s5, 16, %s596_s27, [#allocation9]  }
  0x92   : > { %p4830_p5 = pneg %p4829_p2  ;;  %p4836_p10 = por %p4835_p9, %p4834_p8 }
  0x94   : > { %p4837_p11 = pnand %p4836_p10, %p4830_p5 }
  0x96   : > { %4840 = shalt.err (!%p4837_p11)
}
  0x97   : > { %s6109_s7 = sld [smem:[#allocation46_spill]]  ;;  %s4852_s27 = scalar_lea.vmem %s646_s19, 16 }
  0x98   : > { %p4853_p12 = scmp.ne.s32.totalorder %s646_s19, %s4852_s27  ;;  %s4859_s9 = scalar_lea.vmem %s646_s19, 32 }
  0x99   : > { %p4860_p4 = scmp.lt.s32.totalorder %s646_s19, %s646_s19  ;;  %p4861_p13 = scmp.lt.s32.totalorder %s4859_s9, %s4852_s27 }
  0x9a   : > { %p4855_p1 = pnand %p4853_p12, %p5292_p7 }
  0x9b   : > { %p4862_p0 = por %p4861_p13, %p4860_p4 }
  0x9c   : > { %p4856_p3 = pneg %p4855_p1 }
  0x9d   : > { %4264 = dma.hbm_to_vmem [thread:$0]  (!%p5282_p6), %s6109_s7, 16, %s618_s2, [#allocation12]  }
  0x9e   : > { %p4863_p2 = pnand %p4862_p0, %p4856_p3 }
  0xa0   : > { %4866 = shalt.err (!%p4863_p2)
}
  0xa1   : > { %s6110_s11 = sld [smem:[#allocation48_spill]]  ;;  %s5110_s25 = smov [#allocation19]  }
  0xa2   : > { %s669_s2 = sshll.u32 %s5110_s25, 4  ;;  %s5111_s0 = smov [#allocation22]   ;;  %s670_s2 = int_to_ptr.vmem [resolvable:$true] %s669_s2 }
  0xa3   : > { %s693_s21 = sshll.u32 %s5111_s0, 4  ;;  %s4878_s6 = scalar_lea.vmem %s670_s2, 16  ;;  %s694_s21 = int_to_ptr.vmem [resolvable:$true] %s693_s21 }
  0xa4   : > { %p4879_p5 = scmp.ne.s32.totalorder %s670_s2, %s4878_s6  ;;  %s4885_s5 = scalar_lea.vmem %s670_s2, 32 }
  0xa5   : > { %p4886_p10 = scmp.lt.s32.totalorder %s670_s2, %s670_s2  ;;  %p4887_p11 = scmp.lt.s32.totalorder %s4885_s5, %s4878_s6 }
  0xa6   : > { %p4881_p8 = pnand %p4879_p5, %p5292_p7 }
  0xa7   : > { %4270 = dma.hbm_to_vmem [thread:$0]  (!%p5282_p6), %s6110_s11, 16, %s646_s19, [#allocation15]  }
  0xa8   : > { %p4882_p9 = pneg %p4881_p8  ;;  %p4888_p12 = por %p4887_p11, %p4886_p10 }
  0xaa   : > { %p4889_p1 = pnand %p4888_p12, %p4882_p9 }
  0xac   : > { %4892 = shalt.err (!%p4889_p1)
}
  0xad   : > { %s6111_s13 = sld [smem:[#allocation50_spill]]  ;;  %s4904_s9 = scalar_lea.vmem %s694_s21, 16 }
  0xae   : > { %p4905_p3 = scmp.ne.s32.totalorder %s694_s21, %s4904_s9  ;;  %s4911_s22 = scalar_lea.vmem %s694_s21, 32 }
  0xaf   : > { %p4912_p0 = scmp.lt.s32.totalorder %s694_s21, %s694_s21  ;;  %p4913_p2 = scmp.lt.s32.totalorder %s4911_s22, %s4904_s9 }
  0xb0   : > { %p4907_p4 = pnand %p4905_p3, %p5292_p7 }
  0xb1   : > { %p4914_p5 = por %p4913_p2, %p4912_p0 }
  0xb2   : > { %p4908_p13 = pneg %p4907_p4 }
  0xb3   : > { %4276 = dma.hbm_to_vmem [thread:$0]  (!%p5282_p6), %s6111_s13, 16, %s670_s2, [#allocation18]  }
  0xb4   : > { %p4915_p8 = pnand %p4914_p5, %p4908_p13 }
  0xb6   : > { %4918 = shalt.err (!%p4915_p8)
}
  0xb7   : > { %s6112_s15 = sld [smem:[#allocation52_spill]]  ;;  %s5112_s2 = smov [#allocation25]  }
  0xb8   : > { %s717_s0 = sshll.u32 %s5112_s2, 4  ;;  %s5113_s6 = smov [#allocation26]   ;;  %s718_s0 = int_to_ptr.vmem [resolvable:$true] %s717_s0 }
  0xb9   : > { %s727_s5 = sshll.u32 %s5113_s6, 4  ;;  %s4930_s27 = scalar_lea.vmem %s718_s0, 16  ;;  %s728_s5 = int_to_ptr.vmem [resolvable:$true] %s727_s5 }
  0xba   : > { %p4931_p9 = scmp.ne.s32.totalorder %s718_s0, %s4930_s27  ;;  %s4937_s19 = scalar_lea.vmem %s718_s0, 32 }
  0xbb   : > { %p4938_p12 = scmp.lt.s32.totalorder %s718_s0, %s718_s0  ;;  %p4939_p1 = scmp.lt.s32.totalorder %s4937_s19, %s4930_s27 }
  0xbc   : > { %p4933_p10 = pnand %p4931_p9, %p5292_p7 }
  0xbd   : > { %4282 = dma.hbm_to_vmem [thread:$0]  (!%p5282_p6), %s6112_s15, 16, %s694_s21, [#allocation21]  }
  0xbe   : > { %p4934_p11 = pneg %p4933_p10  ;;  %p4940_p3 = por %p4939_p1, %p4938_p12 }
  0xc0   : > { %p4941_p4 = pnand %p4940_p3, %p4934_p11 }
  0xc2   : > { %4944 = shalt.err (!%p4941_p4)
}
  0xc3   : > { %4288 = dma.hbm_to_vmem [thread:$0]  (!%p5282_p6), %s6067_s17, 16, %s718_s0, [#allocation24]  }
  0xc4   : > { %s4956_s22 = scalar_lea.vmem %s728_s5, 256  ;;  %p4964_p5 = scmp.lt.s32.totalorder %s728_s5, %s728_s5 }
  0xc5   : > { %p4957_p13 = scmp.ne.s32.totalorder %s728_s5, %s4956_s22  ;;  %p4965_p8 = scmp.lt.s32.totalorder %s4956_s22, %s4956_s22 }
  0xc7   : > { %p4959_p0 = pnand %p4957_p13, %p5292_p7  ;;  %p4966_p9 = por %p4965_p8, %p4964_p5 }
  0xc9   : > { %p4960_p2 = pneg %p4959_p0 }
  0xcb   : > { %p4967_p10 = pnand %p4966_p9, %p4960_p2 }
  0xcd   : > { %4970 = shalt.err (!%p4967_p10)
}
  0xce   : > { %s6113_s24 = smov 4   ;;  %s6114_s25 = smov 64  }
  0xcf   : > { %4291 = dma.hbm_to_vmem [thread:$0]  (!%p5282_p6), %s6068_s18, 256, %s728_s5, [#allocation27], %s6114_s25, %s6114_s25, %s6113_s24  }
  0xd0   : > { %s3723_s26 = sadd.s32 4294967294, %s5095_s30   ;;  %s5428_s4 = sadd.s32 1, %s5095_s30  }
  0xd1   : > { %s79_s0 = sadd.s32 1, %s5091_s29  ;;  %s76_s27 = ssub.s32 %s5095_s30, %s5428_s4 }
  0xd2   : > { %p86_p7 = scmp.ne.s32.totalorder %s5091_s29, %s5087_s28  ;;  %p77_p11 = scmp.eq.s32.totalorder %s76_s27, 0 }
  0xd3   : > { %p87_p12 = scmp.eq.s32.totalorder %s5095_s30, 0  ;;  %p92_p1 = scmp.ne.s32.totalorder %s5087_s28, %s5083_s3 }
  0xd4   : > { %p536_p3 = scmp.eq.s32.totalorder %s5266_s23, 1  ;;  %p6115_p13 = scmp.eq.s32.totalorder %s5266_s23, 0 }
  0xd5   : > { %s5440_s19 = scalar_select %p77_p11, %s5091_s29, %s79_s0  }
  0xd6   : > { %p88_p4 = por %p87_p12, %p86_p7  ;;  %p5444_p0 = por %p6115_p13, %p92_p1 }
  0xd7   : > { %p5448_p6 = por %p536_p3, %p86_p7  ;;  %p542_p2 = scmp.eq.s32.totalorder %s3723_s26, 1 }
  0xd8   : > { %s6116_s9 = scalar_select %p5444_p0, 1, 0 }
  0xd9   : > { %s6117_s5 = scalar_select %p5448_p6, 1, 0 }
  0xda   : > { %p4315_p5 = scmp.lt.s32.totalorder %s5095_s30, 2  ;;  %s759_s21 = sand.u32 1, %s5091_s29  }
  0xdb   : > { %p5454_p8 = por %p542_p2, %p92_p1  ;;  %s3741_s24 = sshll.u32 %s759_s21, 5 }
  0xdc   : > { %s3840_s25 = sshll.u32 %s5095_s30, 9  ;;  %s6119_s0 = sld [smem:[#allocation40_spill]] }
  0xdd   : > { %s6118_s22 = scalar_select %p5454_p8, 1, 0 }
  0xde   : > { %s763_s7 = scalar_lea.vmem [#allocation2], %s3741_s24  ;;  %p5464_p9 = pnand %p4315_p5, %p88_p4 }
  0xdf   : > { %s771_s11 = sshll.u32 %s763_s7, 4  ;;  %s5470_s12 = scalar_lea.sflag [#allocation3], %s759_s21  ;;  %s5468_s11 = int_to_ptr.vmem [resolvable:$true] %s771_s11 }
  0xe0   : > { %p4973_p7 = pneg %p5464_p9 }
  0xe2   : > { %s5462_s27 = scalar_lea.hbm %s6119_s0, %s3840_s25  ;;  %s4976_s24 = scalar_lea.hbm %s6119_s0, 1024 }
  0xe3   : > { %s4971_s13 = scalar_lea.hbm %s5462_s27, 512  ;;  %p4977_p1 = scmp.lt.s32.totalorder %s5462_s27, %s6119_s0 }
  0xe4   : > { %p4972_p10 = scmp.ne.s32.totalorder %s5462_s27, %s4971_s13  ;;  %p4978_p3 = scmp.lt.s32.totalorder %s4976_s24, %s4971_s13 }
  0xe6   : > { %p4974_p11 = pnand %p4973_p7, %p4972_p10  ;;  %p4979_p4 = por %p4978_p3, %p4977_p1 }
  0xe8   : > { %p4975_p12 = pneg %p4974_p11 }
  0xea   : > { %p4980_p13 = pnand %p4979_p4, %p4975_p12 }
  0xec   : > { %4983 = shalt.err (!%p4980_p13)
}
  0xed   : > { %s4984_s21 = scalar_lea.vmem %s5468_s11, 512  ;;  %s5114_s14 = smov [#allocation2]  }
  0xee   : > { %p4985_p2 = scmp.ne.s32.totalorder %s5468_s11, %s4984_s21  ;;  %s4989_s15 = sshll.u32 %s5114_s14, 4  ;;  %s4990_s15 = int_to_ptr.vmem [resolvable:$false] %s4989_s15 }
  0xef   : > { %s4991_s25 = scalar_lea.vmem %s4990_s15, 1024  ;;  %p4992_p11 = scmp.lt.s32.totalorder %s5468_s11, %s4990_s15 }
  0xf0   : > { %p4987_p5 = pnand %p4985_p2, %p4973_p7  ;;  %p4993_p8 = scmp.lt.s32.totalorder %s4991_s25, %s4984_s21 }
  0xf2   : > { %p4988_p10 = pneg %p4987_p5  ;;  %p4994_p6 = por %p4993_p8, %p4992_p11 }
  0xf4   : > { %p4995_p0 = pnand %p4994_p6, %p4988_p10 }
  0xf6   : > { %4998 = shalt.err (!%p4995_p0)
}
  0xf7   : > { %s5115_s13 = smov 128   ;;  %s5116_s2 = smov 8  }
  0xf8   : > { %4295 = dma.hbm_to_vmem [thread:$0]  (!%p5464_p9), %s5462_s27, 512, %s5468_s11, %s5470_s12, %s5115_s13, %s5115_s13, %s5116_s2  }
  0xf9   : > { %p6121_p7 = scmp.ne.s32.totalorder %s6098_s1, 0 }
  0xfa   : > { %s5494_s14 = sand.u32 (!%p6121_p7), 1, %s5087_s28   ;;  %p6122_p0 = scmp.ne.s32.totalorder (!%p6121_p7), %s6116_s9, 0 }
  0xfb   : > { %783 = sbr.rel (%p6121_p7) target bundleno = 4295 (0x10c7), region = 108  ;;  %s3746_s15 = sshll.u32 (!%p6121_p7), %s5494_s14, 5 }
  0xfc   : > { %s786_s24 = scalar_lea.sflag (!%p6121_p7), [#allocation3], %s5494_s14  ;;  %s5498_s7 = scalar_lea.vmem (!%p6121_p7), [#allocation2], %s3746_s15 }
 0x100   : > { %5042 = dma.done.wait (%p6122_p0), %s786_s24, 512  }
 0x101   : > { %5044 = vsyncadd (%p6122_p0), %s786_s24, 4294966784  ;;  %p6123_p6 = scmp.eq.s32.totalorder %s5266_s23, 0 }
 0x103   : > { %5046 = dma.done.wait (%p6123_p6), [#allocation6], 32   ;;  %p6124_p8 = pmov %p6123_p6 }
 0x104   : > { %p6125_p9 = pmov %p6123_p6 }
 0x105   : > { %5048 = vsyncadd (%p6124_p8), [#allocation6], 4294967264 }
 0x106   : > { %5050 = dma.done.wait (%p6125_p9), [#allocation9], 32   ;;  %p6126_p12 = pmov %p6123_p6 }
 0x107   : > { %p6127_p1 = pmov %p6123_p6 }
 0x108   : > { %5052 = vsyncadd (%p6126_p12), [#allocation9], 4294967264 }
 0x109   : > { %5054 = dma.done.wait (%p6127_p1), [#allocation12], 32   ;;  %p6128_p3 = pmov %p6127_p1 }
 0x10a   : > { %p6129_p4 = pmov %p6127_p1 }
 0x10b   : > { %5056 = vsyncadd (%p6128_p3), [#allocation12], 4294967264 }
 0x10c   : > { %5058 = dma.done.wait (%p6129_p4), [#allocation15], 32   ;;  %p6130_p13 = pmov %p6127_p1 }
 0x10d   : > { %p6131_p2 = pmov %p6127_p1 }
 0x10e   : > { %5060 = vsyncadd (%p6130_p13), [#allocation15], 4294967264 }
 0x10f   : > { %5062 = dma.done.wait (%p6131_p2), [#allocation18], 272   ;;  %p6132_p5 = pmov %p6127_p1 }
 0x110   : > { %p6133_p10 = pmov %p6127_p1 }
 0x111   : > { %5064 = vsyncadd (%p6132_p5), [#allocation18], 4294967024 }
 0x112   : > { %5066 = dma.done.wait (%p6133_p10), [#allocation21], 272   ;;  %p6134_p11 = pmov %p6127_p1 }
 0x113   : > { %p6135_p7 = pmov %p6127_p1 }
 0x114   : > { %5068 = vsyncadd (%p6134_p11), [#allocation21], 4294967024 }
 0x115   : > { %5070 = dma.done.wait (%p6135_p7), [#allocation24], 272   ;;  %p6136_p0 = pmov %p6127_p1 }
 0x117   : > { %5072 = vsyncadd (%p6136_p0), [#allocation24], 4294967024  ;;  %p6137_p6 = pmov %p6136_p0 }
 0x118   : > { %p6138_p8 = pmov %p6136_p0 }
 0x119   : > { %5074 = dma.done.wait (%p6137_p6), [#allocation27], 256  }
 0x11a   : > { %5076 = vsyncadd (%p6138_p8), [#allocation27], 4294967040  ;;  %s3763_s11 = sshll.u32 %s5266_s23, 1  ;;  %vm936_vm0 = vcmask 261120   ;;  %s6139_s27 = sld [smem:[#allocation39_spill]]  ;;  %v4485_v14 = vld [vmem:[%s6058_s8 + $0x8] sm:$0xff]  }
 0x11b   : > { %p916_p9 = scmp.lt.s32.totalorder %s3763_s11, 3  ;;  %v5117_v15 = vmov 0.0   ;;  %vm5118_vm1 = vmmov 0   ;;  %v4486_v16 = vld [vmem:[%s6058_s8] sm:$0xff]   ;;  %v3767_v35 = vld [vmem:[#allocation14] ss:$0 sm:$0xff] }
 0x11c   : > { %3930 = vmatprep.subr.bf16.mxu1 %v5117_v15  ;;  %3934 = vmatprep.mubr.msk.bf16.mxu1 %vm5118_vm1, %v5117_v15  ;;  %v3765_v25 = vld [vmem:[#allocation5] ss:$0 sm:$0xff]  ;;  %v3766_v29 = vld [vmem:[#allocation7] ss:$0 sm:$0xff]  ;;  %s5119_s2 = smov 112   ;;  %s5120_s15 = smov 120  }
 0x11d   : > { %s6151_s11 = smov (!%p916_p9, %s3763_s11), 3  ;;  %3931 = vmatpush3.bf16.msra.mxu1 %v4485_v14  ;;  %3944 = vmatprep.subr.bf16.mxu0 %v5117_v15  ;;  %s5121_s24 = smov 104   ;;  %vm1081_vm2 = vcmask 64512   ;;  %vm1556_vm3 = vcmask 1043456   ;;  %vm1978_vm5 = vcmask 130048   ;;  %vm1981_vm6 = vcmask 195584  }
 0x11e   : > { %s3764_s12 = sshll.u32 %s6151_s11, 3  ;;  %3932 = vmatprep.subr.bf16.mxu1 %v5117_v15  ;;  %3946 = vmatprep.mubr.msk.bf16.mxu0 %vm5118_vm1, %v5117_v15  ;;  %s5122_s11 = smov 96   ;;  %vm3432_vm7 = vcmask 523264  }
 0x11f   : > { %s5127_s25 = smov 24   ;;  %s6140_s6 = sld [smem:[#allocation53_spill]] }
 0x120   : > { %s919_s26 = scalar_lea.vmem %s6139_s27, %s3764_s12  ;;  %s5123_s12 = smov 64  }
 0x121   : > { %v5540_v0 = vld [vmem:[%s919_s26] sm:$0xff]  ;;  %v5542_v1 = vld [vmem:[%s919_s26 + $0x8] sm:$0xff]  ;;  %3933 = vmatpush3.bf16.msra.mxu1 %v4486_v16  ;;  %s5125_s27 = smov 8   ;;  %s5126_s26 = smov 16  }
 0x122   : > { %v937_v2 = vsel %vm936_vm0, %v5540_v0, 0.0  ;;  %v940_v3 = vsel %vm936_vm0, %v5542_v1, 0.0  ;;  %3938 = vmatprep.subr.bf16.mxu1 %v5117_v15  ;;  %s3762_s13 = sshll.u32 %s5494_s14, 4  ;;  %s6142_s1 = sld [smem:[#allocation55_spill]] }
 0x123   : > { %938 = vadd.xlane.f32.xlu0 %v937_v2  ;;  %p6143_p1 = scmp.ne.s32.totalorder %s6117_s5, 0 }
 0x127   : > { %941 = vadd.xlane.f32.xlu0 %v940_v3 }
 0x1ac   : > { %v939_v4 = vpop.xlane.xlu0 %938 }
 0x1ad   : > { %v944_v5 = vmul.f32 0.03125, %v939_v4 }
 0x1af   : > { %v946_v6 = vsub.f32 %v5540_v0, %v944_v5 }
 0x1b0   : > { %v942_v7 = vpop.xlane.xlu0 %941 }
 0x1b1   : > { %v945_v8 = vmul.f32 0.03125, %v942_v7  ;;  %v948_v9 = vmul.f32 %v946_v6, %v946_v6 }
 0x1b3   : > { %v947_v10 = vsub.f32 %v5542_v1, %v945_v8  ;;  %v950_v11 = vsel %vm936_vm0, %v948_v9, 0.0 }
 0x1b4   : > { %951 = vadd.xlane.f32.xlu1 %v950_v11 }
 0x1b5   : > { %v949_v12 = vmul.f32 %v947_v10, %v947_v10 }
 0x1b7   : > { %v953_v13 = vsel %vm936_vm0, %v949_v12, 0.0 }
 0x1b8   : > { %954 = vadd.xlane.f32.xlu1 %v953_v13 }
 0x23d   : > { %v952_v17 = vpop.xlane.xlu1 %951 }
 0x23e   : > { %v956_v18 = vmul.f32 0.03125, %v952_v17 }
 0x240   : > { %v959_v19 = vadd.f32 1e-12, %v956_v18  ;;  %v930_v18 = vlaneseq }
 0x241   : > { %v955_v20 = vpop.xlane.xlu1 %954 }
 0x242   : > { %4501 = vrsqrt.f32 %v959_v19  ;;  %v957_v21 = vmul.f32 0.03125, %v955_v20  ;;  %v931_v19 = vshrl.u32 %v930_v18, 7  ;;  %v933_v20 = vand.u32 127, %v930_v18 }
 0x244   : > { %v960_v22 = vadd.f32 1e-12, %v957_v21  ;;  %vm934_vm4 = vcmp.le.s32.totalorder %v933_v20, %v931_v19  ;;  %v5124_v21 = vmov -1e+30  }
 0x246   : > { %4503 = vrsqrt.f32 %v960_v22  ;;  %v5644_v22 = vsel %vm934_vm4, 0.0, %v5124_v21 }
 0x24f   : > { %v4502_v23 = vpop.eup %4501 }
 0x250   : > { %v963_v24 = vmul.f32 %v4502_v23, %v946_v6 }
 0x252   : > { %v971_v28 = vmul.f32 %v3765_v25, %v963_v24 }
 0x253   : > { %v4504_v26 = vpop.eup %4503 }
 0x254   : > { %v964_v27 = vmul.f32 %v4504_v26, %v947_v10  ;;  %v980_v31 = vadd.f32 %v3766_v29, %v971_v28 }
 0x256   : > { %v972_v30 = vmul.f32 %v3765_v25, %v964_v27 }
 0x258   : > { %v981_v32 = vadd.f32 %v3766_v29, %v972_v30 }
 0x25a   : > { %v982_v33 = vpack.c.bf16 %v981_v32, %v980_v31 }
 0x25c   : > { %3935 = vmatmul.mubr.msk.bf16.vlgmr.msra.gmra.mxu1 %vm936_vm0, %v982_v33 }
 0x25d   : > { %3940 = vmatprep.mubr.msk.bf16.mxu1 %vm5118_vm1, %v5117_v15 }
 0x31c   : > { %v1043_v34 = vpop.f32.mrf.mxu1 }
 0x31d   : > { %v1044_v38 = vadd.f32 %v3767_v35, %v1043_v34 }
 0x31e   : > { %v3936_v36 = vpop.f32.mrf.mxu1 }
 0x31f   : > { %v1070_v43 = vpack.c.bf16 %v1044_v38, %v1044_v38 }
 0x320   : > { %v1046_v37 = vpop.f32.mrf.mxu1 }
 0x321   : > { %v1047_v39 = vadd.f32 %v3767_v35, %v1046_v37 }
 0x322   : > { %v3937_v40 = vpop.f32.mrf.mxu1 }
 0x323   : > { %v4400_v41 = vpack.i.bf16 %v1047_v39, %v1044_v38  ;;  %v1071_v42 = vpack.c.bf16 %v1047_v39, %v1047_v39 }
 0x325   : > { %4401 = vrot.lane.b32.xlu1 %v4400_v41, %s5119_s2  ;;  %4396 = vrot.lane.b32.xlu0 %v4400_v41, %s5120_s15 }
 0x329   : > { %4406 = vrot.lane.b32.xlu1 %v4400_v41, %s5121_s24  ;;  %1129 = vrot.lane.b32.xlu0 %v1071_v42, %s5122_s11 }
 0x32d   : > { %1079 = vrot.lane.b32.xlu1 %v1070_v43, %s5122_s11 }
 0x397   : > { %v4402_v44 = vpop.permute.xlu1 %4401  ;;  %v4397_v45 = vpop.permute.xlu0 %4396 }
 0x398   : > { %v4399_v46 = vunpack.i.h.bf16 %v4397_v45  ;;  %v4398_v47 = vunpack.i.l.bf16 %v4397_v45  ;;  %v4404_v48 = vunpack.i.h.bf16 %v4402_v44  ;;  %v4403_v49 = vunpack.i.l.bf16 %v4402_v44 }
 0x39a   : > { %v1073_v50 = vpack.c.bf16 %v4399_v46, %v4399_v46  ;;  %v1072_v51 = vpack.c.bf16 %v4398_v47, %v4398_v47  ;;  %v5577_v55 = vpack.c.bf16 %v4404_v48, %v4404_v48  ;;  %v5579_v56 = vpack.c.bf16 %v4403_v49, %v4403_v49 }
 0x39b   : > { %v4407_v52 = vpop.permute.xlu1 %4406  ;;  %v1130_v53 = vpop.permute.xlu0 %1129 }
 0x39c   : > { %1178 = vrot.lane.b32.xlu1 %v1072_v51, %s5122_s11  ;;  %1227 = vrot.lane.b32.xlu0 %v1073_v50, %s5122_s11  ;;  %v1135_v54 = vsel %vm1081_vm2, %v1130_v53, 0  ;;  %v4409_v57 = vunpack.i.h.bf16 %v4407_v52  ;;  %v4408_v58 = vunpack.i.l.bf16 %v4407_v52 }
 0x39d   : > { %3945 = vmatpush3.bf16.xpose.msra.mxu0 %v1135_v54 }
 0x39e   : > { %3956 = vmatprep.subr.bf16.mxu0 %v5117_v15  ;;  %v5587_v61 = vpack.c.bf16 %v4409_v57, %v4409_v57  ;;  %v5589_v62 = vpack.c.bf16 %v4408_v58, %v4408_v58 }
 0x39f   : > { %v1080_v59 = vpop.permute.xlu1 %1079 }
 0x3a0   : > { %v1086_v60 = vsel %vm1081_vm2, %v1080_v59, 0  ;;  %1276 = vrot.lane.b32.xlu1 %v5579_v56, %s5122_s11  ;;  %1325 = vrot.lane.b32.xlu0 %v5577_v55, %s5122_s11 }
 0x3a1   : > { %3939 = vmatpush3.bf16.xpose.msra.mxu1 %v1086_v60 }
 0x3a2   : > { %3950 = vmatprep.subr.bf16.mxu1 %v5117_v15 }
 0x3a4   : > { %1374 = vrot.lane.b32.xlu1 %v5589_v62, %s5122_s11  ;;  %1423 = vrot.lane.b32.xlu0 %v5587_v61, %s5122_s11 }
 0x3a5   : > { %3947 = vmatmul.mubr.msk.bf16.vlgmr.msra.gmra.mxu0 %vm1081_vm2, %v1071_v42 }
 0x3a6   : > { %3958 = vmatprep.mubr.msk.bf16.mxu0 %vm5118_vm1, %v5117_v15 }
 0x3a8   : > { %3941 = vmatmul.mubr.msk.bf16.vlgmr.msra.gmra.mxu1 %vm1081_vm2, %v1070_v43  ;;  %1551 = vrot.lane.b32.xlu1 %v1070_v43, %s5123_s12 }
 0x3a9   : > { %1600 = vrot.lane.b32.xlu0 %v1071_v42, %s5123_s12  ;;  %3952 = vmatprep.mubr.msk.bf16.mxu1 %vm5118_vm1, %v5117_v15 }
 0x3ac   : > { %1648 = vrot.lane.b32.xlu1 %v1072_v51, %s5123_s12 }
 0x3b0   : > { %1696 = vrot.lane.b32.xlu1 %v1073_v50, %s5123_s12 }
 0x40e   : > { %v1179_v63 = vpop.permute.xlu1 %1178  ;;  %v1228_v2 = vpop.permute.xlu0 %1227 }
 0x40f   : > { %v1184_v3 = vsel %vm1081_vm2, %v1179_v63, 0  ;;  %v1233_v4 = vsel %vm1081_vm2, %v1228_v2, 0 }
 0x410   : > { %3951 = vmatpush3.bf16.xpose.msra.mxu1 %v1184_v3  ;;  %3957 = vmatpush3.bf16.xpose.msra.mxu0 %v1233_v4 }
 0x411   : > { %3962 = vmatprep.subr.bf16.mxu1 %v5117_v15  ;;  %3968 = vmatprep.subr.bf16.mxu0 %v5117_v15 }
 0x412   : > { %v1277_v5 = vpop.permute.xlu1 %1276  ;;  %v1326_v6 = vpop.permute.xlu0 %1325 }
 0x413   : > { %v1282_v7 = vsel %vm1081_vm2, %v1277_v5, 0  ;;  %v1331_v8 = vsel %vm1081_vm2, %v1326_v6, 0 }
 0x416   : > { %v1375_v9 = vpop.permute.xlu1 %1374  ;;  %v1424_v10 = vpop.permute.xlu0 %1423 }
 0x417   : > { %3953 = vmatmul.mubr.msk.bf16.vlgmr.msra.gmra.mxu1 %vm1081_vm2, %v1072_v51  ;;  %3959 = vmatmul.mubr.msk.bf16.vlgmr.msra.gmra.mxu0 %vm1081_vm2, %v1073_v50  ;;  %v1380_v11 = vsel %vm1081_vm2, %v1375_v9, 0  ;;  %v1429_v12 = vsel %vm1081_vm2, %v1424_v10, 0 }
 0x418   : > { %3963 = vmatpush3.bf16.xpose.msra.mxu1 %v1282_v7  ;;  %3969 = vmatpush3.bf16.xpose.msra.mxu0 %v1331_v8 }
 0x419   : > { %3964 = vmatprep.mubr.msk.bf16.mxu1 %vm5118_vm1, %v5117_v15  ;;  %3970 = vmatprep.mubr.msk.bf16.mxu0 %vm5118_vm1, %v5117_v15 }
 0x41a   : > { %3974 = vmatprep.subr.bf16.mxu1 %v5117_v15  ;;  %3980 = vmatprep.subr.bf16.mxu0 %v5117_v15  ;;  %v1552_v13 = vpop.permute.xlu1 %1551 }
 0x41b   : > { %v1601_v14 = vpop.permute.xlu0 %1600  ;;  %v1558_v16 = vsel %vm1556_vm3, %v1552_v13, 0 }
 0x41c   : > { %v1606_v17 = vsel %vm1556_vm3, %v1601_v14, 0 }
 0x41e   : > { %v1649_v5 = vpop.permute.xlu1 %1648 }
 0x41f   : > { %3965 = vmatmul.mubr.msk.bf16.vlgmr.msra.gmra.mxu1 %vm1081_vm2, %v5579_v56  ;;  %3971 = vmatmul.mubr.msk.bf16.vlgmr.msra.gmra.mxu0 %vm1081_vm2, %v5577_v55 }
 0x420   : > { %3975 = vmatpush3.bf16.xpose.msra.mxu1 %v1380_v11  ;;  %3981 = vmatpush3.bf16.xpose.msra.mxu0 %v1429_v12 }
 0x421   : > { %3976 = vmatprep.mubr.msk.bf16.mxu1 %vm5118_vm1, %v5117_v15  ;;  %3982 = vmatprep.mubr.msk.bf16.mxu0 %vm5118_vm1, %v5117_v15 }
 0x422   : > { %3986 = vmatprep.subr.bf16.mxu1 %v5117_v15  ;;  %3992 = vmatprep.subr.bf16.mxu0 %v5117_v15  ;;  %v1697_v11 = vpop.permute.xlu1 %1696 }
 0x427   : > { %3977 = vmatmul.mubr.msk.bf16.vlgmr.msra.gmra.mxu1 %vm1081_vm2, %v5589_v62  ;;  %3983 = vmatmul.mubr.msk.bf16.vlgmr.msra.gmra.mxu0 %vm1081_vm2, %v5587_v61 }
 0x428   : > { %3987 = vmatpush3.bf16.msra.mxu1 %v1558_v16  ;;  %3993 = vmatpush3.bf16.msra.mxu0 %v1606_v17 }
 0x429   : > { %3994 = vmatprep.mubr.msk.bf16.mxu0 %vm5118_vm1, %v5117_v15  ;;  %4004 = vmatprep.subr.bf16.mxu0 %v5117_v15 }
 0x42a   : > { %3988 = vmatprep.mubr.msk.bf16.mxu1 %vm5118_vm1, %v5117_v15  ;;  %3998 = vmatprep.subr.bf16.mxu1 %v5117_v15 }
 0x465   : > { %v1171_v23 = vpop.f32.mrf.mxu0 }
 0x466   : > { %v1172_v24 = vadd.f32 %v1171_v23, %v5644_v22  ;;  %v1702_v23 = vsel %vm1556_vm3, %v1697_v11, 0 }
 0x467   : > { %v3948_v25 = vpop.f32.mrf.mxu0 }
 0x468   : > { %v1474_v26 = vsel %vm1081_vm2, %v1172_v24, -inf  ;;  %v1122_v27 = vpop.f32.mrf.mxu1 }
 0x469   : > { %1475 = vmax.xlane.f32.xlu0 %v1474_v26  ;;  %v1123_v28 = vadd.f32 %v1122_v27, %v5644_v22  ;;  %v1174_v29 = vpop.f32.mrf.mxu0 }
 0x46a   : > { %v3942_v30 = vpop.f32.mrf.mxu1 }
 0x46b   : > { %v3949_v31 = vpop.f32.mrf.mxu0  ;;  %v1471_v32 = vsel %vm1081_vm2, %v1123_v28, -inf }
 0x46c   : > { %1472 = vmax.xlane.f32.xlu1 %v1471_v32  ;;  %v1125_v33 = vpop.f32.mrf.mxu1 }
 0x46e   : > { %v3943_v34 = vpop.f32.mrf.mxu1 }
 0x47d   : > { %1744 = vrot.lane.b32.xlu1 %v5579_v56, %s5123_s12 }
 0x4d7   : > { %v1220_v35 = vpop.f32.mrf.mxu1  ;;  %v1269_v36 = vpop.f32.mrf.mxu0 }
 0x4d8   : > { %v5653_v37 = vadd.f32 %v1220_v35, %v5644_v22  ;;  %v5656_v40 = vadd.f32 %v1269_v36, %v5644_v22 }
 0x4d9   : > { %v3954_v38 = vpop.f32.mrf.mxu1  ;;  %v3960_v39 = vpop.f32.mrf.mxu0 }
 0x4da   : > { %v1477_v41 = vsel %vm1081_vm2, %v5653_v37, -inf  ;;  %v1480_v46 = vsel %vm1081_vm2, %v5656_v40, -inf }
 0x4db   : > { %v1272_v42 = vpop.f32.mrf.mxu0  ;;  %1478 = vmax.xlane.f32.xlu0 %v1477_v41  ;;  %v1223_v43 = vpop.f32.mrf.mxu1 }
 0x4dd   : > { %v3955_v44 = vpop.f32.mrf.mxu1  ;;  %v3961_v45 = vpop.f32.mrf.mxu0 }
 0x4df   : > { %v1367_v47 = vpop.f32.mrf.mxu0  ;;  %1481 = vmax.xlane.f32.xlu0 %v1480_v46  ;;  %v1318_v48 = vpop.f32.mrf.mxu1 }
 0x4e0   : > { %v5663_v49 = vadd.f32 %v1367_v47, %v5644_v22  ;;  %v5666_v50 = vadd.f32 %v1318_v48, %v5644_v22 }
 0x4e1   : > { %v3966_v51 = vpop.f32.mrf.mxu1  ;;  %v3972_v52 = vpop.f32.mrf.mxu0 }
 0x4e2   : > { %v1486_v53 = vsel %vm1081_vm2, %v5663_v49, -inf  ;;  %v1483_v54 = vsel %vm1081_vm2, %v5666_v50, -inf }
 0x4e3   : > { %v1370_v56 = vpop.f32.mrf.mxu0  ;;  %1487 = vmax.xlane.f32.xlu0 %v1486_v53  ;;  %1484 = vmax.xlane.f32.xlu1 %v1483_v54  ;;  %v1321_v57 = vpop.f32.mrf.mxu1 }
 0x4e5   : > { %v3967_v58 = vpop.f32.mrf.mxu1  ;;  %v3973_v59 = vpop.f32.mrf.mxu0 }
 0x4e7   : > { %v1416_v60 = vpop.f32.mrf.mxu1  ;;  %v1465_v63 = vpop.f32.mrf.mxu0 }
 0x4e8   : > { %v1417_v2 = vadd.f32 %v1416_v60, %v5644_v22 }
 0x4e9   : > { %v3978_v3 = vpop.f32.mrf.mxu1  ;;  %v3984_v4 = vpop.f32.mrf.mxu0 }
 0x4ea   : > { %v1489_v6 = vsel %vm1081_vm2, %v1417_v2, -inf }
 0x4eb   : > { %v1468_v7 = vpop.f32.mrf.mxu0  ;;  %1490 = vmax.xlane.f32.xlu1 %v1489_v6  ;;  %v1419_v8 = vpop.f32.mrf.mxu1 }
 0x4ed   : > { %v3979_v9 = vpop.f32.mrf.mxu1  ;;  %v3985_v10 = vpop.f32.mrf.mxu0 }
 0x4f2   : > { %v1476_v12 = vpop.xlane.xlu0 %1475 }
 0x4f3   : > { %v1496_v13 = vsub.f32 %v1172_v24, %v1476_v12 }
 0x4f5   : > { %v1505_v14 = vmul.f32 1.442695, %v1496_v13  ;;  %v1473_v16 = vpop.xlane.xlu1 %1472 }
 0x4f6   : > { %v1495_v17 = vsub.f32 %v1123_v28, %v1473_v16 }
 0x4f7   : > { %4505 = vpow2.f32 %v1505_v14 }
 0x4f8   : > { %v1503_v18 = vmul.f32 1.442695, %v1495_v17 }
 0x4f9   : > { %1792 = vrot.lane.b32.xlu0 %v5577_v55, %s5123_s12  ;;  %v1654_v55 = vsel %vm1556_vm3, %v1649_v5, 0  ;;  %v1745_v29 = vpop.permute.xlu1 %1744 }
 0x4fa   : > { %4507 = vpow2.f32 %v1503_v18 }
 0x4fc   : > { %1840 = vrot.lane.b32.xlu1 %v5589_v62, %s5123_s12  ;;  %v5697_v62 = vadd.f32 %v1465_v63, %v5644_v22 }
 0x4fe   : > { %v1492_v25 = vsel %vm1081_vm2, %v5697_v62, -inf }
 0x504   : > { %v5678_v19 = vpop.eup %4505 }
 0x505   : > { %v1544_v20 = vpack.c.bf16 %v5678_v19, %v5678_v19  ;;  %v1522_v10 = vsel %vm1081_vm2, %v5678_v19, 0.0 }
 0x507   : > { %v5682_v21 = vpop.eup %4507  ;;  %3995 = vmatmul.mubr.msk.bf16.vlgmr.msra.gmra.mxu0 %vm1081_vm2, %v1544_v20 }
 0x508   : > { %4005 = vmatpush3.bf16.msra.mxu0 %v1702_v23  ;;  %v1543_v24 = vpack.c.bf16 %v5682_v21, %v5682_v21  ;;  %4006 = vmatprep.mubr.msk.bf16.mxu0 %vm5118_vm1, %v5117_v15  ;;  %v1519_v63 = vsel %vm1081_vm2, %v5682_v21, 0.0 }
 0x509   : > { %4016 = vmatprep.subr.bf16.mxu0 %v5117_v15 }
 0x50a   : > { %3989 = vmatmul.mubr.msk.bf16.vlgmr.msra.gmra.mxu1 %vm1081_vm2, %v1543_v24 }
 0x50b   : > { %3999 = vmatpush3.bf16.msra.mxu1 %v1654_v55  ;;  %4000 = vmatprep.mubr.msk.bf16.mxu1 %vm5118_vm1, %v5117_v15 }
 0x50c   : > { %4010 = vmatprep.subr.bf16.mxu1 %v5117_v15 }
 0x518   : > { %1493 = vmax.xlane.f32.xlu0 %v1492_v25 }
 0x52e   : > { %1888 = vrot.lane.b32.xlu0 %v5587_v61, %s5123_s12 }
 0x564   : > { %v1479_v26 = vpop.xlane.xlu0 %1478 }
 0x565   : > { %v1497_v27 = vsub.f32 %v5653_v37, %v1479_v26 }
 0x567   : > { %v1507_v28 = vmul.f32 1.442695, %v1497_v27 }
 0x568   : > { %v1482_v30 = vpop.xlane.xlu0 %1481 }
 0x569   : > { %4509 = vpow2.f32 %v1507_v28  ;;  %v1498_v31 = vsub.f32 %v5656_v40, %v1482_v30  ;;  %v1750_v40 = vsel %vm1556_vm3, %v1745_v29, 0 }
 0x56b   : > { %v1509_v32 = vmul.f32 1.442695, %v1498_v31 }
 0x56c   : > { %v1488_v33 = vpop.xlane.xlu0 %1487  ;;  %v1485_v22 = vpop.xlane.xlu1 %1484 }
 0x56d   : > { %4511 = vpow2.f32 %v1509_v32  ;;  %v1500_v34 = vsub.f32 %v5663_v49, %v1488_v33  ;;  %v1499_v35 = vsub.f32 %v5666_v50, %v1485_v22  ;;  %v4487_v33 = vld [vmem:[%s6060_s10 + $0x8] sm:$0xff]  }
 0x56f   : > { %v1513_v36 = vmul.f32 1.442695, %v1500_v34  ;;  %v1511_v38 = vmul.f32 1.442695, %v1499_v35 }
 0x570   : > { %v1793_v45 = vpop.permute.xlu0 %1792 }
 0x571   : > { %4513 = vpow2.f32 %v1511_v38  ;;  %v1798_v48 = vsel %vm1556_vm3, %v1793_v45, 0 }
 0x572   : > { %4515 = vpow2.f32 %v1513_v36 }
 0x574   : > { %v1491_v61 = vpop.xlane.xlu1 %1490 }
 0x575   : > { %v1501_v37 = vsub.f32 %v1417_v2, %v1491_v61 }
 0x576   : > { %v4510_v39 = vpop.eup %4509 }
 0x577   : > { %v1515_v41 = vmul.f32 1.442695, %v1501_v37  ;;  %v1525_v42 = vsel %vm1081_vm2, %v4510_v39, 0.0  ;;  %v1545_v43 = vpack.c.bf16 %v4510_v39, %v4510_v39 }
 0x578   : > { %1526 = vadd.xlane.f32.xlu1 %v1525_v42  ;;  %v1841_v50 = vpop.permute.xlu1 %1840 }
 0x579   : > { %4517 = vpow2.f32 %v1515_v41  ;;  %4001 = vmatmul.mubr.msk.bf16.vlgmr.msra.gmra.mxu1 %vm1081_vm2, %v1545_v43  ;;  %v1846_v54 = vsel %vm1556_vm3, %v1841_v50, 0 }
 0x57a   : > { %v4512_v44 = vpop.eup %4511  ;;  %4011 = vmatpush3.bf16.msra.mxu1 %v1750_v40  ;;  %4012 = vmatprep.mubr.msk.bf16.mxu1 %vm5118_vm1, %v5117_v15 }
 0x57b   : > { %v1528_v46 = vsel %vm1081_vm2, %v4512_v44, 0.0  ;;  %v1546_v47 = vpack.c.bf16 %v4512_v44, %v4512_v44  ;;  %4022 = vmatprep.subr.bf16.mxu1 %v5117_v15 }
 0x57c   : > { %1529 = vadd.xlane.f32.xlu0 %v1528_v46 }
 0x57d   : > { %4007 = vmatmul.mubr.msk.bf16.vlgmr.msra.gmra.mxu0 %vm1081_vm2, %v1546_v47 }
 0x57e   : > { %4017 = vmatpush3.bf16.msra.mxu0 %v1798_v48  ;;  %4018 = vmatprep.mubr.msk.bf16.mxu0 %vm5118_vm1, %v5117_v15  ;;  %v4514_v49 = vpop.eup %4513 }
 0x57f   : > { %4028 = vmatprep.subr.bf16.mxu0 %v5117_v15  ;;  %v4516_v51 = vpop.eup %4515  ;;  %v1531_v52 = vsel %vm1081_vm2, %v4514_v49, 0.0  ;;  %v1547_v53 = vpack.c.bf16 %v4514_v49, %v4514_v49 }
 0x580   : > { %1532 = vadd.xlane.f32.xlu0 %v1531_v52  ;;  %v1548_v56 = vpack.c.bf16 %v4516_v51, %v4516_v51  ;;  %v1534_v57 = vsel %vm1081_vm2, %v4516_v51, 0.0 }
 0x581   : > { %4013 = vmatmul.mubr.msk.bf16.vlgmr.msra.gmra.mxu1 %vm1081_vm2, %v1547_v53 }
 0x582   : > { %4023 = vmatpush3.bf16.msra.mxu1 %v1846_v54  ;;  %4024 = vmatprep.mubr.msk.bf16.mxu1 %vm5118_vm1, %v5117_v15  ;;  %v4488_v54 = vld [vmem:[%s6060_s10] sm:$0xff]  }
 0x583   : > { %4034 = vmatprep.subr.bf16.mxu1 %v5117_v15 }
 0x584   : > { %1535 = vadd.xlane.f32.xlu0 %v1534_v57 }
 0x585   : > { %4019 = vmatmul.mubr.msk.bf16.vlgmr.msra.gmra.mxu0 %vm1081_vm2, %v1548_v56 }
 0x586   : > { %v4518_v58 = vpop.eup %4517  ;;  %4030 = vmatprep.mubr.msk.bf16.mxu0 %vm5118_vm1, %v5117_v15 }
 0x587   : > { %v1537_v59 = vsel %vm1081_vm2, %v4518_v58, 0.0  ;;  %v1549_v60 = vpack.c.bf16 %v4518_v58, %v4518_v58 }
 0x588   : > { %1538 = vadd.xlane.f32.xlu1 %v1537_v59 }
 0x589   : > { %4025 = vmatmul.mubr.msk.bf16.vlgmr.msra.gmra.mxu1 %vm1081_vm2, %v1549_v60 }
 0x58a   : > { %4038 = vmatprep.mubr.msk.bf16.mxu1 %vm5118_vm1, %v5117_v15  ;;  %4035 = vmatpush3.bf16.msra.mxu1 %v4487_v33 }
 0x58b   : > { %4036 = vmatprep.subr.bf16.mxu1 %v5117_v15 }
 0x58c   : > { %1520 = vadd.xlane.f32.xlu1 %v1519_v63 }
 0x58e   : > { %4037 = vmatpush3.bf16.msra.mxu1 %v4488_v54 }
 0x5a1   : > { %v1494_v2 = vpop.xlane.xlu0 %1493 }
 0x5a2   : > { %v1502_v3 = vsub.f32 %v5697_v62, %v1494_v2 }
 0x5a4   : > { %v1517_v4 = vmul.f32 1.442695, %v1502_v3 }
 0x5a5   : > { %v1889_v5 = vpop.permute.xlu0 %1888 }
 0x5a6   : > { %4519 = vpow2.f32 %v1517_v4  ;;  %v1894_v6 = vsel %vm1556_vm3, %v1889_v5, 0 }
 0x5a7   : > { %4029 = vmatpush3.bf16.msra.mxu0 %v1894_v6 }
 0x5a8   : > { %4042 = vmatprep.subr.bf16.mxu0 %v5117_v15 }
 0x5b3   : > { %v4520_v7 = vpop.eup %4519 }
 0x5b4   : > { %v1540_v8 = vsel %vm1081_vm2, %v4520_v7, 0.0  ;;  %v1550_v9 = vpack.c.bf16 %v4520_v7, %v4520_v7 }
 0x5b5   : > { %1541 = vadd.xlane.f32.xlu0 %v1540_v8 }
 0x5b6   : > { %4031 = vmatmul.mubr.msk.bf16.vlgmr.msra.gmra.mxu0 %vm1081_vm2, %v1550_v9 }
 0x5b7   : > { %4046 = vmatprep.mubr.msk.bf16.mxu0 %vm5118_vm1, %v5117_v15 }
 0x5b9   : > { %1523 = vadd.xlane.f32.xlu0 %v1522_v10 }
 0x5c7   : > { %v5744_v11 = vpop.f32.mrf.mxu0 }
 0x5c9   : > { %v3996_v12 = vpop.f32.mrf.mxu0 }
 0x5ca   : > { %v5746_v13 = vpop.f32.mrf.mxu1 }
 0x5cb   : > { %v1645_v14 = vpop.f32.mrf.mxu0 }
 0x5cc   : > { %v3990_v16 = vpop.f32.mrf.mxu1 }
 0x5cd   : > { %v3997_v17 = vpop.f32.mrf.mxu0 }
 0x5ce   : > { %v1597_v18 = vpop.f32.mrf.mxu1 }
 0x5d0   : > { %v3991_v20 = vpop.f32.mrf.mxu1 }
 0x601   : > { %v1527_v23 = vpop.xlane.xlu1 %1526 }
 0x602   : > { %4521 = vrcp.f32 %v1527_v23 }
 0x605   : > { %v1530_v21 = vpop.xlane.xlu0 %1529 }
 0x606   : > { %4523 = vrcp.f32 %v1530_v21 }
 0x609   : > { %v1533_v24 = vpop.xlane.xlu0 %1532 }
 0x60a   : > { %4525 = vrcp.f32 %v1533_v24 }
 0x60d   : > { %v1536_v55 = vpop.xlane.xlu0 %1535 }
 0x60e   : > { %4527 = vrcp.f32 %v1536_v55 }
 0x60f   : > { %v4522_v25 = vpop.eup %4521 }
 0x611   : > { %v1539_v52 = vpop.xlane.xlu1 %1538 }
 0x612   : > { %4529 = vrcp.f32 %v1539_v52  ;;  %v4491_v52 = vld [vmem:[#allocation17 + $0x8] sm:$0xff]  }
 0x613   : > { %v4524_v26 = vpop.eup %4523  ;;  %4043 = vmatpush3.bf16.msra.mxu0 %v4491_v52 }
 0x614   : > { %4044 = vmatprep.subr.bf16.mxu0 %v5117_v15 }
 0x615   : > { %v1521_v5 = vpop.xlane.xlu1 %1520 }
 0x617   : > { %v4526_v38 = vpop.eup %4525 }
 0x61b   : > { %v4528_v37 = vpop.eup %4527 }
 0x61f   : > { %v4530_v56 = vpop.eup %4529 }
 0x639   : > { %v1690_v19 = vpop.f32.mrf.mxu1 }
 0x63a   : > { %v1946_v29 = vmul.f32 %v4522_v25, %v1690_v19 }
 0x63b   : > { %v4002_v62 = vpop.f32.mrf.mxu1 }
 0x63d   : > { %v1693_v27 = vpop.f32.mrf.mxu1  ;;  %v1738_v28 = vpop.f32.mrf.mxu0 }
 0x63e   : > { %v1947_v30 = vmul.f32 %v4524_v26, %v1738_v28  ;;  %v1542_v53 = vpop.xlane.xlu0 %1541 }
 0x63f   : > { %v4003_v31 = vpop.f32.mrf.mxu1  ;;  %v4008_v32 = vpop.f32.mrf.mxu0  ;;  %4531 = vrcp.f32 %v1542_v53  ;;  %v4492_v53 = vld [vmem:[#allocation17] sm:$0xff]  }
 0x640   : > { %v4410_v22 = vpack.i.bf16 %v1947_v30, %v1946_v29  ;;  %4533 = vrcp.f32 %v1521_v5  ;;  %4045 = vmatpush3.bf16.msra.mxu0 %v4492_v53 }
 0x641   : > { %v1741_v34 = vpop.f32.mrf.mxu0  ;;  %v1786_v35 = vpop.f32.mrf.mxu1  ;;  %4058 = vmatprep.subr.bf16.mxu0 %v5117_v15 }
 0x642   : > { %4411 = vrot.lane.b32.xlu1 %v4410_v22, %s5125_s27  ;;  %v1948_v41 = vmul.f32 %v4526_v38, %v1786_v35  ;;  %v1524_v6 = vpop.xlane.xlu0 %1523  ;;  %v4489_v38 = vld [vmem:[#allocation20 + $0x8] sm:$0xff]  }
 0x643   : > { %v4009_v36 = vpop.f32.mrf.mxu0  ;;  %v4014_v61 = vpop.f32.mrf.mxu1  ;;  %4535 = vrcp.f32 %v1524_v6  ;;  %4050 = vmatprep.subr.bf16.mxu1 %v4489_v38 }
 0x645   : > { %v1834_v39 = vpop.f32.mrf.mxu0  ;;  %v1789_v42 = vpop.f32.mrf.mxu1 }
 0x646   : > { %v1949_v43 = vmul.f32 %v4528_v37, %v1834_v39 }
 0x647   : > { %v4020_v40 = vpop.f32.mrf.mxu0  ;;  %v4015_v45 = vpop.f32.mrf.mxu1 }
 0x648   : > { %v4415_v44 = vpack.i.bf16 %v1949_v43, %v1948_v41  ;;  %v4490_v45 = vld [vmem:[#allocation20] sm:$0xff]  }
 0x649   : > { %v1837_v46 = vpop.f32.mrf.mxu0  ;;  %v1882_v47 = vpop.f32.mrf.mxu1 }
 0x64a   : > { %4416 = vrot.lane.b32.xlu0 %v4415_v44, %s5126_s26  ;;  %v1950_v59 = vmul.f32 %v4530_v56, %v1882_v47  ;;  %v926_v46 = vld [vmem:[%s5498_s7] sm:$0xff]  ;;  %v927_v47 = vld [vmem:[%s5498_s7 + $0x8] sm:$0xff] }
 0x64b   : > { %v4021_v48 = vpop.f32.mrf.mxu0  ;;  %v4026_v49 = vpop.f32.mrf.mxu1 }
 0x64c   : > { %v4532_v57 = vpop.eup %4531  ;;  %v2166_v48 = vpack.c.bf16 %v927_v47, %v926_v46  ;;  %v928_v49 = vld [vmem:[%s5498_s7 + $0x10] sm:$0xff] }
 0x64d   : > { %v1885_v50 = vpop.f32.mrf.mxu1  ;;  %v4534_v8 = vpop.eup %4533 }
 0x64e   : > { %v1944_v18 = vmul.f32 %v4534_v8, %v5746_v13  ;;  %v929_v50 = vld [vmem:[%s5498_s7 + $0x18] sm:$0xff]  ;;  %s6141_s7 = sld [smem:[#allocation54_spill]] }
 0x64f   : > { %v4027_v51 = vpop.f32.mrf.mxu1 }
 0x650   : > { %v4536_v10 = vpop.eup %4535  ;;  %v2167_v51 = vpack.c.bf16 %v929_v50, %v928_v49 }
 0x651   : > { %v1945_v20 = vmul.f32 %v4536_v10, %v5744_v11  ;;  %v3787_v11 = vld [vmem:[#allocation16] ss:$0 sm:$0xff] }
 0x676   : > { %v1930_v58 = vpop.f32.mrf.mxu0 }
 0x677   : > { %v1951_v60 = vmul.f32 %v4532_v57, %v1930_v58 }
 0x678   : > { %v4032_v63 = vpop.f32.mrf.mxu0 }
 0x679   : > { %v4420_v2 = vpack.i.bf16 %v1951_v60, %v1950_v59 }
 0x67a   : > { %v1933_v3 = vpop.f32.mrf.mxu0 }
 0x67b   : > { %4421 = vrot.lane.b32.xlu1 %v4420_v2, %s5127_s25  ;;  %v3791_v3 = vld [vmem:[#allocation8] ss:$0 sm:$0xff] }
 0x67c   : > { %v4033_v4 = vpop.f32.mrf.mxu0 }
 0x6b4   : > { %v4412_v7 = vpop.permute.xlu1 %4411 }
 0x6b5   : > { %v4414_v12 = vunpack.i.h.bf16 %v4412_v7  ;;  %v4413_v14 = vunpack.i.l.bf16 %v4412_v7  ;;  %v3792_v7 = vld [vmem:[#allocation10] ss:$0 sm:$0xff] }
 0x6b7   : > { %v1977_v23 = vsel %vm1081_vm2, %v1945_v20, %v4414_v12  ;;  %v1976_v24 = vsel %vm1081_vm2, %v1944_v18, %v4413_v14 }
 0x6bc   : > { %v4417_v9 = vpop.permute.xlu0 %4416 }
 0x6bd   : > { %v4419_v16 = vunpack.i.h.bf16 %v4417_v9  ;;  %v4418_v17 = vunpack.i.l.bf16 %v4417_v9 }
 0x6bf   : > { %v1980_v62 = vsel %vm1978_vm5, %v1977_v23, %v4419_v16  ;;  %v1979_v25 = vsel %vm1978_vm5, %v1976_v24, %v4418_v17  ;;  %v3797_v16 = vld [vmem:[#allocation22] ss:$0 sm:$0xff] }
 0x6ed   : > { %v4422_v21 = vpop.permute.xlu1 %4421 }
 0x6ee   : > { %v4424_v55 = vunpack.i.h.bf16 %v4422_v21  ;;  %v4423_v19 = vunpack.i.l.bf16 %v4422_v21 }
 0x6f0   : > { %v1983_v26 = vsel %vm1981_vm6, %v1980_v62, %v4424_v55  ;;  %v1982_v27 = vsel %vm1981_vm6, %v1979_v25, %v4423_v19 }
 0x6f1   : > { %v1984_v13 = vpack.c.bf16 %v1983_v26, %v1982_v27 }
 0x6f3   : > { %4039 = vmatmul.mubr.msk.bf16.vlgmr.msra.gmra.mxu1 %vm936_vm0, %v1984_v13 }
 0x6f4   : > { %4051 = vmatpush3.bf16.msra.mxu1 %v4489_v38  ;;  %4054 = vmatprep.mubr.msk.bf16.mxu1 %vm936_vm0, %v2166_v48 }
 0x6f5   : > { %4052 = vmatprep.subr.bf16.mxu1 %v4490_v45 }
 0x6f8   : > { %4053 = vmatpush3.bf16.msra.mxu1 %v4490_v45 }
 0x6f9   : > { %4064 = vmatprep.subr.bf16.mxu1 %v5117_v15 }
 0x6fb   : > { %4055 = vmatmul.mubr.msk.bf16.vlgmr.msra.gmra.mxu1 %vm936_vm0, %v2167_v51 }
 0x6fc   : > { %4066 = vmatprep.mubr.msk.bf16.mxu1 %vm5118_vm1, %v5117_v15 }
 0x7b3   : > { %v2045_v28 = vpop.f32.mrf.mxu1 }
 0x7b4   : > { %v2046_v29 = vadd.f32 %v3787_v11, %v2045_v28 }
 0x7b5   : > { %v4040_v30 = vpop.f32.mrf.mxu1 }
 0x7b6   : > { %v5768_v31 = vadd.f32 %v2046_v29, %v5540_v0  ;;  %v3793_v30 = vld [vmem:[#allocation19] ss:$0 sm:$0xff] }
 0x7b7   : > { %v2048_v32 = vpop.f32.mrf.mxu1 }
 0x7b8   : > { %v2049_v33 = vadd.f32 %v3787_v11, %v2048_v32  ;;  %v2054_v22 = vsel %vm936_vm0, %v5768_v31, 0.0 }
 0x7b9   : > { %2055 = vadd.xlane.f32.xlu1 %v2054_v22  ;;  %v4041_v34 = vpop.f32.mrf.mxu1 }
 0x7ba   : > { %v5773_v35 = vadd.f32 %v2049_v33, %v5542_v1 }
 0x7bb   : > { %v4056_v14 = vpop.f32.mrf.mxu1 }
 0x7bc   : > { %v2057_v36 = vsel %vm936_vm0, %v5773_v35, 0.0  ;;  %v2240_v18 = vadd.f32 %v4056_v14, %v3797_v16 }
 0x7bd   : > { %2058 = vadd.xlane.f32.xlu0 %v2057_v36  ;;  %v2231_v17 = vpop.f32.mrf.mxu1 }
 0x7be   : > { %v2232_v21 = vadd.f32 %v3797_v16, %v2231_v17 }
 0x7bf   : > { %v4057_v20 = vpop.f32.mrf.mxu1 }
 0x7c0   : > { %v2243_v23 = vadd.f32 %v4057_v20, %v3797_v16 }
 0x7c1   : > { %v2234_v24 = vpop.f32.mrf.mxu1 }
 0x7c2   : > { %v2235_v55 = vadd.f32 %v3797_v16, %v2234_v24  ;;  %v4430_v19 = vpack.i.bf16 %v2243_v23, %v2240_v18  ;;  %v2315_v62 = vpack.c.bf16 %v2243_v23, %v2240_v18 }
 0x7c4   : > { %v4425_v25 = vpack.i.bf16 %v2235_v55, %v2232_v21  ;;  %v2314_v26 = vpack.c.bf16 %v2235_v55, %v2232_v21  ;;  %v2372_v27 = vsel %vm1081_vm2, %v2315_v62, 0 }
 0x7c5   : > { %4065 = vmatpush3.bf16.xpose.msra.mxu1 %v2372_v27 }
 0x7c6   : > { %v2326_v13 = vsel %vm1081_vm2, %v2314_v26, 0  ;;  %4076 = vmatprep.subr.bf16.mxu1 %v5117_v15 }
 0x842   : > { %v2056_v0 = vpop.xlane.xlu1 %2055 }
 0x843   : > { %v2060_v61 = vmul.f32 0.03125, %v2056_v0 }
 0x845   : > { %v2062_v37 = vsub.f32 %v5768_v31, %v2060_v61 }
 0x846   : > { %v2059_v39 = vpop.xlane.xlu0 %2058 }
 0x847   : > { %v2061_v41 = vmul.f32 0.03125, %v2059_v39  ;;  %v2064_v42 = vmul.f32 %v2062_v37, %v2062_v37 }
 0x849   : > { %v2063_v1 = vsub.f32 %v5773_v35, %v2061_v41  ;;  %v2066_v43 = vsel %vm936_vm0, %v2064_v42, 0.0 }
 0x84a   : > { %2067 = vadd.xlane.f32.xlu0 %v2066_v43 }
 0x84b   : > { %v2065_v40 = vmul.f32 %v2063_v1, %v2063_v1 }
 0x84d   : > { %v2069_v44 = vsel %vm936_vm0, %v2065_v40, 0.0 }
 0x84e   : > { %2070 = vadd.xlane.f32.xlu1 %v2069_v44 }
 0x85f   : > { %4431 = vrot.lane.b32.xlu1 %v4430_v19, %s5120_s15 }
 0x860   : > { %4426 = vrot.lane.b32.xlu0 %v4425_v25, %s5120_s15 }
 0x863   : > { %4436 = vrot.lane.b32.xlu1 %v4425_v25, %s5119_s2 }
 0x864   : > { %4441 = vrot.lane.b32.xlu0 %v4430_v19, %s5119_s2 }
 0x868   : > { %4446 = vrot.lane.b32.xlu0 %v4425_v25, %s5121_s24 }
 0x8d3   : > { %v2068_v54 = vpop.xlane.xlu0 %2067 }
 0x8d4   : > { %v2072_v56 = vmul.f32 0.03125, %v2068_v54 }
 0x8d6   : > { %v2075_v57 = vadd.f32 1e-12, %v2072_v56 }
 0x8d7   : > { %v2071_v58 = vpop.xlane.xlu1 %2070  ;;  %v4427_v11 = vpop.permute.xlu0 %4426 }
 0x8d8   : > { %4537 = vrsqrt.f32 %v2075_v57  ;;  %v2073_v59 = vmul.f32 0.03125, %v2071_v58  ;;  %v4429_v28 = vunpack.i.h.bf16 %v4427_v11  ;;  %v4428_v29 = vunpack.i.l.bf16 %v4427_v11 }
 0x8da   : > { %v2076_v60 = vadd.f32 1e-12, %v2073_v59  ;;  %v2316_v38 = vpack.c.bf16 %v4429_v28, %v4428_v29 }
 0x8db   : > { %v4432_v32 = vpop.permute.xlu1 %4431  ;;  %v4442_v46 = vpop.permute.xlu0 %4441 }
 0x8dc   : > { %4539 = vrsqrt.f32 %v2076_v60  ;;  %v4434_v33 = vunpack.i.h.bf16 %v4432_v32  ;;  %v4433_v22 = vunpack.i.l.bf16 %v4432_v32  ;;  %v2418_v39 = vsel %vm1081_vm2, %v2316_v38, 0 }
 0x8dd   : > { %v4444_v47 = vunpack.i.h.bf16 %v4442_v46  ;;  %v4443_v48 = vunpack.i.l.bf16 %v4442_v46 }
 0x8df   : > { %v4437_v45 = vpop.permute.xlu1 %4436  ;;  %v5822_v52 = vpack.c.bf16 %v4444_v47, %v4443_v48  ;;  %v4447_v57 = vpop.permute.xlu0 %4446 }
 0x8e0   : > { %v4439_v49 = vunpack.i.h.bf16 %v4437_v45  ;;  %v4438_v50 = vunpack.i.l.bf16 %v4437_v45 }
 0x8e2   : > { %v5824_v53 = vpack.c.bf16 %v4439_v49, %v4438_v50 }
 0x8e5   : > { %v4538_v63 = vpop.eup %4537 }
 0x8e6   : > { %v2079_v2 = vmul.f32 %v4538_v63, %v2062_v37  ;;  %v2317_v37 = vpack.c.bf16 %v4434_v33, %v4433_v22  ;;  %v4449_v63 = vunpack.i.h.bf16 %v4447_v57 }
 0x8e8   : > { %v2087_v6 = vmul.f32 %v3791_v3, %v2079_v2  ;;  %v2464_v44 = vsel %vm1081_vm2, %v2317_v37, 0  ;;  %v4448_v2 = vunpack.i.l.bf16 %v4447_v57 }
 0x8e9   : > { %v4540_v4 = vpop.eup %4539 }
 0x8ea   : > { %v2080_v5 = vmul.f32 %v4540_v4, %v2063_v1  ;;  %v2096_v9 = vadd.f32 %v3792_v7, %v2087_v6  ;;  %v2556_v4 = vsel %vm1081_vm2, %v5822_v52, 0 }
 0x8ec   : > { %v2088_v8 = vmul.f32 %v3791_v3, %v2080_v5  ;;  %v2510_v3 = vsel %vm1081_vm2, %v5824_v53, 0 }
 0x8ee   : > { %v2097_v10 = vadd.f32 %v3792_v7, %v2088_v8  ;;  %v5838_v8 = vpack.c.bf16 %v4449_v63, %v4448_v2 }
 0x8f0   : > { %v2098_v12 = vpack.c.bf16 %v2097_v10, %v2096_v9  ;;  %v2602_v18 = vsel %vm1081_vm2, %v5838_v8, 0 }
 0x8f2   : > { %4047 = vmatmul.mubr.msk.bf16.vlgmr.msra.gmra.mxu0 %vm936_vm0, %v2098_v12 }
 0x8f3   : > { %4060 = vmatprep.mubr.msk.bf16.mxu0 %vm5118_vm1, %v5117_v15  ;;  %4059 = vmatpush3.bf16.xpose.msra.mxu0 %v2326_v13 }
 0x8f4   : > { %4070 = vmatprep.subr.bf16.mxu0 %v5117_v15 }
 0x9b2   : > { %v2159_v34 = vpop.f32.mrf.mxu0 }
 0x9b3   : > { %v2160_v36 = vadd.f32 %v3793_v30, %v2159_v34 }
 0x9b4   : > { %v4048_v0 = vpop.f32.mrf.mxu0 }
 0x9b5   : > { %v2266_v61 = vpack.c.bf16 %v2160_v36, %v2160_v36 }
 0x9b6   : > { %v2162_v41 = vpop.f32.mrf.mxu0 }
 0x9b7   : > { %v2163_v42 = vadd.f32 %v3793_v30, %v2162_v41  ;;  %4061 = vmatmul.mubr.msk.bf16.vlgmr.msra.gmra.mxu0 %vm1081_vm2, %v2266_v61 }
 0x9b8   : > { %v4049_v1 = vpop.f32.mrf.mxu0  ;;  %4071 = vmatpush3.bf16.xpose.msra.mxu0 %v2418_v39  ;;  %4072 = vmatprep.mubr.msk.bf16.mxu0 %vm5118_vm1, %v5117_v15 }
 0x9b9   : > { %v2267_v43 = vpack.c.bf16 %v2163_v42, %v2163_v42  ;;  %v4450_v40 = vpack.i.bf16 %v2163_v42, %v2160_v36  ;;  %4082 = vmatprep.subr.bf16.mxu0 %v5117_v15 }
 0x9bb   : > { %4067 = vmatmul.mubr.msk.bf16.vlgmr.msra.gmra.mxu1 %vm1081_vm2, %v2267_v43  ;;  %4451 = vrot.lane.b32.xlu1 %v4450_v40, %s5120_s15  ;;  %s914_s15 = scalar_lea.vmem [#allocation28], %s3762_s13 }
 0x9bc   : > { %4466 = vrot.lane.b32.xlu0 %v4450_v40, %s5121_s24  ;;  %4077 = vmatpush3.bf16.xpose.msra.mxu1 %v2464_v44 }
 0x9bd   : > { %4078 = vmatprep.mubr.msk.bf16.mxu1 %vm5118_vm1, %v5117_v15  ;;  %4088 = vmatprep.subr.bf16.mxu1 %v5117_v15 }
 0x9bf   : > { %4456 = vrot.lane.b32.xlu1 %v4450_v40, %s5119_s2  ;;  %s3841_s2 = sshll.u32 %s5266_s23, 8  ;;  %s3482_s23 = scalar_lea.sflag [#allocation4], %s5494_s14 }
 0x9c0   : > { %2818 = vrot.lane.b32.xlu0 %v2315_v62, %s5122_s11  ;;  %s6002_s9 = scalar_lea.hbm %s6142_s1, %s3841_s2 }
 0x9c3   : > { %4461 = vrot.lane.b32.xlu1 %v4430_v19, %s5121_s24  ;;  %s3495_s24 = sshll.u32 %s914_s15, 4  ;;  %s6005_s24 = int_to_ptr.vmem [resolvable:$true] %s3495_s24 }
 0x9c7   : > { %2771 = vrot.lane.b32.xlu1 %v2314_v26, %s5122_s11 }
 0x9cb   : > { %2865 = vrot.lane.b32.xlu1 %v2316_v38, %s5122_s11 }
 0x9cf   : > { %2912 = vrot.lane.b32.xlu1 %v2317_v37, %s5122_s11 }
 0xa2d   : > { %v4452_v51 = vpop.permute.xlu1 %4451 }
 0xa2e   : > { %v4454_v54 = vunpack.i.h.bf16 %v4452_v51  ;;  %v4453_v56 = vunpack.i.l.bf16 %v4452_v51  ;;  %v4467_v17 = vpop.permute.xlu0 %4466 }
 0xa2f   : > { %v4469_v21 = vunpack.i.h.bf16 %v4467_v17  ;;  %v4468_v23 = vunpack.i.l.bf16 %v4467_v17 }
 0xa30   : > { %v2269_v58 = vpack.c.bf16 %v4454_v54, %v4454_v54  ;;  %v2268_v59 = vpack.c.bf16 %v4453_v56, %v4453_v56 }
 0xa31   : > { %v4457_v60 = vpop.permute.xlu1 %4456  ;;  %v2273_v24 = vpack.c.bf16 %v4469_v21, %v4469_v21  ;;  %v2272_v55 = vpack.c.bf16 %v4468_v23, %v4468_v23 }
 0xa32   : > { %4073 = vmatmul.mubr.msk.bf16.vlgmr.msra.gmra.mxu0 %vm1081_vm2, %v2268_v59  ;;  %4079 = vmatmul.mubr.msk.bf16.vlgmr.msra.gmra.mxu1 %vm1081_vm2, %v2269_v58  ;;  %v4459_v5 = vunpack.i.h.bf16 %v4457_v60  ;;  %v4458_v6 = vunpack.i.l.bf16 %v4457_v60  ;;  %v2819_v19 = vpop.permute.xlu0 %2818 }
 0xa33   : > { %4083 = vmatpush3.bf16.xpose.msra.mxu0 %v2510_v3  ;;  %4089 = vmatpush3.bf16.xpose.msra.mxu1 %v2556_v4 }
 0xa34   : > { %4090 = vmatprep.mubr.msk.bf16.mxu1 %vm5118_vm1, %v5117_v15  ;;  %4084 = vmatprep.mubr.msk.bf16.mxu0 %vm5118_vm1, %v5117_v15  ;;  %v2271_v12 = vpack.c.bf16 %v4459_v5, %v4459_v5  ;;  %v2270_v14 = vpack.c.bf16 %v4458_v6, %v4458_v6 }
 0xa35   : > { %v4462_v7 = vpop.permute.xlu1 %4461  ;;  %4094 = vmatprep.subr.bf16.mxu0 %v5117_v15  ;;  %4100 = vmatprep.subr.bf16.mxu1 %v5117_v15 }
 0xa36   : > { %v4464_v9 = vunpack.i.h.bf16 %v4462_v7  ;;  %v4463_v10 = vunpack.i.l.bf16 %v4462_v7 }
 0xa38   : > { %v5840_v16 = vpack.c.bf16 %v4464_v9, %v4463_v10 }
 0xa39   : > { %v2772_v62 = vpop.permute.xlu1 %2771 }
 0xa3a   : > { %4085 = vmatmul.mubr.msk.bf16.vlgmr.msra.gmra.mxu0 %vm1081_vm2, %v2270_v14  ;;  %4091 = vmatmul.mubr.msk.bf16.vlgmr.msra.gmra.mxu1 %vm1081_vm2, %v2271_v12  ;;  %v2648_v20 = vsel %vm1081_vm2, %v5840_v16, 0 }
 0xa3b   : > { %4095 = vmatpush3.bf16.xpose.msra.mxu0 %v2602_v18  ;;  %4101 = vmatpush3.bf16.xpose.msra.mxu1 %v2648_v20 }
 0xa3c   : > { %4096 = vmatprep.mubr.msk.bf16.mxu0 %vm5118_vm1, %v5117_v15  ;;  %4102 = vmatprep.mubr.msk.bf16.mxu1 %vm5118_vm1, %v5117_v15 }
 0xa3d   : > { %4106 = vmatprep.subr.bf16.mxu0 %v5117_v15  ;;  %4112 = vmatprep.subr.bf16.mxu1 %v5117_v15  ;;  %v2866_v39 = vpop.permute.xlu1 %2865 }
 0xa41   : > { %v2913_v48 = vpop.permute.xlu1 %2912 }
 0xa42   : > { %4097 = vmatmul.mubr.msk.bf16.vlgmr.msra.gmra.mxu0 %vm1081_vm2, %v2272_v55  ;;  %4103 = vmatmul.mubr.msk.bf16.vlgmr.msra.gmra.mxu1 %vm1081_vm2, %v2273_v24 }
 0xa43   : > { %4107 = vmatpush3.bf16.msra.mxu0 %v2772_v62  ;;  %4113 = vmatpush3.bf16.msra.mxu1 %v2819_v19 }
 0xa44   : > { %4108 = vmatprep.mubr.msk.bf16.mxu0 %vm5118_vm1, %v5117_v15  ;;  %4118 = vmatprep.subr.bf16.mxu0 %v5117_v15 }
 0xa45   : > { %4114 = vmatprep.mubr.msk.bf16.mxu1 %vm5118_vm1, %v5117_v15  ;;  %4124 = vmatprep.subr.bf16.mxu1 %v5117_v15 }
 0xa77   : > { %v2362_v25 = vpop.f32.mrf.mxu0 }
 0xa78   : > { %v2690_v26 = vsel %vm1978_vm5, %v2362_v25, -inf }
 0xa79   : > { %2691 = vmax.xlane.f32.xlu1 %v2690_v26  ;;  %v4062_v27 = vpop.f32.mrf.mxu0 }
 0xa7b   : > { %v2365_v13 = vpop.f32.mrf.mxu0  ;;  %v2408_v11 = vpop.f32.mrf.mxu1 }
 0xa7c   : > { %v2693_v28 = vsel %vm1978_vm5, %v2408_v11, -inf }
 0xa7d   : > { %v4068_v29 = vpop.f32.mrf.mxu1  ;;  %2694 = vmax.xlane.f32.xlu0 %v2693_v28  ;;  %v4063_v30 = vpop.f32.mrf.mxu0 }
 0xa7f   : > { %v2411_v32 = vpop.f32.mrf.mxu1 }
 0xa81   : > { %v4069_v33 = vpop.f32.mrf.mxu1 }
 0xa8a   : > { %2959 = vrot.lane.b32.xlu1 %v5824_v53, %s5122_s11 }
 0xaf2   : > { %v5866_v22 = vpop.f32.mrf.mxu0  ;;  %v5868_v34 = vpop.f32.mrf.mxu1 }
 0xaf3   : > { %v2696_v36 = vsel %vm1978_vm5, %v5866_v22, -inf  ;;  %v2699_v41 = vsel %vm1978_vm5, %v5868_v34, -inf }
 0xaf4   : > { %v4080_v38 = vpop.f32.mrf.mxu1  ;;  %2697 = vmax.xlane.f32.xlu0 %v2696_v36  ;;  %v4074_v0 = vpop.f32.mrf.mxu0 }
 0xaf6   : > { %v2457_v61 = vpop.f32.mrf.mxu0  ;;  %v2503_v37 = vpop.f32.mrf.mxu1 }
 0xaf8   : > { %v4081_v42 = vpop.f32.mrf.mxu1  ;;  %2700 = vmax.xlane.f32.xlu0 %v2699_v41  ;;  %v4075_v1 = vpop.f32.mrf.mxu0 }
 0xafa   : > { %v2546_v43 = vpop.f32.mrf.mxu0  ;;  %v2592_v40 = vpop.f32.mrf.mxu1 }
 0xafb   : > { %v2705_v44 = vsel %vm1978_vm5, %v2592_v40, -inf  ;;  %v2702_v45 = vsel %vm1978_vm5, %v2546_v43, -inf }
 0xafc   : > { %v4092_v46 = vpop.f32.mrf.mxu1  ;;  %2706 = vmax.xlane.f32.xlu0 %v2705_v44  ;;  %2703 = vmax.xlane.f32.xlu1 %v2702_v45  ;;  %v4086_v47 = vpop.f32.mrf.mxu0 }
 0xafe   : > { %v2549_v49 = vpop.f32.mrf.mxu0  ;;  %v2595_v50 = vpop.f32.mrf.mxu1 }
 0xb00   : > { %v4087_v51 = vpop.f32.mrf.mxu0  ;;  %v4093_v53 = vpop.f32.mrf.mxu1 }
 0xb02   : > { %v5876_v54 = vpop.f32.mrf.mxu1  ;;  %v2692_v56 = vpop.xlane.xlu1 %2691 }
 0xb03   : > { %v2714_v57 = vsub.f32 %v2362_v25, %v2692_v56  ;;  %v2638_v58 = vpop.f32.mrf.mxu0 }
 0xb04   : > { %v4104_v59 = vpop.f32.mrf.mxu1  ;;  %v2708_v60 = vsel %vm1978_vm5, %v2638_v58, -inf }
 0xb05   : > { %v2722_v63 = vmul.f32 1.442695, %v2714_v57  ;;  %2709 = vmax.xlane.f32.xlu1 %v2708_v60  ;;  %v4098_v2 = vpop.f32.mrf.mxu0 }
 0xb06   : > { %v2695_v3 = vpop.xlane.xlu0 %2694  ;;  %v2687_v4 = vpop.f32.mrf.mxu1 }
 0xb07   : > { %4541 = vpow2.f32 %v2722_v63  ;;  %v2715_v5 = vsub.f32 %v2408_v11, %v2695_v3  ;;  %v2641_v6 = vpop.f32.mrf.mxu0  ;;  %v2960_v23 = vpop.permute.xlu1 %2959 }
 0xb08   : > { %v4105_v7 = vpop.f32.mrf.mxu1 }
 0xb09   : > { %v2724_v9 = vmul.f32 1.442695, %v2715_v5  ;;  %v4099_v10 = vpop.f32.mrf.mxu0 }
 0xb0b   : > { %4543 = vpow2.f32 %v2724_v9 }
 0xb12   : > { %3006 = vrot.lane.b32.xlu0 %v5822_v52, %s5122_s11  ;;  %v2711_v52 = vsel %vm1978_vm5, %v5876_v54, -inf }
 0xb14   : > { %v5881_v12 = vpop.eup %4541 }
 0xb15   : > { %v2762_v14 = vpack.c.bf16 %v5881_v12, %v5881_v12  ;;  %v2738_v45 = vsel %vm1978_vm5, %v5881_v12, 0.0 }
 0xb16   : > { %3053 = vrot.lane.b32.xlu1 %v5838_v8, %s5122_s11 }
 0xb17   : > { %4109 = vmatmul.mubr.msk.bf16.vlgmr.msra.gmra.mxu0 %vm1978_vm5, %v2762_v14 }
 0xb18   : > { %v5888_v17 = vpop.eup %4543  ;;  %4119 = vmatpush3.bf16.msra.mxu0 %v2866_v39  ;;  %4120 = vmatprep.mubr.msk.bf16.mxu0 %vm5118_vm1, %v5117_v15 }
 0xb19   : > { %v2763_v18 = vpack.c.bf16 %v5888_v17, %v5888_v17  ;;  %4130 = vmatprep.subr.bf16.mxu0 %v5117_v15  ;;  %v2741_v56 = vsel %vm1978_vm5, %v5888_v17, 0.0 }
 0xb1b   : > { %4115 = vmatmul.mubr.msk.bf16.vlgmr.msra.gmra.mxu1 %vm1978_vm5, %v2763_v18 }
 0xb1c   : > { %4125 = vmatpush3.bf16.msra.mxu1 %v2913_v48  ;;  %4126 = vmatprep.mubr.msk.bf16.mxu1 %vm5118_vm1, %v5117_v15 }
 0xb1d   : > { %4136 = vmatprep.subr.bf16.mxu1 %v5117_v15 }
 0xb31   : > { %2712 = vmax.xlane.f32.xlu0 %v2711_v52 }
 0xb47   : > { %3100 = vrot.lane.b32.xlu0 %v5840_v16, %s5122_s11 }
 0xb7d   : > { %v2698_v8 = vpop.xlane.xlu0 %2697 }
 0xb7e   : > { %v2716_v20 = vsub.f32 %v5866_v22, %v2698_v8 }
 0xb80   : > { %v2726_v21 = vmul.f32 1.442695, %v2716_v20 }
 0xb81   : > { %v2701_v24 = vpop.xlane.xlu0 %2700 }
 0xb82   : > { %4545 = vpow2.f32 %v2726_v21  ;;  %v2717_v55 = vsub.f32 %v5868_v34, %v2701_v24 }
 0xb84   : > { %v2728_v19 = vmul.f32 1.442695, %v2717_v55 }
 0xb85   : > { %v2707_v62 = vpop.xlane.xlu0 %2706  ;;  %v2704_v25 = vpop.xlane.xlu1 %2703 }
 0xb86   : > { %4547 = vpow2.f32 %v2728_v19  ;;  %v2719_v26 = vsub.f32 %v2592_v40, %v2707_v62  ;;  %v2718_v27 = vsub.f32 %v2546_v43, %v2704_v25 }
 0xb88   : > { %v2732_v13 = vmul.f32 1.442695, %v2719_v26  ;;  %v2730_v11 = vmul.f32 1.442695, %v2718_v27 }
 0xb89   : > { %v3007_v38 = vpop.permute.xlu0 %3006 }
 0xb8a   : > { %4549 = vpow2.f32 %v2730_v11 }
 0xb8b   : > { %4551 = vpow2.f32 %v2732_v13 }
 0xb8e   : > { %v2710_v16 = vpop.xlane.xlu1 %2709 }
 0xb8f   : > { %v4546_v28 = vpop.eup %4545  ;;  %v2720_v29 = vsub.f32 %v2638_v58, %v2710_v16 }
 0xb90   : > { %v2744_v30 = vsel %vm1978_vm5, %v4546_v28, 0.0  ;;  %v2764_v32 = vpack.c.bf16 %v4546_v28, %v4546_v28 }
 0xb91   : > { %v2734_v33 = vmul.f32 1.442695, %v2720_v29  ;;  %2745 = vadd.xlane.f32.xlu1 %v2744_v30 }
 0xb92   : > { %4121 = vmatmul.mubr.msk.bf16.vlgmr.msra.gmra.mxu0 %vm1978_vm5, %v2764_v32  ;;  %v3054_v41 = vpop.permute.xlu1 %3053 }
 0xb93   : > { %v4548_v22 = vpop.eup %4547  ;;  %4553 = vpow2.f32 %v2734_v33  ;;  %4131 = vmatpush3.bf16.msra.mxu0 %v2960_v23  ;;  %4132 = vmatprep.mubr.msk.bf16.mxu0 %vm5118_vm1, %v5117_v15  ;;  %v4493_v23 = vld [vmem:[#allocation23 + $0x8] sm:$0xff]  }
 0xb94   : > { %v2747_v34 = vsel %vm1978_vm5, %v4548_v22, 0.0  ;;  %v2765_v36 = vpack.c.bf16 %v4548_v22, %v4548_v22  ;;  %4142 = vmatprep.subr.bf16.mxu0 %v5117_v15 }
 0xb95   : > { %2748 = vadd.xlane.f32.xlu0 %v2747_v34 }
 0xb96   : > { %4127 = vmatmul.mubr.msk.bf16.vlgmr.msra.gmra.mxu1 %vm1978_vm5, %v2765_v36 }
 0xb97   : > { %4137 = vmatpush3.bf16.msra.mxu1 %v3007_v38  ;;  %4138 = vmatprep.mubr.msk.bf16.mxu1 %vm5118_vm1, %v5117_v15  ;;  %v4550_v0 = vpop.eup %4549 }
 0xb98   : > { %4148 = vmatprep.subr.bf16.mxu1 %v5117_v15  ;;  %v4552_v61 = vpop.eup %4551  ;;  %v2750_v37 = vsel %vm1978_vm5, %v4550_v0, 0.0  ;;  %v2766_v39 = vpack.c.bf16 %v4550_v0, %v4550_v0 }
 0xb99   : > { %2751 = vadd.xlane.f32.xlu0 %v2750_v37  ;;  %v2767_v42 = vpack.c.bf16 %v4552_v61, %v4552_v61  ;;  %v2753_v1 = vsel %vm1978_vm5, %v4552_v61, 0.0 }
 0xb9a   : > { %4133 = vmatmul.mubr.msk.bf16.vlgmr.msra.gmra.mxu0 %vm1978_vm5, %v2766_v39  ;;  %v4494_v39 = vld [vmem:[#allocation23] sm:$0xff]  }
 0xb9b   : > { %4143 = vmatpush3.bf16.msra.mxu0 %v3054_v41  ;;  %4144 = vmatprep.mubr.msk.bf16.mxu0 %vm5118_vm1, %v5117_v15 }
 0xb9c   : > { %4154 = vmatprep.subr.bf16.mxu0 %v5117_v15 }
 0xb9d   : > { %2754 = vadd.xlane.f32.xlu0 %v2753_v1 }
 0xb9e   : > { %4139 = vmatmul.mubr.msk.bf16.vlgmr.msra.gmra.mxu1 %vm1978_vm5, %v2767_v42 }
 0xb9f   : > { %4150 = vmatprep.mubr.msk.bf16.mxu1 %vm5118_vm1, %v5117_v15 }
 0xba0   : > { %v4554_v43 = vpop.eup %4553 }
 0xba1   : > { %v2756_v40 = vsel %vm1978_vm5, %v4554_v43, 0.0  ;;  %v2768_v44 = vpack.c.bf16 %v4554_v43, %v4554_v43 }
 0xba2   : > { %2757 = vadd.xlane.f32.xlu1 %v2756_v40 }
 0xba3   : > { %4145 = vmatmul.mubr.msk.bf16.vlgmr.msra.gmra.mxu0 %vm1978_vm5, %v2768_v44 }
 0xba4   : > { %4158 = vmatprep.mubr.msk.bf16.mxu0 %vm5118_vm1, %v5117_v15  ;;  %4155 = vmatpush3.bf16.msra.mxu0 %v4493_v23 }
 0xba5   : > { %4156 = vmatprep.subr.bf16.mxu0 %v5117_v15 }
 0xba6   : > { %2739 = vadd.xlane.f32.xlu1 %v2738_v45 }
 0xba8   : > { %4157 = vmatpush3.bf16.msra.mxu0 %v4494_v39  ;;  %v3822_v39 = vld [vmem:[#allocation11] ss:$0 sm:$0xff] }
 0xba9   : > { %4170 = vmatprep.subr.bf16.mxu0 %v5117_v15 }
 0xbba   : > { %v2713_v46 = vpop.xlane.xlu0 %2712 }
 0xbbb   : > { %v2721_v47 = vsub.f32 %v5876_v54, %v2713_v46 }
 0xbbd   : > { %v2736_v48 = vmul.f32 1.442695, %v2721_v47 }
 0xbbe   : > { %v3101_v49 = vpop.permute.xlu0 %3100 }
 0xbbf   : > { %4555 = vpow2.f32 %v2736_v48  ;;  %4149 = vmatpush3.bf16.msra.mxu1 %v3101_v49 }
 0xbc0   : > { %4162 = vmatprep.subr.bf16.mxu1 %v5117_v15 }
 0xbcc   : > { %v4556_v50 = vpop.eup %4555 }
 0xbcd   : > { %v2759_v51 = vsel %vm1978_vm5, %v4556_v50, 0.0  ;;  %v2769_v53 = vpack.c.bf16 %v4556_v50, %v4556_v50 }
 0xbce   : > { %2760 = vadd.xlane.f32.xlu0 %v2759_v51 }
 0xbcf   : > { %4151 = vmatmul.mubr.msk.bf16.vlgmr.msra.gmra.mxu1 %vm1978_vm5, %v2769_v53 }
 0xbd0   : > { %4166 = vmatprep.mubr.msk.bf16.mxu1 %vm5118_vm1, %v5117_v15 }
 0xbd2   : > { %2742 = vadd.xlane.f32.xlu0 %v2741_v56 }
 0xbd7   : > { %v5938_v54 = vpop.f32.mrf.mxu0 }
 0xbd9   : > { %v4110_v57 = vpop.f32.mrf.mxu0 }
 0xbdb   : > { %v2814_v58 = vpop.f32.mrf.mxu0  ;;  %v5940_v59 = vpop.f32.mrf.mxu1 }
 0xbdd   : > { %v4111_v60 = vpop.f32.mrf.mxu0  ;;  %v4116_v63 = vpop.f32.mrf.mxu1 }
 0xbdf   : > { %v2861_v2 = vpop.f32.mrf.mxu1 }
 0xbe1   : > { %v4117_v3 = vpop.f32.mrf.mxu1 }
 0xc1a   : > { %v2746_v5 = vpop.xlane.xlu1 %2745 }
 0xc1b   : > { %4557 = vrcp.f32 %v2746_v5 }
 0xc1e   : > { %v2749_v4 = vpop.xlane.xlu0 %2748 }
 0xc1f   : > { %4559 = vrcp.f32 %v2749_v4 }
 0xc22   : > { %v2752_v6 = vpop.xlane.xlu0 %2751 }
 0xc23   : > { %4561 = vrcp.f32 %v2752_v6 }
 0xc26   : > { %v2755_v7 = vpop.xlane.xlu0 %2754 }
 0xc27   : > { %4563 = vrcp.f32 %v2755_v7 }
 0xc28   : > { %v4558_v12 = vpop.eup %4557 }
 0xc2b   : > { %v2758_v61 = vpop.xlane.xlu1 %2757 }
 0xc2c   : > { %v4560_v14 = vpop.eup %4559  ;;  %4565 = vrcp.f32 %v2758_v61 }
 0xc2f   : > { %v2740_v48 = vpop.xlane.xlu1 %2739 }
 0xc30   : > { %v4562_v25 = vpop.eup %4561 }
 0xc34   : > { %v4564_v27 = vpop.eup %4563 }
 0xc39   : > { %v4566_v41 = vpop.eup %4565 }
 0xc52   : > { %v2905_v9 = vpop.f32.mrf.mxu0 }
 0xc53   : > { %v3156_v52 = vmul.f32 %v4558_v12, %v2905_v9 }
 0xc54   : > { %v4122_v10 = vpop.f32.mrf.mxu0 }
 0xc56   : > { %v2908_v17 = vpop.f32.mrf.mxu0  ;;  %v2952_v18 = vpop.f32.mrf.mxu1 }
 0xc57   : > { %v3157_v8 = vmul.f32 %v4560_v14, %v2952_v18  ;;  %v2761_v37 = vpop.xlane.xlu0 %2760 }
 0xc58   : > { %v4123_v20 = vpop.f32.mrf.mxu0  ;;  %v4128_v21 = vpop.f32.mrf.mxu1  ;;  %4567 = vrcp.f32 %v2761_v37 }
 0xc59   : > { %v4470_v24 = vpack.i.bf16 %v3157_v8, %v3156_v52  ;;  %4569 = vrcp.f32 %v2740_v48  ;;  %v4498_v48 = vld [vmem:[%s6070_s20 + $0x10] sm:$0xff]  }
 0xc5a   : > { %v2955_v55 = vpop.f32.mrf.mxu1  ;;  %v2999_v19 = vpop.f32.mrf.mxu0 }
 0xc5b   : > { %4471 = vrot.lane.b32.xlu1 %v4470_v24, %s5125_s27  ;;  %v3158_v11 = vmul.f32 %v4562_v25, %v2999_v19  ;;  %v2743_v49 = vpop.xlane.xlu0 %2742 }
 0xc5c   : > { %v4129_v62 = vpop.f32.mrf.mxu1  ;;  %v4134_v26 = vpop.f32.mrf.mxu0  ;;  %4571 = vrcp.f32 %v2743_v49  ;;  %v4499_v49 = vld [vmem:[%s6070_s20 + $0x8] sm:$0xff]  }
 0xc5e   : > { %v3046_v13 = vpop.f32.mrf.mxu1  ;;  %v3002_v16 = vpop.f32.mrf.mxu0 }
 0xc5f   : > { %v3159_v28 = vmul.f32 %v4564_v27, %v3046_v13 }
 0xc60   : > { %v4140_v29 = vpop.f32.mrf.mxu1  ;;  %v4135_v32 = vpop.f32.mrf.mxu0 }
 0xc61   : > { %v4475_v30 = vpack.i.bf16 %v3159_v28, %v3158_v11  ;;  %v4496_v32 = vld [vmem:[#allocation26] sm:$0xff]  }
 0xc62   : > { %v3049_v33 = vpop.f32.mrf.mxu1 }
 0xc63   : > { %v3093_v22 = vpop.f32.mrf.mxu0  ;;  %4476 = vrot.lane.b32.xlu0 %v4475_v30, %s5126_s26  ;;  %v4495_v30 = vld [vmem:[#allocation26 + $0x8] sm:$0xff]   ;;  %s4999_s26 = scalar_lea.vmem %s6005_s24, 256 }
 0xc64   : > { %v4141_v34 = vpop.f32.mrf.mxu1  ;;  %v3160_v43 = vmul.f32 %v4566_v41, %v3093_v22  ;;  %4163 = vmatpush3.bf16.msra.mxu1 %v4495_v30  ;;  %p5000_p12 = scmp.ne.s32.totalorder %s6005_s24, %s4999_s26 }
 0xc65   : > { %v4146_v36 = vpop.f32.mrf.mxu0  ;;  %v4568_v42 = vpop.eup %4567  ;;  %4164 = vmatprep.subr.bf16.mxu1 %v5117_v15 }
 0xc66   : > { %v4570_v51 = vpop.eup %4569  ;;  %p5001_p3 = pnand %p5000_p12, %p6143_p1 }
 0xc67   : > { %v3096_v38 = vpop.f32.mrf.mxu0  ;;  %v3154_v2 = vmul.f32 %v4570_v51, %v5938_v54  ;;  %v3818_v54 = vld [vmem:[#allocation25] ss:$0 sm:$0xff]  ;;  %v3824_v51 = vld [vmem:[%s6140_s6] ss:$0 sm:$0xff]  ;;  %s5128_s6 = smov [#allocation28]  }
 0xc68   : > { %4165 = vmatpush3.bf16.msra.mxu1 %v4496_v32  ;;  %p5002_p4 = pneg %p5001_p3  ;;  %s5003_s21 = sshll.u32 %s5128_s6, 4  ;;  %s5004_s21 = int_to_ptr.vmem [resolvable:$false] %s5003_s21 }
 0xc69   : > { %v4147_v0 = vpop.f32.mrf.mxu0  ;;  %v4572_v56 = vpop.eup %4571  ;;  %p5006_p13 = scmp.lt.s32.totalorder %s6005_s24, %s5004_s21 }
 0xc6a   : > { %v3155_v3 = vmul.f32 %v4572_v56, %v5940_v59 }
 0xc8f   : > { %v3140_v1 = vpop.f32.mrf.mxu1 }
 0xc90   : > { %v3161_v40 = vmul.f32 %v4568_v42, %v3140_v1 }
 0xc91   : > { %v4152_v44 = vpop.f32.mrf.mxu1 }
 0xc92   : > { %v4480_v45 = vpack.i.bf16 %v3161_v40, %v3160_v43  ;;  %v3823_v43 = vld [vmem:[#allocation13] ss:$0 sm:$0xff] }
 0xc93   : > { %v3143_v46 = vpop.f32.mrf.mxu1 }
 0xc94   : > { %4481 = vrot.lane.b32.xlu1 %v4480_v45, %s5127_s25  ;;  %s5005_s25 = scalar_lea.vmem %s5004_s21, 512 }
 0xc95   : > { %v4153_v47 = vpop.f32.mrf.mxu1  ;;  %p5007_p2 = scmp.lt.s32.totalorder %s5005_s25, %s4999_s26 }
 0xc96   : > { %v4497_v47 = vld [vmem:[%s6070_s20 + $0x18] sm:$0xff]  }
 0xc97   : > { %p5008_p5 = por %p5007_p2, %p5006_p13 }
 0xc99   : > { %p5009_p10 = pnand %p5008_p5, %p5002_p4 }
 0xccd   : > { %v4472_v50 = vpop.permute.xlu1 %4471 }
 0xcce   : > { %v4474_v57 = vunpack.i.h.bf16 %v4472_v50  ;;  %v4473_v58 = vunpack.i.l.bf16 %v4472_v50  ;;  %v4500_v50 = vld [vmem:[%s6070_s20] sm:$0xff]  }
 0xcd0   : > { %v3187_v5 = vsel %vm1081_vm2, %v3155_v3, %v4474_v57  ;;  %v3186_v6 = vsel %vm1081_vm2, %v3154_v2, %v4473_v58 }
 0xcd5   : > { %v4477_v53 = vpop.permute.xlu0 %4476 }
 0xcd6   : > { %v4479_v60 = vunpack.i.h.bf16 %v4477_v53  ;;  %v4478_v63 = vunpack.i.l.bf16 %v4477_v53 }
 0xcd8   : > { %v3189_v10 = vsel %vm1978_vm5, %v3187_v5, %v4479_v60  ;;  %v3188_v12 = vsel %vm1978_vm5, %v3186_v6, %v4478_v63 }
 0xd06   : > { %v4482_v4 = vpop.permute.xlu1 %4481 }
 0xd07   : > { %v4484_v7 = vunpack.i.h.bf16 %v4482_v4  ;;  %v4483_v9 = vunpack.i.l.bf16 %v4482_v4 }
 0xd09   : > { %v3191_v14 = vsel %vm1981_vm6, %v3189_v10, %v4484_v7  ;;  %v3190_v17 = vsel %vm1981_vm6, %v3188_v12, %v4483_v9 }
 0xd0a   : > { %v3192_v18 = vpack.c.bf16 %v3191_v14, %v3190_v17 }
 0xd0c   : > { %4159 = vmatmul.mubr.msk.bf16.vlgmr.msra.gmra.mxu0 %vm936_vm0, %v3192_v18 }
 0xd0d   : > { %4178 = vmatprep.mubr.msk.bf16.mxu0 %vm5118_vm1, %v5117_v15  ;;  %4171 = vmatpush3.bf16.msra.mxu0 %v4497_v47 }
 0xd0e   : > { %4172 = vmatprep.subr.bf16.mxu0 %v5117_v15 }
 0xd11   : > { %4173 = vmatpush3.bf16.msra.mxu0 %v4498_v48 }
 0xd12   : > { %4174 = vmatprep.subr.bf16.mxu0 %v5117_v15 }
 0xd15   : > { %4175 = vmatpush3.bf16.msra.mxu0 %v4499_v49 }
 0xd16   : > { %4176 = vmatprep.subr.bf16.mxu0 %v5117_v15 }
 0xd19   : > { %4177 = vmatpush3.bf16.msra.mxu0 %v4500_v50 }
 0xdcc   : > { %v3253_v59 = vpop.f32.mrf.mxu0 }
 0xdcd   : > { %v3254_v52 = vadd.f32 %v3818_v54, %v3253_v59 }
 0xdce   : > { %v4160_v8 = vpop.f32.mrf.mxu0 }
 0xdcf   : > { %v5959_v20 = vadd.f32 %v3254_v52, %v5768_v31 }
 0xdd0   : > { %v3256_v21 = vpop.f32.mrf.mxu0 }
 0xdd1   : > { %v3257_v23 = vadd.f32 %v3818_v54, %v3256_v21  ;;  %v3262_v24 = vsel %vm936_vm0, %v5959_v20, 0.0 }
 0xdd2   : > { %3263 = vadd.xlane.f32.xlu1 %v3262_v24  ;;  %v4161_v55 = vpop.f32.mrf.mxu0  ;;  %v3828_v24 = vld [vmem:[%s6141_s7] ss:$0 sm:$0xff] }
 0xdd3   : > { %v5964_v19 = vadd.f32 %v3257_v23, %v5773_v35 }
 0xdd5   : > { %v3265_v62 = vsel %vm936_vm0, %v5964_v19, 0.0 }
 0xdd6   : > { %3266 = vadd.xlane.f32.xlu0 %v3265_v62 }
 0xe5b   : > { %v3264_v25 = vpop.xlane.xlu1 %3263 }
 0xe5c   : > { %v3268_v26 = vmul.f32 0.03125, %v3264_v25 }
 0xe5e   : > { %v3270_v27 = vsub.f32 %v5959_v20, %v3268_v26 }
 0xe5f   : > { %v3267_v31 = vpop.xlane.xlu0 %3266 }
 0xe60   : > { %v3269_v13 = vmul.f32 0.03125, %v3267_v31  ;;  %v3272_v11 = vmul.f32 %v3270_v27, %v3270_v27 }
 0xe62   : > { %v3271_v16 = vsub.f32 %v5964_v19, %v3269_v13  ;;  %v3274_v28 = vsel %vm936_vm0, %v3272_v11, 0.0 }
 0xe63   : > { %3275 = vadd.xlane.f32.xlu0 %v3274_v28 }
 0xe64   : > { %v3273_v29 = vmul.f32 %v3271_v16, %v3271_v16 }
 0xe66   : > { %v3277_v35 = vsel %vm936_vm0, %v3273_v29, 0.0 }
 0xe67   : > { %3278 = vadd.xlane.f32.xlu1 %v3277_v35 }
 0xeec   : > { %v3276_v33 = vpop.xlane.xlu0 %3275 }
 0xeed   : > { %v3280_v22 = vmul.f32 0.03125, %v3276_v33 }
 0xeef   : > { %v3283_v34 = vadd.f32 1e-12, %v3280_v22 }
 0xef0   : > { %v3279_v36 = vpop.xlane.xlu1 %3278 }
 0xef1   : > { %4573 = vrsqrt.f32 %v3283_v34  ;;  %v3281_v38 = vmul.f32 0.03125, %v3279_v36 }
 0xef3   : > { %v3284_v0 = vadd.f32 1e-12, %v3281_v38 }
 0xef5   : > { %4575 = vrsqrt.f32 %v3284_v0 }
 0xefe   : > { %v4574_v61 = vpop.eup %4573 }
 0xeff   : > { %v3287_v37 = vmul.f32 %v4574_v61, %v3270_v27 }
 0xf01   : > { %v3295_v1 = vmul.f32 %v3822_v39, %v3287_v37 }
 0xf02   : > { %v4576_v41 = vpop.eup %4575 }
 0xf03   : > { %v3288_v42 = vmul.f32 %v4576_v41, %v3271_v16  ;;  %v3304_v44 = vadd.f32 %v3823_v43, %v3295_v1 }
 0xf05   : > { %v3296_v40 = vmul.f32 %v3822_v39, %v3288_v42 }
 0xf07   : > { %v3305_v45 = vadd.f32 %v3823_v43, %v3296_v40 }
 0xf09   : > { %v3306_v46 = vpack.c.bf16 %v3305_v45, %v3304_v44 }
 0xf0b   : > { %4167 = vmatmul.mubr.msk.bf16.vlgmr.msra.gmra.mxu1 %vm936_vm0, %v3306_v46 }
 0xfcb   : > { %v3367_v53 = vpop.f32.mrf.mxu1 }
 0xfcc   : > { %v3368_v56 = vadd.f32 %v3824_v51, %v3367_v53 }
 0xfcd   : > { %v4168_v57 = vpop.f32.mrf.mxu1 }
 0xfce   : > { %v3376_v58 = vmul.f32 0.044715, %v3368_v56  ;;  %v3374_v54 = vmul.f32 0.5, %v3368_v56 }
 0xfcf   : > { %v3370_v60 = vpop.f32.mrf.mxu1 }
 0xfd0   : > { %v3378_v63 = vmul.f32 %v3376_v58, %v3368_v56  ;;  %v3371_v2 = vadd.f32 %v3824_v51, %v3370_v60 }
 0xfd1   : > { %v4169_v3 = vpop.f32.mrf.mxu1 }
 0xfd2   : > { %v3380_v4 = vmul.f32 %v3378_v63, %v3368_v56  ;;  %v3377_v5 = vmul.f32 0.044715, %v3371_v2  ;;  %v3375_v59 = vmul.f32 0.5, %v3371_v2 }
 0xfd4   : > { %v3382_v6 = vadd.f32 %v3380_v4, %v3368_v56  ;;  %v3379_v7 = vmul.f32 %v3377_v5, %v3371_v2 }
 0xfd6   : > { %v3384_v9 = vmul.f32 0.7978846, %v3382_v6  ;;  %v3381_v10 = vmul.f32 %v3379_v7, %v3371_v2 }
 0xfd8   : > { %4577 = vtanh.f32 %v3384_v9  ;;  %v3383_v15 = vadd.f32 %v3381_v10, %v3371_v2 }
 0xfda   : > { %v3385_v12 = vmul.f32 0.7978846, %v3383_v15 }
 0xfdc   : > { %4579 = vtanh.f32 %v3385_v12 }
 0xfe5   : > { %v4578_v14 = vpop.eup %4577 }
 0xfe6   : > { %v3388_v17 = vadd.f32 1.0, %v4578_v14 }
 0xfe8   : > { %v3390_v8 = vmul.f32 %v3388_v17, %v3374_v54 }
 0xfe9   : > { %v4580_v18 = vpop.eup %4579 }
 0xfea   : > { %v3389_v52 = vadd.f32 1.0, %v4580_v18 }
 0xfec   : > { %v3391_v21 = vmul.f32 %v3389_v52, %v3375_v59 }
 0xfee   : > { %v3392_v23 = vpack.c.bf16 %v3391_v21, %v3390_v8 }
 0xff0   : > { %4179 = vmatmul.mubr.msk.bf16.vlgmr.msra.gmra.mxu0 %vm3432_vm7, %v3392_v23 }
0x10b0   : > { %v3470_v55 = vpop.f32.mrf.mxu0 }
0x10b1   : > { %v3471_v62 = vadd.f32 %v3828_v24, %v3470_v55 }
0x10b2   : > { %v4180_v25 = vpop.f32.mrf.mxu0 }
0x10b3   : > { %v3477_v26 = vadd.f32 %v3471_v62, %v5959_v20 }
0x10b4   : > { %v3473_v27 = vpop.f32.mrf.mxu0 }
0x10b5   : > { %3479 = vst.msk [vmem:[%s914_s15] sm:$0xff] %vm936_vm0, %v3477_v26  ;;  %v3474_v31 = vadd.f32 %v3828_v24, %v3473_v27 }
0x10b6   : > { %v4181_v13 = vpop.f32.mrf.mxu0 }
0x10b7   : > { %v3478_v11 = vadd.f32 %v3474_v31, %v5964_v19 }
0x10b9   : > { %3480 = vst.msk [vmem:[%s914_s15 + $0x8] sm:$0xff] %vm936_vm0, %v3478_v11 }
0x10ba   : > { %5012 = shalt.err (!%p5009_p10)
}
0x10bb   : > { %s5013_s7 = scalar_lea.hbm %s6002_s9, 256  ;;  %s5017_s15 = scalar_lea.hbm %s6142_s1, 512 }
0x10bc   : > { %p5014_p11 = scmp.ne.s32.totalorder %s6002_s9, %s5013_s7  ;;  %p5018_p6 = scmp.lt.s32.totalorder %s6002_s9, %s6142_s1 }
0x10bd   : > { %p5019_p8 = scmp.lt.s32.totalorder %s5017_s15, %s5013_s7 }
0x10be   : > { %p5015_p7 = pnand %p5014_p11, %p6143_p1 }
0x10bf   : > { %p5020_p9 = por %p5019_p8, %p5018_p6 }
0x10c0   : > { %p5016_p0 = pneg %p5015_p7 }
0x10c2   : > { %p5021_p12 = pnand %p5020_p9, %p5016_p0 }
0x10c4   : > { %5024 = shalt.err (!%p5021_p12)
}
0x10c5   : > { %s5129_s26 = smov 128  }
0x10c6   : > { %4244 = dma.vmem_to_hbm [thread:$0]  (%p6143_p1), %s6005_s24, 256, %s6002_s9, %s3482_s23, %s5129_s26, %s5129_s26, %s5125_s27  }
0x10c7 PF: > { %s3510_s6 = sand.u32 1, %s5083_s3   ;;  %p6144_p3 = scmp.ne.s32.totalorder %s6118_s22, 0 }
0x10c8   : > { %p6145_p4 = scmp.ge.s32.totalorder %s5095_s30, 2  ;;  %s3511_s21 = scalar_lea.sflag [#allocation4], %s3510_s6 }
0x10ca   : > { %p4297_p13 = pnand %p6145_p4, %p6144_p3 }
0x10cc   : > { %p4298_p2 = pneg %p4297_p13 }
0x10ce   : > { %5078 = dma.done.wait (%p4298_p2), %s3511_s21, 256  }
0x10cf   : > { %5080 = vsyncadd (%p4298_p2), %s3511_s21, 4294967040  ;;  %p43_p5 = scmp.ge.s32.totalorder %s5428_s4, 4   ;;  %s6146_s3 = smov %s5087_s28 }
0x10d0   : > { %s6147_s28 = smov %s5091_s29  ;;  %s6148_s29 = smov %s5440_s19 }
0x10d1   : > { %s6149_s30 = smov %s5428_s4  ;;  %45 = sbr.rel (!%p43_p5) target bundleno = 31 (0x1f), region = 216 }
0x10d6   :  { %3516 = vsyncpa [#allocation3], 1 }
0x10d7   :  { %3518 = vsyncpa [#allocation3 + $0x1], 1 }
0x10d8   :  { %3519 = vsyncpa [#allocation6], 1 }
0x10d9   :  { %3520 = vsyncpa [#allocation9], 1 }
0x10da   :  { %3521 = vsyncpa [#allocation12], 1 }
0x10db   :  { %3522 = vsyncpa [#allocation15], 1 }
0x10dc   :  { %3523 = vsyncpa [#allocation18], 1 }
0x10dd   :  { %3524 = vsyncpa [#allocation21], 1 }
0x10de   :  { %3525 = vsyncpa [#allocation24], 1 }
0x10df   :  { %3526 = vsyncpa [#allocation27], 1 }
0x10e0   :  { %3527 = vsyncpa [#allocation4], 1 }
0x10e1   :  { %3529 = vsyncpa [#allocation4 + $0x1], 1 }

</bundles_post_ra>
